<compile_context>
chip_gen: v7x
topology: tpu7x:2x2x1
jax: 0.10.0
libtpu: 0.0.40
codegen_flags: <defaults>
</compile_context>

<pallas_src>
import jax
import jax.numpy as jnp
import numpy as np
from jax.experimental import pallas as pl
from jax.experimental.pallas import tpu as pltpu

LANE = 128  # TPU vreg lane width — channel dim is padded up to this


def _conv3x3_same(xp, w_ref, H, W, cin3, cout):
    """3x3 / stride-1 conv over a value with a 1-pixel zero halo.

    xp    : (H+2, W+2, Cp) value (zero halo already in place)
    w_ref : Ref of shape (3, 3*Cp, Cp) — kw taps folded into contraction dim
    returns (H*W, Cp) float32 accumulator.
    """
    acc = jnp.zeros((H * W, cout), jnp.float32)
    for kh in range(3):
        rows = xp[kh:kh + H]  # (H, W+2, Cp) — outer-dim slice, cheap
        # Build the (H*W, 3*Cp) patch: three kw-shifted views concatenated
        # along the (128-aligned) lane axis.
        patch = jnp.concatenate(
            [rows[:, kw:kw + W, :].reshape(H * W, cout) for kw in range(3)],
            axis=-1)
        acc = acc + jnp.dot(patch, w_ref[kh],
                            preferred_element_type=jnp.float32)
    return acc


def basic_block_kernel(x_ref, w1_ref, s1_ref, b1_ref, w2_ref, s2_ref, b2_ref,
                       out_ref, mid_ref):
    # x_ref:   (1, H+2, W+2, Cp)  spatially zero-padded, channel-padded input
    # w*_ref:  (3, 3*Cp, Cp)      conv weights, kw folded into contraction
    # s*/b*:   (1, Cp)            folded BN scale / bias (f32)
    # out_ref: (1, H, W, Cp)      f32 output (channel-padded)
    # mid_ref: (H+2, W+2, Cp)     VMEM scratch for the conv2 input (w/ halo)
    _, Hp, Wp, Cp = x_ref.shape
    H, W = Hp - 2, Wp - 2

    x = x_ref[0]  # (Hp, Wp, Cp)

    # ---- conv1: 3 fat matmuls (K = 3*Cp) ----
    acc1 = _conv3x3_same(x, w1_ref, H, W, 3 * Cp, Cp)

    # ---- bn1 (inference affine) + relu, in f32 ----
    y1 = jnp.maximum(acc1 * s1_ref[...] + b1_ref[...], 0.0)

    # ---- stage conv2 input: zero only the 1-px halo strips, then write the
    #      interior (interior is fully overwritten every grid step, so this
    #      is correct regardless of how the batch axis is core-sharded) ----
    zrow = jnp.zeros((1, Wp, Cp), mid_ref.dtype)
    zcol = jnp.zeros((Hp, 1, Cp), mid_ref.dtype)
    mid_ref[0:1, :, :] = zrow
    mid_ref[Hp - 1:Hp, :, :] = zrow
    mid_ref[:, 0:1, :] = zcol
    mid_ref[:, Wp - 1:Wp, :] = zcol
    mid_ref[1:H + 1, 1:W + 1, :] = y1.reshape(H, W, Cp).astype(mid_ref.dtype)

    # ---- conv2: 3 fat matmuls (K = 3*Cp) ----
    acc2 = _conv3x3_same(mid_ref[...], w2_ref, H, W, 3 * Cp, Cp)

    # ---- bn2 + residual add (downsample is None) + relu, in f32 ----
    y2 = acc2 * s2_ref[...] + b2_ref[...]
    identity = x[1:H + 1, 1:W + 1, :].reshape(H * W, Cp).astype(jnp.float32)
    out = jnp.maximum(y2 + identity, 0.0)
    out_ref[...] = out.reshape(1, H, W, Cp).astype(out_ref.dtype)


def basic_block_forward(x_nchw, w1, s1, b1, w2, s2, b2,
                        *, compute_dtype=jnp.float32):
    """x_nchw: (N, C, H, W) float32.  Returns (N, C, H, W) float32.

    compute_dtype=jnp.bfloat16 halves activation/weight bytes and doubles MXU
    rate on v6e/v7x; accumulation, BN and the residual add remain f32.
    """
    N, C, H, W = x_nchw.shape
    planes = w1.shape[-1]
    assert C == w1.shape[2] and planes == C, \
        "identity path requires inplanes == planes (stride=1, downsample=None)"

    # Lane-dense channel padding (multiple of 128).
    Cp = -(-C // LANE) * LANE
    Hp, Wp = H + 2, W + 2

    # NHWC, spatial zero pad for conv1, channel pad to Cp.
    x = jnp.transpose(x_nchw, (0, 2, 3, 1)).astype(compute_dtype)
    x_pad = jnp.pad(x, ((0, 0), (1, 1), (1, 1), (0, Cp - C)))

    def prep_w(w):
        # (3, 3, C, planes) -> pad channels -> (3, 3*Cp, Cp) with the kw taps
        # stacked along the contraction (input-channel) axis, matching the
        # in-kernel patch concatenation order.
        wp = jnp.pad(w, ((0, 0), (0, 0), (0, Cp - C), (0, Cp - planes)))
        return wp.astype(compute_dtype).reshape(3, 3 * Cp, Cp)

    def prep_sb(v):
        return jnp.pad(v, ((0, 0), (0, Cp - planes))).astype(jnp.float32)

    w1r, w2r = prep_w(w1), prep_w(w2)
    s1p, b1p, s2p, b2p = prep_sb(s1), prep_sb(b1), prep_sb(s2), prep_sb(b2)

    itemsize = jnp.dtype(compute_dtype).itemsize
    flops = 4 * N * H * W * 9 * Cp * Cp  # 2 convs x 2 flops/MAC
    bytes_accessed = (N * Hp * Wp * Cp * itemsize        # input
                      + 2 * 3 * 3 * Cp * Cp * itemsize   # weights
                      + 4 * Cp * 4                       # BN scale/bias
                      + N * H * W * Cp * 4)              # output

    out_nhwc = pl.pallas_call(
        basic_block_kernel,
        out_shape=jax.ShapeDtypeStruct((N, H, W, Cp), jnp.float32),
        grid_spec=pltpu.PrefetchScalarGridSpec(
            num_scalar_prefetch=0,
            grid=(N,),
            in_specs=[
                pl.BlockSpec((1, Hp, Wp, Cp), lambda b: (b, 0, 0, 0)),
                pl.BlockSpec((3, 3 * Cp, Cp), lambda b: (0, 0, 0)),
                pl.BlockSpec((1, Cp), lambda b: (0, 0)),
                pl.BlockSpec((1, Cp), lambda b: (0, 0)),
                pl.BlockSpec((3, 3 * Cp, Cp), lambda b: (0, 0, 0)),
                pl.BlockSpec((1, Cp), lambda b: (0, 0)),
                pl.BlockSpec((1, Cp), lambda b: (0, 0)),
            ],
            out_specs=pl.BlockSpec((1, H, W, Cp), lambda b: (b, 0, 0, 0)),
            scratch_shapes=[pltpu.VMEM((Hp, Wp, Cp), compute_dtype)],
        ),
        compiler_params=pltpu.CompilerParams(
            dimension_semantics=("parallel",),
            vmem_limit_bytes=32 * 1024 * 1024,
        ),
        cost_estimate=pl.CostEstimate(
            flops=int(flops), transcendentals=0,
            bytes_accessed=int(bytes_accessed)),
    )(x_pad, w1r, s1p, b1p, w2r, s2p, b2p)

    # Drop channel padding, back to NCHW.
    return jnp.transpose(out_nhwc[..., :C], (0, 3, 1, 2))


def reference_forward(x_nchw, w1, s1, b1, w2, s2, b2):
    """Plain-JAX reference (lax.conv) for verification."""
    x = jnp.transpose(x_nchw, (0, 2, 3, 1))
    dn = ('NHWC', 'HWIO', 'NHWC')
    y = jax.lax.conv_general_dilated(x, w1, (1, 1), 'SAME', dimension_numbers=dn)
    y = jnp.maximum(y * s1 + b1, 0.0)
    y = jax.lax.conv_general_dilated(y, w2, (1, 1), 'SAME', dimension_numbers=dn)
    y = y * s2 + b2 + x
    y = jnp.maximum(y, 0.0)
    return jnp.transpose(y, (0, 3, 1, 2))


def init_params(key, inplanes, planes, eps=1e-5):
    """Deterministic synthetic parameters (HWIO conv weights + folded BN)."""
    k = jax.random.split(key, 8)
    w1 = jax.random.normal(k[0], (3, 3, inplanes, planes), jnp.float32) * 0.1
    w2 = jax.random.normal(k[1], (3, 3, planes, planes), jnp.float32) * 0.1
    g1 = 1.0 + 0.1 * jax.random.normal(k[2], (planes,), jnp.float32)
    be1 = 0.1 * jax.random.normal(k[3], (planes,), jnp.float32)
    m1 = 0.1 * jax.random.normal(k[4], (planes,), jnp.float32)
    v1 = jnp.abs(jax.random.normal(k[5], (planes,), jnp.float32)) + 0.5
    g2 = 1.0 + 0.1 * jax.random.normal(k[6], (planes,), jnp.float32)
    be2 = 0.1 * jax.random.normal(k[7], (planes,), jnp.float32)
    m2 = jnp.zeros((planes,), jnp.float32)
    v2 = jnp.ones((planes,), jnp.float32)
    s1 = (g1 / jnp.sqrt(v1 + eps)).reshape(1, planes)
    b1 = (be1 - m1 * g1 / jnp.sqrt(v1 + eps)).reshape(1, planes)
    s2 = (g2 / jnp.sqrt(v2 + eps)).reshape(1, planes)
    b2 = (be2 - m2 * g2 / jnp.sqrt(v2 + eps)).reshape(1, planes)
    return w1, s1, b1, w2, s2, b2


if __name__ == "__main__":
    N, C, H, W = 2, 8, 16, 16   # inplanes == planes, stride=1, downsample=None
    key = jax.random.PRNGKey(0)
    kx, kp = jax.random.split(key)
    x = jax.random.normal(kx, (N, C, H, W), jnp.float32)
    params = init_params(kp, C, C)

    out = jax.block_until_ready(basic_block_forward(x, *params))
    ref = jax.block_until_ready(reference_forward(x, *params))

    np.testing.assert_allclose(np.asarray(out), np.asarray(ref),
                               rtol=1e-4, atol=1e-4)
    print("KERNEL_OK")
</pallas_src>

<mosaic_0001>
module attributes {stable_mosaic.version = 11 : i64} {
  func.func @basic_block_kernel(%arg0: i32, %arg1: memref<1x18x18x128xf32, #tpu.memory_space<vmem>>, %arg2: memref<3x384x128xf32, #tpu.memory_space<vmem>>, %arg3: memref<1x128xf32, #tpu.memory_space<vmem>>, %arg4: memref<1x128xf32, #tpu.memory_space<vmem>>, %arg5: memref<3x384x128xf32, #tpu.memory_space<vmem>>, %arg6: memref<1x128xf32, #tpu.memory_space<vmem>>, %arg7: memref<1x128xf32, #tpu.memory_space<vmem>>, %arg8: memref<1x16x16x128xf32, #tpu.memory_space<vmem>>, %arg9: memref<18x18x128xf32, #tpu.memory_space<vmem>>) attributes {dimension_semantics = [#tpu.dimension_semantics<parallel>], iteration_bounds = array<i64: 2>, scalar_prefetch = 0 : i64, scratch_operands = 1 : i64, tpu.core_type = #tpu.core_type<tc>, window_params = [{transform_indices = @transform_0, window_bounds = array<i64: 1, 18, 18, 128>}, {pipeline_mode = #tpu.pipeline_mode<synchronous>, transform_indices = @transform_1, window_bounds = array<i64: 3, 384, 128>}, {pipeline_mode = #tpu.pipeline_mode<synchronous>, transform_indices = @transform_2, window_bounds = array<i64: 1, 128>}, {pipeline_mode = #tpu.pipeline_mode<synchronous>, transform_indices = @transform_3, window_bounds = array<i64: 1, 128>}, {pipeline_mode = #tpu.pipeline_mode<synchronous>, transform_indices = @transform_4, window_bounds = array<i64: 3, 384, 128>}, {pipeline_mode = #tpu.pipeline_mode<synchronous>, transform_indices = @transform_5, window_bounds = array<i64: 1, 128>}, {pipeline_mode = #tpu.pipeline_mode<synchronous>, transform_indices = @transform_6, window_bounds = array<i64: 1, 128>}, {transform_indices = @transform_7, window_bounds = array<i64: 1, 16, 16, 128>}]} {
    %c0 = arith.constant 0 : index
    %c0_0 = arith.constant 0 : index
    %c0_1 = arith.constant 0 : index
    %c0_2 = arith.constant 0 : index
    %0 = vector.load %arg1[%c0, %c0_0, %c0_1, %c0_2] : memref<1x18x18x128xf32, #tpu.memory_space<vmem>>, vector<1x18x18x128xf32>
    %1 = vector.shape_cast %0 : vector<1x18x18x128xf32> to vector<18x18x128xf32>
    %cst = arith.constant 0.000000e+00 : f32
    %2 = vector.broadcast %cst : f32 to vector<256x128xf32>
    %3 = vector.extract_strided_slice %1 {offsets = [0, 0, 0], sizes = [16, 18, 128], strides = [1, 1, 1]} : vector<18x18x128xf32> to vector<16x18x128xf32>
    %4 = vector.extract_strided_slice %3 {offsets = [0, 0, 0], sizes = [16, 16, 128], strides = [1, 1, 1]} : vector<16x18x128xf32> to vector<16x16x128xf32>
    %5 = vector.shape_cast %4 : vector<16x16x128xf32> to vector<256x128xf32>
    %6 = vector.extract_strided_slice %3 {offsets = [0, 1, 0], sizes = [16, 16, 128], strides = [1, 1, 1]} : vector<16x18x128xf32> to vector<16x16x128xf32>
    %7 = vector.shape_cast %6 : vector<16x16x128xf32> to vector<256x128xf32>
    %8 = vector.extract_strided_slice %3 {offsets = [0, 2, 0], sizes = [16, 16, 128], strides = [1, 1, 1]} : vector<16x18x128xf32> to vector<16x16x128xf32>
    %9 = vector.shape_cast %8 : vector<16x16x128xf32> to vector<256x128xf32>
    %10 = tpu.concatenate %5, %7, %9 in 1 : vector<256x128xf32>, vector<256x128xf32>, vector<256x128xf32> -> vector<256x384xf32>
    %c0_3 = arith.constant 0 : index
    %c0_4 = arith.constant 0 : index
    %c0_5 = arith.constant 0 : index
    %11 = vector.load %arg2[%c0_3, %c0_4, %c0_5] : memref<3x384x128xf32, #tpu.memory_space<vmem>>, vector<1x384x128xf32>
    %12 = vector.shape_cast %11 : vector<1x384x128xf32> to vector<384x128xf32>
    %cst_6 = arith.constant dense<0.000000e+00> : vector<256x128xf32>
    %13 = tpu.matmul %10, %12, %cst_6 {dimension_numbers = #tpu.dot_dimension_numbers<[1], [0], [0], [1], [0, 0, 1, 1], [], []>} : vector<256x384xf32>, vector<384x128xf32>, vector<256x128xf32> -> vector<256x128xf32>
    %14 = arith.addf %2, %13 : vector<256x128xf32>
    %15 = vector.extract_strided_slice %1 {offsets = [1, 0, 0], sizes = [16, 18, 128], strides = [1, 1, 1]} : vector<18x18x128xf32> to vector<16x18x128xf32>
    %16 = vector.extract_strided_slice %15 {offsets = [0, 0, 0], sizes = [16, 16, 128], strides = [1, 1, 1]} : vector<16x18x128xf32> to vector<16x16x128xf32>
    %17 = vector.shape_cast %16 : vector<16x16x128xf32> to vector<256x128xf32>
    %18 = vector.extract_strided_slice %15 {offsets = [0, 1, 0], sizes = [16, 16, 128], strides = [1, 1, 1]} : vector<16x18x128xf32> to vector<16x16x128xf32>
    %19 = vector.shape_cast %18 : vector<16x16x128xf32> to vector<256x128xf32>
    %20 = vector.extract_strided_slice %15 {offsets = [0, 2, 0], sizes = [16, 16, 128], strides = [1, 1, 1]} : vector<16x18x128xf32> to vector<16x16x128xf32>
    %21 = vector.shape_cast %20 : vector<16x16x128xf32> to vector<256x128xf32>
    %22 = tpu.concatenate %17, %19, %21 in 1 : vector<256x128xf32>, vector<256x128xf32>, vector<256x128xf32> -> vector<256x384xf32>
    %c1 = arith.constant 1 : index
    %c0_7 = arith.constant 0 : index
    %c0_8 = arith.constant 0 : index
    %23 = vector.load %arg2[%c1, %c0_7, %c0_8] : memref<3x384x128xf32, #tpu.memory_space<vmem>>, vector<1x384x128xf32>
    %24 = vector.shape_cast %23 : vector<1x384x128xf32> to vector<384x128xf32>
    %cst_9 = arith.constant dense<0.000000e+00> : vector<256x128xf32>
    %25 = tpu.matmul %22, %24, %cst_9 {dimension_numbers = #tpu.dot_dimension_numbers<[1], [0], [0], [1], [0, 0, 1, 1], [], []>} : vector<256x384xf32>, vector<384x128xf32>, vector<256x128xf32> -> vector<256x128xf32>
    %26 = arith.addf %14, %25 : vector<256x128xf32>
    %27 = vector.extract_strided_slice %1 {offsets = [2, 0, 0], sizes = [16, 18, 128], strides = [1, 1, 1]} : vector<18x18x128xf32> to vector<16x18x128xf32>
    %28 = vector.extract_strided_slice %27 {offsets = [0, 0, 0], sizes = [16, 16, 128], strides = [1, 1, 1]} : vector<16x18x128xf32> to vector<16x16x128xf32>
    %29 = vector.shape_cast %28 : vector<16x16x128xf32> to vector<256x128xf32>
    %30 = vector.extract_strided_slice %27 {offsets = [0, 1, 0], sizes = [16, 16, 128], strides = [1, 1, 1]} : vector<16x18x128xf32> to vector<16x16x128xf32>
    %31 = vector.shape_cast %30 : vector<16x16x128xf32> to vector<256x128xf32>
    %32 = vector.extract_strided_slice %27 {offsets = [0, 2, 0], sizes = [16, 16, 128], strides = [1, 1, 1]} : vector<16x18x128xf32> to vector<16x16x128xf32>
    %33 = vector.shape_cast %32 : vector<16x16x128xf32> to vector<256x128xf32>
    %34 = tpu.concatenate %29, %31, %33 in 1 : vector<256x128xf32>, vector<256x128xf32>, vector<256x128xf32> -> vector<256x384xf32>
    %c2 = arith.constant 2 : index
    %c0_10 = arith.constant 0 : index
    %c0_11 = arith.constant 0 : index
    %35 = vector.load %arg2[%c2, %c0_10, %c0_11] : memref<3x384x128xf32, #tpu.memory_space<vmem>>, vector<1x384x128xf32>
    %36 = vector.shape_cast %35 : vector<1x384x128xf32> to vector<384x128xf32>
    %cst_12 = arith.constant dense<0.000000e+00> : vector<256x128xf32>
    %37 = tpu.matmul %34, %36, %cst_12 {dimension_numbers = #tpu.dot_dimension_numbers<[1], [0], [0], [1], [0, 0, 1, 1], [], []>} : vector<256x384xf32>, vector<384x128xf32>, vector<256x128xf32> -> vector<256x128xf32>
    %38 = arith.addf %26, %37 : vector<256x128xf32>
    %c0_13 = arith.constant 0 : index
    %c0_14 = arith.constant 0 : index
    %39 = vector.load %arg3[%c0_13, %c0_14] : memref<1x128xf32, #tpu.memory_space<vmem>>, vector<1x128xf32>
    %40 = vector.broadcast %39 : vector<1x128xf32> to vector<256x128xf32>
    %41 = arith.mulf %38, %40 : vector<256x128xf32>
    %c0_15 = arith.constant 0 : index
    %c0_16 = arith.constant 0 : index
    %42 = vector.load %arg4[%c0_15, %c0_16] : memref<1x128xf32, #tpu.memory_space<vmem>>, vector<1x128xf32>
    %43 = vector.broadcast %42 : vector<1x128xf32> to vector<256x128xf32>
    %44 = arith.addf %41, %43 : vector<256x128xf32>
    %cst_17 = arith.constant 0.000000e+00 : f32
    %45 = vector.broadcast %cst_17 : f32 to vector<256x128xf32>
    %46 = arith.maximumf %44, %45 : vector<256x128xf32>
    %cst_18 = arith.constant 0.000000e+00 : f32
    %47 = vector.broadcast %cst_18 : f32 to vector<1x18x128xf32>
    %cst_19 = arith.constant 0.000000e+00 : f32
    %48 = vector.broadcast %cst_19 : f32 to vector<18x1x128xf32>
    %c0_20 = arith.constant 0 : index
    %c0_21 = arith.constant 0 : index
    %c0_22 = arith.constant 0 : index
    %49 = vector.load %arg9[%c0_20, %c0_21, %c0_22] : memref<18x18x128xf32, #tpu.memory_space<vmem>>, vector<1x18x128xf32>
    tpu.vector_store %arg9[%c0_20, %c0_21, %c0_22], %47 {strides = array<i32>} : memref<18x18x128xf32, #tpu.memory_space<vmem>>, vector<1x18x128xf32>,
    %c17 = arith.constant 17 : index
    %c0_23 = arith.constant 0 : index
    %c0_24 = arith.constant 0 : index
    %50 = vector.load %arg9[%c17, %c0_23, %c0_24] : memref<18x18x128xf32, #tpu.memory_space<vmem>>, vector<1x18x128xf32>
    tpu.vector_store %arg9[%c17, %c0_23, %c0_24], %47 {strides = array<i32>} : memref<18x18x128xf32, #tpu.memory_space<vmem>>, vector<1x18x128xf32>,
    %c0_25 = arith.constant 0 : index
    %c0_26 = arith.constant 0 : index
    %c0_27 = arith.constant 0 : index
    %51 = vector.load %arg9[%c0_25, %c0_26, %c0_27] : memref<18x18x128xf32, #tpu.memory_space<vmem>>, vector<18x1x128xf32>
    tpu.vector_store %arg9[%c0_25, %c0_26, %c0_27], %48 {strides = array<i32>} : memref<18x18x128xf32, #tpu.memory_space<vmem>>, vector<18x1x128xf32>,
    %c0_28 = arith.constant 0 : index
    %c17_29 = arith.constant 17 : index
    %c0_30 = arith.constant 0 : index
    %52 = vector.load %arg9[%c0_28, %c17_29, %c0_30] : memref<18x18x128xf32, #tpu.memory_space<vmem>>, vector<18x1x128xf32>
    tpu.vector_store %arg9[%c0_28, %c17_29, %c0_30], %48 {strides = array<i32>} : memref<18x18x128xf32, #tpu.memory_space<vmem>>, vector<18x1x128xf32>,
    %53 = vector.shape_cast %46 : vector<256x128xf32> to vector<16x16x128xf32>
    %c1_31 = arith.constant 1 : index
    %c1_32 = arith.constant 1 : index
    %c0_33 = arith.constant 0 : index
    %54 = vector.load %arg9[%c1_31, %c1_32, %c0_33] : memref<18x18x128xf32, #tpu.memory_space<vmem>>, vector<16x16x128xf32>
    tpu.vector_store %arg9[%c1_31, %c1_32, %c0_33], %53 {strides = array<i32>} : memref<18x18x128xf32, #tpu.memory_space<vmem>>, vector<16x16x128xf32>,
    %c0_34 = arith.constant 0 : index
    %c0_35 = arith.constant 0 : index
    %c0_36 = arith.constant 0 : index
    %55 = vector.load %arg9[%c0_34, %c0_35, %c0_36] : memref<18x18x128xf32, #tpu.memory_space<vmem>>, vector<18x18x128xf32>
    %cst_37 = arith.constant 0.000000e+00 : f32
    %56 = vector.broadcast %cst_37 : f32 to vector<256x128xf32>
    %57 = vector.extract_strided_slice %55 {offsets = [0, 0, 0], sizes = [16, 18, 128], strides = [1, 1, 1]} : vector<18x18x128xf32> to vector<16x18x128xf32>
    %58 = vector.extract_strided_slice %57 {offsets = [0, 0, 0], sizes = [16, 16, 128], strides = [1, 1, 1]} : vector<16x18x128xf32> to vector<16x16x128xf32>
    %59 = vector.shape_cast %58 : vector<16x16x128xf32> to vector<256x128xf32>
    %60 = vector.extract_strided_slice %57 {offsets = [0, 1, 0], sizes = [16, 16, 128], strides = [1, 1, 1]} : vector<16x18x128xf32> to vector<16x16x128xf32>
    %61 = vector.shape_cast %60 : vector<16x16x128xf32> to vector<256x128xf32>
    %62 = vector.extract_strided_slice %57 {offsets = [0, 2, 0], sizes = [16, 16, 128], strides = [1, 1, 1]} : vector<16x18x128xf32> to vector<16x16x128xf32>
    %63 = vector.shape_cast %62 : vector<16x16x128xf32> to vector<256x128xf32>
    %64 = tpu.concatenate %59, %61, %63 in 1 : vector<256x128xf32>, vector<256x128xf32>, vector<256x128xf32> -> vector<256x384xf32>
    %c0_38 = arith.constant 0 : index
    %c0_39 = arith.constant 0 : index
    %c0_40 = arith.constant 0 : index
    %65 = vector.load %arg5[%c0_38, %c0_39, %c0_40] : memref<3x384x128xf32, #tpu.memory_space<vmem>>, vector<1x384x128xf32>
    %66 = vector.shape_cast %65 : vector<1x384x128xf32> to vector<384x128xf32>
    %cst_41 = arith.constant dense<0.000000e+00> : vector<256x128xf32>
    %67 = tpu.matmul %64, %66, %cst_41 {dimension_numbers = #tpu.dot_dimension_numbers<[1], [0], [0], [1], [0, 0, 1, 1], [], []>} : vector<256x384xf32>, vector<384x128xf32>, vector<256x128xf32> -> vector<256x128xf32>
    %68 = arith.addf %56, %67 : vector<256x128xf32>
    %69 = vector.extract_strided_slice %55 {offsets = [1, 0, 0], sizes = [16, 18, 128], strides = [1, 1, 1]} : vector<18x18x128xf32> to vector<16x18x128xf32>
    %70 = vector.extract_strided_slice %69 {offsets = [0, 0, 0], sizes = [16, 16, 128], strides = [1, 1, 1]} : vector<16x18x128xf32> to vector<16x16x128xf32>
    %71 = vector.shape_cast %70 : vector<16x16x128xf32> to vector<256x128xf32>
    %72 = vector.extract_strided_slice %69 {offsets = [0, 1, 0], sizes = [16, 16, 128], strides = [1, 1, 1]} : vector<16x18x128xf32> to vector<16x16x128xf32>
    %73 = vector.shape_cast %72 : vector<16x16x128xf32> to vector<256x128xf32>
    %74 = vector.extract_strided_slice %69 {offsets = [0, 2, 0], sizes = [16, 16, 128], strides = [1, 1, 1]} : vector<16x18x128xf32> to vector<16x16x128xf32>
    %75 = vector.shape_cast %74 : vector<16x16x128xf32> to vector<256x128xf32>
    %76 = tpu.concatenate %71, %73, %75 in 1 : vector<256x128xf32>, vector<256x128xf32>, vector<256x128xf32> -> vector<256x384xf32>
    %c1_42 = arith.constant 1 : index
    %c0_43 = arith.constant 0 : index
    %c0_44 = arith.constant 0 : index
    %77 = vector.load %arg5[%c1_42, %c0_43, %c0_44] : memref<3x384x128xf32, #tpu.memory_space<vmem>>, vector<1x384x128xf32>
    %78 = vector.shape_cast %77 : vector<1x384x128xf32> to vector<384x128xf32>
    %cst_45 = arith.constant dense<0.000000e+00> : vector<256x128xf32>
    %79 = tpu.matmul %76, %78, %cst_45 {dimension_numbers = #tpu.dot_dimension_numbers<[1], [0], [0], [1], [0, 0, 1, 1], [], []>} : vector<256x384xf32>, vector<384x128xf32>, vector<256x128xf32> -> vector<256x128xf32>
    %80 = arith.addf %68, %79 : vector<256x128xf32>
    %81 = vector.extract_strided_slice %55 {offsets = [2, 0, 0], sizes = [16, 18, 128], strides = [1, 1, 1]} : vector<18x18x128xf32> to vector<16x18x128xf32>
    %82 = vector.extract_strided_slice %81 {offsets = [0, 0, 0], sizes = [16, 16, 128], strides = [1, 1, 1]} : vector<16x18x128xf32> to vector<16x16x128xf32>
    %83 = vector.shape_cast %82 : vector<16x16x128xf32> to vector<256x128xf32>
    %84 = vector.extract_strided_slice %81 {offsets = [0, 1, 0], sizes = [16, 16, 128], strides = [1, 1, 1]} : vector<16x18x128xf32> to vector<16x16x128xf32>
    %85 = vector.shape_cast %84 : vector<16x16x128xf32> to vector<256x128xf32>
    %86 = vector.extract_strided_slice %81 {offsets = [0, 2, 0], sizes = [16, 16, 128], strides = [1, 1, 1]} : vector<16x18x128xf32> to vector<16x16x128xf32>
    %87 = vector.shape_cast %86 : vector<16x16x128xf32> to vector<256x128xf32>
    %88 = tpu.concatenate %83, %85, %87 in 1 : vector<256x128xf32>, vector<256x128xf32>, vector<256x128xf32> -> vector<256x384xf32>
    %c2_46 = arith.constant 2 : index
    %c0_47 = arith.constant 0 : index
    %c0_48 = arith.constant 0 : index
    %89 = vector.load %arg5[%c2_46, %c0_47, %c0_48] : memref<3x384x128xf32, #tpu.memory_space<vmem>>, vector<1x384x128xf32>
    %90 = vector.shape_cast %89 : vector<1x384x128xf32> to vector<384x128xf32>
    %cst_49 = arith.constant dense<0.000000e+00> : vector<256x128xf32>
    %91 = tpu.matmul %88, %90, %cst_49 {dimension_numbers = #tpu.dot_dimension_numbers<[1], [0], [0], [1], [0, 0, 1, 1], [], []>} : vector<256x384xf32>, vector<384x128xf32>, vector<256x128xf32> -> vector<256x128xf32>
    %92 = arith.addf %80, %91 : vector<256x128xf32>
    %c0_50 = arith.constant 0 : index
    %c0_51 = arith.constant 0 : index
    %93 = vector.load %arg6[%c0_50, %c0_51] : memref<1x128xf32, #tpu.memory_space<vmem>>, vector<1x128xf32>
    %94 = vector.broadcast %93 : vector<1x128xf32> to vector<256x128xf32>
    %95 = arith.mulf %92, %94 : vector<256x128xf32>
    %c0_52 = arith.constant 0 : index
    %c0_53 = arith.constant 0 : index
    %96 = vector.load %arg7[%c0_52, %c0_53] : memref<1x128xf32, #tpu.memory_space<vmem>>, vector<1x128xf32>
    %97 = vector.broadcast %96 : vector<1x128xf32> to vector<256x128xf32>
    %98 = arith.addf %95, %97 : vector<256x128xf32>
    %99 = vector.extract_strided_slice %1 {offsets = [1, 1, 0], sizes = [16, 16, 128], strides = [1, 1, 1]} : vector<18x18x128xf32> to vector<16x16x128xf32>
    %100 = vector.shape_cast %99 : vector<16x16x128xf32> to vector<256x128xf32>
    %101 = arith.addf %98, %100 : vector<256x128xf32>
    %cst_54 = arith.constant 0.000000e+00 : f32
    %102 = vector.broadcast %cst_54 : f32 to vector<256x128xf32>
    %103 = arith.maximumf %101, %102 : vector<256x128xf32>
    %104 = vector.shape_cast %103 : vector<256x128xf32> to vector<1x16x16x128xf32>
    %c0_55 = arith.constant 0 : index
    %c0_56 = arith.constant 0 : index
    %c0_57 = arith.constant 0 : index
    %c0_58 = arith.constant 0 : index
    %105 = vector.load %arg8[%c0_55, %c0_56, %c0_57, %c0_58] : memref<1x16x16x128xf32, #tpu.memory_space<vmem>>, vector<1x16x16x128xf32>
    tpu.vector_store %arg8[%c0_55, %c0_56, %c0_57, %c0_58], %104 {strides = array<i32>} : memref<1x16x16x128xf32, #tpu.memory_space<vmem>>, vector<1x16x16x128xf32>,
    return
  }
  func.func @transform_0(%arg0: i32) -> (i32, i32, i32, i32) {
    %c0_i32 = arith.constant 0 : i32
    %c0_i32_0 = arith.constant 0 : i32
    %c0_i32_1 = arith.constant 0 : i32
    %c0_i32_2 = arith.constant 0 : i32
    return %arg0, %c0_i32, %c0_i32_0, %c0_i32_1 : i32, i32, i32, i32
  }
  func.func @transform_1(%arg0: i32) -> (i32, i32, i32) {
    %c0_i32 = arith.constant 0 : i32
    %c0_i32_0 = arith.constant 0 : i32
    %c0_i32_1 = arith.constant 0 : i32
    %c0_i32_2 = arith.constant 0 : i32
    return %c0_i32, %c0_i32_0, %c0_i32_1 : i32, i32, i32
  }
  func.func @transform_2(%arg0: i32) -> (i32, i32) {
    %c0_i32 = arith.constant 0 : i32
    %c0_i32_0 = arith.constant 0 : i32
    %c0_i32_1 = arith.constant 0 : i32
    return %c0_i32, %c0_i32_0 : i32, i32
  }
  func.func @transform_3(%arg0: i32) -> (i32, i32) {
    %c0_i32 = arith.constant 0 : i32
    %c0_i32_0 = arith.constant 0 : i32
    %c0_i32_1 = arith.constant 0 : i32
    return %c0_i32, %c0_i32_0 : i32, i32
  }
  func.func @transform_4(%arg0: i32) -> (i32, i32, i32) {
    %c0_i32 = arith.constant 0 : i32
    %c0_i32_0 = arith.constant 0 : i32
    %c0_i32_1 = arith.constant 0 : i32
    %c0_i32_2 = arith.constant 0 : i32
    return %c0_i32, %c0_i32_0, %c0_i32_1 : i32, i32, i32
  }
  func.func @transform_5(%arg0: i32) -> (i32, i32) {
    %c0_i32 = arith.constant 0 : i32
    %c0_i32_0 = arith.constant 0 : i32
    %c0_i32_1 = arith.constant 0 : i32
    return %c0_i32, %c0_i32_0 : i32, i32
  }
  func.func @transform_6(%arg0: i32) -> (i32, i32) {
    %c0_i32 = arith.constant 0 : i32
    %c0_i32_0 = arith.constant 0 : i32
    %c0_i32_1 = arith.constant 0 : i32
    return %c0_i32, %c0_i32_0 : i32, i32
  }
  func.func @transform_7(%arg0: i32) -> (i32, i32, i32, i32) {
    %c0_i32 = arith.constant 0 : i32
    %c0_i32_0 = arith.constant 0 : i32
    %c0_i32_1 = arith.constant 0 : i32
    %c0_i32_2 = arith.constant 0 : i32
    return %arg0, %c0_i32, %c0_i32_0, %c0_i32_1 : i32, i32, i32, i32
  }
}

</mosaic_0001>

<bundles_post_ra>
// kernel: tpu_custom_call.1
= control target key start
LH: loop header
LB: loop body
LE: loop exit
PB: predicated region body
PF: predicated region fallthrough
CT: control target
= control target key end

     0   :  { %12 = vsyncpa [#allocation4], 0  ;;  %s9213_s0 = inlined_call_operand.vmem [shape: f32[2,18,18,128], index: 0, kind: input, shape index: {}]   ;;  %s9214_s1 = inlined_call_operand.vmem [shape: f32[3,384,128], index: 1, kind: input, shape index: {}]   ;;  %s9215_s2 = inlined_call_operand.vmem [shape: f32[1,128], index: 2, kind: input, shape index: {}]   ;;  %s9216_s3 = inlined_call_operand.vmem [shape: f32[1,128], index: 3, kind: input, shape index: {}]   ;;  %s9217_s4 = inlined_call_operand.hbm [shape: f32[3,384,128], index: 4, kind: input, shape index: {}]   ;;  %s9218_s5 = inlined_call_operand.vmem [shape: f32[1,128], index: 5, kind: input, shape index: {}]   ;;  %s9219_s6 = inlined_call_operand.vmem [shape: f32[1,128], index: 6, kind: input, shape index: {}]   ;;  %s9220_s7 = inlined_call_operand.hbm [shape: f32[2,16,16,128], index: 7, kind: output, shape index: {}]  }
   0x1   :  { %13 = vsyncpa [#allocation5], 0 }
   0x2   :  { %15 = vsyncpa [#allocation5 + $0x1], 0  ;;  %s6140_s24 = smov 0   ;;  %s6142_s25 = smov 0  }
   0x3   :  { %s6144_s26 = smov 0   ;;  %s6146_s27 = smov 0  }
   0x4 LB: > { %s6161_s28 = sadd.s32 4294967295, %s6090_s27   ;;  %s4518_s29 = sadd.s32 4294967294, %s6090_s27   ;;  %s6090_s27 = sphi %s6146_s27, %s9689_s27   ;;  %s6086_s26 = sphi %s6144_s26, %s9688_s26   ;;  %s6082_s25 = sphi %s6142_s25, %s9687_s25   ;;  %s6078_s24 = sphi %s6140_s24, %s9686_s24  }
   0x5   : > { %s6165_s30 = sadd.s32 1, %s6090_s27   ;;  %s180_s8 = sadd.s32 1, %s6086_s26 }
   0x6   : > { %s177_s9 = ssub.s32 %s6090_s27, %s6165_s30  ;;  %p190_p0 = scmp.ne.s32.totalorder %s6086_s26, %s6082_s25 }
   0x7   : > { %p178_p1 = scmp.eq.s32.totalorder %s177_s9, 0  ;;  %p191_p2 = scmp.eq.s32.totalorder %s6161_s28, 1 }
   0x8   : > { %p196_p3 = scmp.ne.s32.totalorder %s6082_s25, %s6078_s24  ;;  %p197_p4 = scmp.eq.s32.totalorder %s4518_s29, 1 }
   0x9   : > { %s6176_s10 = scalar_select %p178_p1, %s6086_s26, %s180_s8  }
   0xa   : > { %p6178_p5 = por %p191_p2, %p190_p0  ;;  %p6182_p6 = por %p197_p4, %p196_p3 }
   0xb   : > { %p4519_p7 = scmp.ge.s32.totalorder %s6090_s27, 1  ;;  %p204_p8 = scmp.lt.s32.totalorder %s6090_s27, 3 }
   0xc   : > { %s9409_s11 = scalar_select %p6178_p5, 1, 0 }
   0xd   : > { %s9410_s12 = scalar_select %p6182_p6, 1, 0 }
   0xe   : > { %p9221_p9 = scmp.eq.s32.totalorder %s6161_s28, 0  ;;  %p6189_p10 = pnand %p4519_p7, %p204_p8 }
   0xf   : > { %s6092_s14 = smov [#allocation3]   ;;  %s5996_s19 = scalar_lea.hbm %s9217_s4, 18432 }
  0x10   : > { %s9411_s13 = scalar_select %p6189_p10, 1, 0 }
  0x11   : > { %s225_s15 = sshll.u32 %s6092_s14, 4  ;;  %p5887_p11 = pneg %p6189_p10  ;;  %s226_s15 = int_to_ptr.vmem [resolvable:$true] %s225_s15 }
  0x12   : > { %p5997_p13 = scmp.ne.s32.totalorder %s9217_s4, %s5996_s19  ;;  %p6003_p3 = scmp.lt.u32.totalorder %s5996_s19, %s9217_s4 }
  0x13   : > { %p6197_p12 = pnand %p9221_p9, %p5887_p11 }
  0x15   : > { %p5998_p0 = pneg %p6197_p12 }
  0x17   : > { %p5999_p1 = pnand %p5998_p0, %p5997_p13 }
  0x19   : > { %p6000_p2 = pneg %p5999_p1 }
  0x1b   : > { %p6005_p4 = pnand %p6003_p3, %p6000_p2 }
  0x1d   : > { %6008 = shalt.err (!%p6005_p4)
}
  0x1e   : > { %s6009_s29 = scalar_lea.vmem %s226_s15, 18432  ;;  %p6017_p9 = scmp.lt.s32.totalorder %s226_s15, %s226_s15 }
  0x1f   : > { %p6010_p7 = scmp.ne.s32.totalorder %s226_s15, %s6009_s29  ;;  %p6018_p6 = scmp.lt.s32.totalorder %s6009_s29, %s6009_s29 }
  0x21   : > { %p6012_p8 = pnand %p6010_p7, %p5998_p0  ;;  %p6019_p5 = por %p6018_p6, %p6017_p9 }
  0x23   : > { %p6013_p11 = pneg %p6012_p8 }
  0x25   : > { %p6020_p10 = pnand %p6019_p5, %p6013_p11 }
  0x27   : > { %6023 = shalt.err (!%p6020_p10)
}
  0x28   : > { %s6093_s8 = smov 128   ;;  %s6094_s9 = smov 8  }
  0x29   : > { %5890 = dma.hbm_to_vmem [thread:$0]  (!%p6197_p12), %s9217_s4, 18432, %s226_s15, [#allocation4], %s6093_s8, %s6093_s8, %s6094_s9  }
  0x2a   : > { %p9413_p13 = scmp.ne.s32.totalorder %s9411_s13, 0 }
  0x2c   : > { %255 = sbr.rel (%p9413_p13) target bundleno = 1107 (0x453), region = 48 }
  0x33   : > { %p9414_p1 = scmp.eq.s32.totalorder %s6161_s28, 0 }
  0x35   : > { %6069 = dma.done.wait (%p9414_p1), [#allocation4], 18432   ;;  %p9415_p0 = pmov %p9414_p1 }
  0x36   : > { %v9231_v0 = vmov 0.0|0.0   ;;  %p287_p5 = scmp.lt.s32.totalorder %s6161_s28, 1  ;;  %v4526_v1 = vld [vmem:[%s9214_s1 + $0x180] sm:$0xff]  ;;  %v4527_v2 = vld [vmem:[%s9214_s1 + $0x188] sm:$0xff]  ;;  %v4528_v6 = vld [vmem:[%s9214_s1 + $0x190] sm:$0xff]  ;;  %vm507_vm0 = vcmask 1045504  }
  0x37   : > { %6071 = vsyncadd (%p9415_p0), [#allocation4], 4294948864  ;;  %5400 = vmatprep.subr.bf16.mxu0 %v9231_v0  ;;  %v4558_v3 = vld [vmem:[%s9214_s1 + $0x280] sm:$0xff]  ;;  %v5401_v4 = vpack.c.bf16 %v4527_v2, %v4526_v1  ;;  %v4559_v5 = vld [vmem:[%s9214_s1 + $0x288] sm:$0xff]  ;;  %vm394_vm1 = vcmask 1046528   ;;  %s4631_s21 = sshll.u32 %s6161_s28, 12 }
  0x38   : > { %s6226_s16 = scalar_select %p287_p5, %s6161_s28, 1  ;;  %v4529_v7 = vld [vmem:[%s9214_s1 + $0x198] sm:$0xff]  ;;  %v5448_v8 = vpack.c.bf16 %v4559_v5, %v4558_v3  ;;  %v4560_v9 = vld [vmem:[%s9214_s1 + $0x290] sm:$0xff]  ;;  %v4562_v13 = vld [vmem:[%s9214_s1 + $0x2a0] sm:$0xff] }
  0x39   : > { %v4561_v10 = vld [vmem:[%s9214_s1 + $0x298] sm:$0xff]  ;;  %5402 = vmatpush1.bf16.msra.mxu0 %v5401_v4  ;;  %v5404_v11 = vpack.c.bf16 %v4529_v7, %v4528_v6  ;;  %v4563_v14 = vld [vmem:[%s9214_s1 + $0x2a8] sm:$0xff]  ;;  %v4530_v15 = vld [vmem:[%s9214_s1 + $0x1a0] sm:$0xff]  ;;  %p9684_p9 = scmp.ne.s32.totalorder %s9409_s11, 0  ;;  %s6097_s14 = smov [#allocation6]  }
  0x3a   : > { %v5452_v12 = vpack.c.bf16 %v4561_v10, %v4560_v9  ;;  %s5880_s23 = smul.u32 432, %s6226_s16  ;;  %5449 = vmatprep.subr.bf16.mxu1 %v5448_v8  ;;  %5403 = vmatprep.subr.bf16.mxu0 %v9231_v0  ;;  %v4531_v16 = vld [vmem:[%s9214_s1 + $0x1a8] sm:$0xff]  ;;  %v5456_v17 = vpack.c.bf16 %v4563_v14, %v4562_v13  ;;  %v4564_v19 = vld [vmem:[%s9214_s1 + $0x2b0] sm:$0xff]  ;;  %v4565_v20 = vld [vmem:[%s9214_s1 + $0x2b8] sm:$0xff]  ;;  %s284_s16 = sand.u32 1, %s6082_s25  }
  0x3b   : > { %5451 = vmatpush3.bf16.msra.mxu1 %v5448_v8  ;;  %v5407_v18 = vpack.c.bf16 %v4531_v16, %v4530_v15  ;;  %v4532_v21 = vld [vmem:[%s9214_s1 + $0x1b0] sm:$0xff]  ;;  %v4533_v22 = vld [vmem:[%s9214_s1 + $0x1b8] sm:$0xff]  ;;  %v5460_v23 = vpack.c.bf16 %v4565_v20, %v4564_v19  ;;  %v4566_v26 = vld [vmem:[%s9214_s1 + $0x2c0] sm:$0xff]  ;;  %s4524_s15 = sshll.u32 %s284_s16, 8  ;;  %s9172_s9 = scalar_lea.sflag [#allocation5], %s284_s16 }
  0x3c   : > { %5453 = vmatprep.subr.bf16.mxu1 %v5452_v12  ;;  %s6275_s20 = scalar_lea.vmem %s9213_s0, %s5880_s23  ;;  %v5410_v25 = vpack.c.bf16 %v4533_v22, %v4532_v21  ;;  %v4567_v27 = vld [vmem:[%s9214_s1 + $0x2c8] sm:$0xff]  ;;  %v4534_v31 = vld [vmem:[%s9214_s1 + $0x1c0] sm:$0xff]  ;;  %v4568_v39 = vld [vmem:[%s9214_s1 + $0x2d0] sm:$0xff]  ;;  %s9165_s23 = scalar_lea.hbm %s9220_s7, %s4631_s21 }
  0x3d   : > { %5405 = vmatpush1.bf16.msra.mxu0 %v5404_v11  ;;  %v6285_v24 = vld [vmem:[%s6275_s20 + $0x18] sm:$0xff]  ;;  %v6294_v28 = vld [vmem:[%s6275_s20 + $0x20] sm:$0xff]  ;;  %v4535_v32 = vld [vmem:[%s9214_s1 + $0x1c8] sm:$0xff]  ;;  %v5464_v35 = vpack.c.bf16 %v4567_v27, %v4566_v26  ;;  %s6028_s17 = sshll.u32 %s6097_s14, 4  ;;  %s6029_s17 = int_to_ptr.vmem [resolvable:$false] %s6028_s17 }
  0x3e   : > { %5406 = vmatprep.subr.bf16.mxu0 %v9231_v0  ;;  %v513_v29 = vrot.slane %v6285_v24, 2  ;;  %v400_v30 = vrot.slane %v6285_v24, 1  ;;  %v514_v33 = vrot.slane %v6294_v28, 2  ;;  %v9224_v34 = vrot.slane %v6294_v28, 1  ;;  %v4569_v40 = vld [vmem:[%s9214_s1 + $0x2d8] sm:$0xff]  ;;  %v4536_v41 = vld [vmem:[%s9214_s1 + $0x1d0] sm:$0xff] }
  0x3f   : > { %5455 = vmatpush3.bf16.msra.mxu1 %v5452_v12  ;;  %v5413_v38 = vpack.c.bf16 %v4535_v32, %v4534_v31  ;;  %v4537_v42 = vld [vmem:[%s9214_s1 + $0x1d8] sm:$0xff]  ;;  %v5468_v43 = vpack.c.bf16 %v4569_v40, %v4568_v39  ;;  %v4570_v45 = vld [vmem:[%s9214_s1 + $0x2e0] sm:$0xff]  ;;  %v4571_v46 = vld [vmem:[%s9214_s1 + $0x2e8] sm:$0xff]  ;;  %s6030_s18 = scalar_lea.vmem %s6029_s17, 8192 }
  0x40   : > { %5457 = vmatprep.subr.bf16.mxu1 %v5456_v17  ;;  %v6310_v36 = vsel %vm507_vm0, %v513_v29, %v514_v33  ;;  %v6315_v37 = vsel %vm394_vm1, %v400_v30, %v9224_v34  ;;  %v5416_v44 = vpack.c.bf16 %v4537_v42, %v4536_v41  ;;  %v4538_v47 = vld [vmem:[%s9214_s1 + $0x1e0] sm:$0xff]  ;;  %v4539_v48 = vld [vmem:[%s9214_s1 + $0x1e8] sm:$0xff]  ;;  %v5472_v49 = vpack.c.bf16 %v4571_v46, %v4570_v45  ;;  %v4572_v51 = vld [vmem:[%s9214_s1 + $0x2f0] sm:$0xff] }
  0x41   : > { %5408 = vmatpush1.bf16.msra.mxu0 %v5407_v18  ;;  %9416 = vst [vmem:[#allocation9_spill] sm:$0xff] %v6310_v36  ;;  %9417 = vst [vmem:[#allocation10_spill] sm:$0xff] %v6315_v37  ;;  %4952 = vmatprep.mubr.f32.mxu1 %v6310_v36  ;;  %v5419_v50 = vpack.c.bf16 %v4539_v48, %v4538_v47  ;;  %v4573_v52 = vld [vmem:[%s9214_s1 + $0x2f8] sm:$0xff]  ;;  %v4540_v53 = vld [vmem:[%s9214_s1 + $0x1f0] sm:$0xff] }
  0x42   : > { %5409 = vmatprep.subr.bf16.mxu0 %v9231_v0  ;;  %798 = vmatprep.mubr.f32.mxu0 %v6315_v37  ;;  %v4541_v54 = vld [vmem:[%s9214_s1 + $0x1f8] sm:$0xff]  ;;  %v5476_v55 = vpack.c.bf16 %v4573_v52, %v4572_v51  ;;  %v6359_v56 = vld [vmem:[%s6275_s20 + $0x28] sm:$0x3]  ;;  %v6362_v58 = vld [vmem:[%s6275_s20 + $0x30] sm:$0xff] }
  0x43   : > { %5459 = vmatpush3.bf16.msra.mxu1 %v5456_v17  ;;  %v5422_v57 = vpack.c.bf16 %v4541_v54, %v4540_v53  ;;  %v6365_v59 = vld [vmem:[%s6275_s20 + $0x38] sm:$0xff]  ;;  %v4542_v60 = vld [vmem:[%s9214_s1 + $0x200] sm:$0xff]  ;;  %v4543_v61 = vld [vmem:[%s9214_s1 + $0x208] sm:$0xff]  ;;  %v516_v62 = vrot.slane %v6359_v56, 2  ;;  %v518_v2 = vrot.slane %v6362_v58, 2 }
  0x44   : > { %5461 = vmatprep.subr.bf16.mxu1 %v5460_v23  ;;  %v620_v63 = vld [vmem:[%s9214_s1] sm:$0xff]  ;;  %v621_v1 = vld [vmem:[%s9214_s1 + $0x8] sm:$0xff]  ;;  %v519_v3 = vrot.slane %v6365_v59, 2  ;;  %v5425_v5 = vpack.c.bf16 %v4543_v61, %v4542_v60  ;;  %v6390_v7 = vld [vmem:[%s6275_s20 + $0x50] sm:$0xff] }
  0x45   : > { %5411 = vmatpush1.bf16.msra.mxu0 %v5410_v25  ;;  %v6384_v4 = vld [vmem:[%s6275_s20 + $0x40] sm:$0x3]  ;;  %v6387_v6 = vld [vmem:[%s6275_s20 + $0x48] sm:$0xff]  ;;  %v4544_v8 = vld [vmem:[%s9214_s1 + $0x210] sm:$0xff]  ;;  %v6402_v10 = vsel %vm507_vm0, %v514_v33, %v516_v62  ;;  %v5481_v11 = vpack.c.bf16 %v621_v1, %v620_v63  ;;  %v524_v17 = vrot.slane %v6390_v7, 2 }
  0x46   : > { %5412 = vmatprep.subr.bf16.mxu0 %v9231_v0  ;;  %v4545_v9 = vld [vmem:[%s9214_s1 + $0x218] sm:$0xff]  ;;  %9418 = vst [vmem:[#allocation11_spill] sm:$0xff] %v6402_v10  ;;  %v521_v12 = vrot.slane %v6384_v4, 2  ;;  %v6407_v13 = vsel %vm507_vm0, %v518_v2, %v519_v3  ;;  %v622_v14 = vld [vmem:[%s9214_s1 + $0x10] sm:$0xff]  ;;  %v523_v16 = vrot.slane %v6387_v6, 2  ;;  %v6421_v20 = vld [vmem:[%s6275_s20 + $0x60] sm:$0xff] }
  0x47   : > { %5463 = vmatpush3.bf16.msra.mxu1 %v5460_v23  ;;  %9419 = vst [vmem:[#allocation12_spill] sm:$0xff] %v6407_v13  ;;  %v623_v15 = vld [vmem:[%s9214_s1 + $0x18] sm:$0xff]  ;;  %v5428_v19 = vpack.c.bf16 %v4545_v9, %v4544_v8  ;;  %v6424_v21 = vld [vmem:[%s6275_s20 + $0x68] sm:$0xff]  ;;  %v4546_v22 = vld [vmem:[%s9214_s1 + $0x220] sm:$0xff]  ;;  %v528_v32 = vrot.slane %v6421_v20, 2 }
  0x48   : > { %5465 = vmatprep.subr.bf16.mxu1 %v5464_v35  ;;  %v6418_v18 = vld [vmem:[%s6275_s20 + $0x58] sm:$0x3]  ;;  %v4547_v23 = vld [vmem:[%s9214_s1 + $0x228] sm:$0xff]  ;;  %v6436_v25 = vsel %vm507_vm0, %v519_v3, %v521_v12  ;;  %v5484_v26 = vpack.c.bf16 %v623_v15, %v622_v14  ;;  %v6441_v29 = vsel %vm507_vm0, %v523_v16, %v524_v17  ;;  %v624_v30 = vld [vmem:[%s9214_s1 + $0x20] sm:$0xff]  ;;  %v529_v33 = vrot.slane %v6424_v21, 2 }
  0x49   : > { %5414 = vmatpush1.bf16.msra.mxu0 %v5413_v38  ;;  %9420 = vst [vmem:[#allocation13_spill] sm:$0xff] %v6436_v25  ;;  %v526_v27 = vrot.slane %v6418_v18, 2  ;;  %9421 = vst [vmem:[#allocation14_spill] sm:$0xff] %v6441_v29  ;;  %v625_v31 = vld [vmem:[%s9214_s1 + $0x28] sm:$0xff]  ;;  %v5431_v38 = vpack.c.bf16 %v4547_v23, %v4546_v22  ;;  %v6455_v39 = vld [vmem:[%s6275_s20 + $0x78] sm:$0xff] }
  0x4a   : > { %5415 = vmatprep.subr.bf16.mxu0 %v9231_v0  ;;  %v6458_v40 = vld [vmem:[%s6275_s20 + $0x80] sm:$0xff]  ;;  %v4548_v41 = vld [vmem:[%s9214_s1 + $0x230] sm:$0xff]  ;;  %v4549_v42 = vld [vmem:[%s9214_s1 + $0x238] sm:$0xff]  ;;  %v6475_v46 = vsel %vm507_vm0, %v528_v32, %v529_v33 }
  0x4b   : > { %5467 = vmatpush3.bf16.msra.mxu1 %v5464_v35  ;;  %v6452_v35 = vld [vmem:[%s6275_s20 + $0x70] sm:$0x3]  ;;  %9423 = vst [vmem:[#allocation16_spill] sm:$0xff] %v6475_v46  ;;  %v627_v48 = vld [vmem:[%s9214_s1 + $0x38] sm:$0xff]  ;;  %v6486_v51 = vld [vmem:[%s6275_s20 + $0x88] sm:$0x3]  ;;  %v5434_v52 = vpack.c.bf16 %v4549_v42, %v4548_v41 }
  0x4c   : > { %5469 = vmatprep.subr.bf16.mxu1 %v5468_v43  ;;  %v531_v45 = vrot.slane %v6452_v35, 2  ;;  %v626_v47 = vld [vmem:[%s9214_s1 + $0x30] sm:$0xff]  ;;  %v6492_v54 = vld [vmem:[%s6275_s20 + $0x98] sm:$0xff]  ;;  %v536_v62 = vrot.slane %v6486_v51, 2  ;;  %v628_v1 = vld [vmem:[%s9214_s1 + $0x40] sm:$0xff] }
  0x4d   : > { %5417 = vmatpush1.bf16.msra.mxu0 %v5416_v44  ;;  %v5487_v44 = vpack.c.bf16 %v625_v31, %v624_v30  ;;  %v6489_v53 = vld [vmem:[%s6275_s20 + $0x90] sm:$0xff]  ;;  %v5490_v61 = vpack.c.bf16 %v627_v48, %v626_v47  ;;  %v629_v2 = vld [vmem:[%s9214_s1 + $0x48] sm:$0xff]  ;;  %v6520_v8 = vld [vmem:[%s6275_s20 + $0xa0] sm:$0x3] }
  0x4e   : > { %5418 = vmatprep.subr.bf16.mxu0 %v9231_v0  ;;  %v6504_v60 = vsel %vm507_vm0, %v529_v33, %v531_v45  ;;  %v538_v3 = vrot.slane %v6489_v53, 2  ;;  %v6526_v12 = vld [vmem:[%s6275_s20 + $0xb0] sm:$0xff]  ;;  %v4553_v15 = vld [vmem:[%s9214_s1 + $0x258] sm:$0xff]  ;;  %v6557_v33 = vld [vmem:[%s6275_s20 + $0xc0] sm:$0xff] }
  0x4f   : > { %5471 = vmatpush3.bf16.msra.mxu1 %v5468_v43  ;;  %v6470_v43 = vsel %vm507_vm0, %v524_v17, %v526_v27  ;;  %9424 = vst [vmem:[#allocation17_spill] sm:$0xff] %v6504_v60  ;;  %v4552_v14 = vld [vmem:[%s9214_s1 + $0x250] sm:$0xff]  ;;  %v5493_v17 = vpack.c.bf16 %v629_v2, %v628_v1  ;;  %v544_v30 = vrot.slane %v6526_v12, 2  ;;  %v6554_v31 = vld [vmem:[%s6275_s20 + $0xb8] sm:$0x3]  ;;  %v4554_v41 = vld [vmem:[%s9214_s1 + $0x260] sm:$0xff] }
  0x50   : > { %5473 = vmatprep.subr.bf16.mxu1 %v5472_v49  ;;  %9422 = vst [vmem:[#allocation15_spill] sm:$0xff] %v6470_v43  ;;  %v630_v23 = vld [vmem:[%s9214_s1 + $0x50] sm:$0xff]  ;;  %v5440_v32 = vpack.c.bf16 %v4553_v15, %v4552_v14  ;;  %v4555_v42 = vld [vmem:[%s9214_s1 + $0x268] sm:$0xff]  ;;  %v546_v47 = vrot.slane %v6554_v31, 2  ;;  %v6594_v1 = vld [vmem:[%s6275_s20 + $0xe0] sm:$0xff] }
  0x51   : > { %5420 = vmatpush1.bf16.msra.mxu0 %v5419_v50  ;;  %v534_v50 = vrot.slane %v6458_v40, 2  ;;  %v4556_v2 = vld [vmem:[%s9214_s1 + $0x270] sm:$0xff]  ;;  %v6672_v34 = vld [vmem:[%s6275_s20] sm:$0xff] }
  0x52   : > { %5421 = vmatprep.subr.bf16.mxu0 %v9231_v0  ;;  %v634_v15 = vld [vmem:[%s9214_s1 + $0x70] sm:$0xff] }
  0x53   : > { %5475 = vmatpush3.bf16.msra.mxu1 %v5472_v49  ;;  %v533_v49 = vrot.slane %v6455_v39, 2  ;;  %v6538_v16 = vsel %vm507_vm0, %v534_v50, %v536_v62  ;;  %v6591_v62 = vld [vmem:[%s6275_s20 + $0xd8] sm:$0xff] }
  0x54   : > { %5477 = vmatprep.subr.bf16.mxu1 %v5476_v55  ;;  %9426 = vst [vmem:[#allocation19_spill] sm:$0xff] %v6538_v16 }
  0x55   : > { %5423 = vmatpush1.bf16.msra.mxu0 %v5422_v57  ;;  %v4551_v57 = vld [vmem:[%s9214_s1 + $0x248] sm:$0xff]  ;;  %v6509_v63 = vsel %vm507_vm0, %v533_v49, %v534_v50  ;;  %v632_v49 = vld [vmem:[%s9214_s1 + $0x60] sm:$0xff] }
  0x56   : > { %5424 = vmatprep.subr.bf16.mxu0 %v9231_v0  ;;  %9425 = vst [vmem:[#allocation18_spill] sm:$0xff] %v6509_v63  ;;  %v633_v50 = vld [vmem:[%s9214_s1 + $0x68] sm:$0xff] }
  0x57   : > { %5479 = vmatpush3.bf16.msra.mxu1 %v5476_v55  ;;  %v4550_v55 = vld [vmem:[%s9214_s1 + $0x240] sm:$0xff] }
  0x58   : > { %5480 = vmatprep.subr.bf16.mxu1 %v9231_v0  ;;  %v5437_v9 = vpack.c.bf16 %v4551_v57, %v4550_v55  ;;  %v6588_v57 = vld [vmem:[%s6275_s20 + $0xd0] sm:$0x3] }
  0x59   : > { %5426 = vmatpush1.bf16.msra.mxu0 %v5425_v5  ;;  %v539_v5 = vrot.slane %v6492_v54, 2  ;;  %v551_v14 = vrot.slane %v6588_v57, 2 }
  0x5a   : > { %4953 = vmatmul.mubr.f32.vlgmr.msra.gmra.mrb[0].mxu1 %v6402_v10  ;;  %5427 = vmatprep.subr.bf16.mxu0 %v9231_v0  ;;  %v411_v10 = vrot.slane %v6390_v7, 1 }
  0x5b   : > { %5482 = vmatpush1.bf16.msra.mxu1 %v5481_v11  ;;  %4955 = vmatprep.mubr.f32.mxu1 %v6407_v13  ;;  %v6523_v11 = vld [vmem:[%s6275_s20 + $0xa8] sm:$0xff]  ;;  %v6543_v22 = vsel %vm507_vm0, %v538_v3, %v539_v5  ;;  %v4557_v3 = vld [vmem:[%s9214_s1 + $0x278] sm:$0xff]  ;;  %v408_v13 = vrot.slane %v6384_v4, 1 }
  0x5c   : > { %5483 = vmatprep.subr.bf16.mxu1 %v9231_v0  ;;  %9427 = vst [vmem:[#allocation20_spill] sm:$0xff] %v6543_v22  ;;  %v543_v27 = vrot.slane %v6523_v11, 2  ;;  %v659_v4 = vld [vmem:[%s9214_s1 + $0x138] sm:$0xff] }
  0x5d   : > { %5429 = vmatpush1.bf16.msra.mxu0 %v5428_v19  ;;  %v541_v19 = vrot.slane %v6520_v8, 2 }
  0x5e   : > { %4956 = vmatmul.mubr.f32.gmra.mrb[2].mxu1 %v6436_v25  ;;  %5430 = vmatprep.subr.bf16.mxu0 %v9231_v0  ;;  %v6577_v48 = vsel %vm507_vm0, %v543_v27, %v544_v30  ;;  %v553_v27 = vrot.slane %v6591_v62, 2 }
  0x5f   : > { %5485 = vmatpush1.bf16.msra.mxu1 %v5484_v26  ;;  %4958 = vmatprep.mubr.f32.mxu1 %v6441_v29  ;;  %v631_v26 = vld [vmem:[%s9214_s1 + $0x58] sm:$0xff]  ;;  %9429 = vst [vmem:[#allocation22_spill] sm:$0xff] %v6577_v48  ;;  %v6729_v29 = vld [vmem:[%s6275_s20 + $0x128] sm:$0xff] }
  0x60   : > { %5486 = vmatprep.subr.bf16.mxu1 %v9231_v0  ;;  %v5496_v45 = vpack.c.bf16 %v631_v26, %v630_v23  ;;  %v635_v26 = vld [vmem:[%s9214_s1 + $0x78] sm:$0xff]  ;;  %9442 = vst [vmem:[#allocation33_spill] sm:$0xff] %v6729_v29 }
  0x61   : > { %5432 = vmatpush1.bf16.msra.mxu0 %v5431_v38  ;;  %v6560_v38 = vld [vmem:[%s6275_s20 + $0xc8] sm:$0xff] }
  0x62   : > { %4959 = vmatmul.mubr.f32.gmra.mrb[4].mxu1 %v6470_v43  ;;  %5433 = vmatprep.subr.bf16.mxu0 %v9231_v0  ;;  %v549_v55 = vrot.slane %v6560_v38, 2 }
  0x63   : > { %5488 = vmatpush1.bf16.msra.mxu1 %v5487_v44  ;;  %4961 = vmatprep.mubr.f32.mxu1 %v6475_v46  ;;  %v6572_v44 = vsel %vm507_vm0, %v539_v5, %v541_v19  ;;  %v6606_v5 = vsel %vm507_vm0, %v544_v30, %v546_v47  ;;  %v653_v19 = vld [vmem:[%s9214_s1 + $0x108] sm:$0xff]  ;;  %v554_v30 = vrot.slane %v6594_v1, 2  ;;  %v6635_v47 = vld [vmem:[%s6275_s20 + $0xf8] sm:$0xff] }
  0x64   : > { %5489 = vmatprep.subr.bf16.mxu1 %v9231_v0  ;;  %9428 = vst [vmem:[#allocation21_spill] sm:$0xff] %v6572_v44  ;;  %9430 = vst [vmem:[#allocation23_spill] sm:$0xff] %v6606_v5 }
  0x65   : > { %5435 = vmatpush1.bf16.msra.mxu0 %v5434_v52  ;;  %v548_v52 = vrot.slane %v6557_v33, 2 }
  0x66   : > { %4962 = vmatmul.mubr.f32.gmra.mrb[6].mxu1 %v6504_v60  ;;  %5436 = vmatprep.subr.bf16.mxu0 %v9231_v0 }
  0x67   : > { %5491 = vmatpush1.bf16.msra.mxu1 %v5490_v61  ;;  %4964 = vmatprep.mubr.f32.mxu1 %v6509_v63  ;;  %v5443_v61 = vpack.c.bf16 %v4555_v42, %v4554_v41  ;;  %v6620_v23 = vsel %vm507_vm0, %v548_v52, %v549_v55  ;;  %v6631_v41 = vld [vmem:[%s6275_s20 + $0xf0] sm:$0xff]  ;;  %v5446_v42 = vpack.c.bf16 %v4557_v3, %v4556_v2  ;;  %v637_v52 = vld [vmem:[%s9214_s1 + $0x88] sm:$0xff] }
  0x68   : > { %5492 = vmatprep.subr.bf16.mxu1 %v9231_v0  ;;  %9431 = vst [vmem:[#allocation24_spill] sm:$0xff] %v6620_v23  ;;  %v558_v3 = vrot.slane %v6631_v41, 2 }
  0x69   : > { %5438 = vmatpush1.bf16.msra.mxu0 %v5437_v9  ;;  %v5499_v9 = vpack.c.bf16 %v633_v50, %v632_v49  ;;  %v636_v50 = vld [vmem:[%s9214_s1 + $0x80] sm:$0xff] }
  0x6a   : > { %4965 = vmatmul.mubr.f32.gmra.mrb[8].mxu1 %v6538_v16  ;;  %5439 = vmatprep.subr.bf16.mxu0 %v9231_v0  ;;  %v406_v16 = vrot.slane %v6365_v59, 1 }
  0x6b   : > { %5494 = vmatpush1.bf16.msra.mxu1 %v5493_v17  ;;  %4967 = vmatprep.mubr.f32.mxu1 %v6543_v22  ;;  %v652_v17 = vld [vmem:[%s9214_s1 + $0x100] sm:$0xff]  ;;  %v405_v22 = vrot.slane %v6362_v58, 1 }
  0x6c   : > { %5495 = vmatprep.subr.bf16.mxu1 %v9231_v0  ;;  %v5528_v49 = vpack.c.bf16 %v653_v19, %v652_v17  ;;  %v654_v17 = vld [vmem:[%s9214_s1 + $0x110] sm:$0xff] }
  0x6d   : > { %5441 = vmatpush1.bf16.msra.mxu0 %v5440_v32  ;;  %v6628_v32 = vld [vmem:[%s6275_s20 + $0xe8] sm:$0x3]  ;;  %v6658_v19 = vld [vmem:[%s6275_s20 + $0x10] sm:$0x3]  ;;  %v6733_v25 = vsel %vm394_vm1, %v405_v22, %v406_v16 }
  0x6e   : > { %4968 = vmatmul.mubr.f32.gmra.mrb[10].mxu1 %v6572_v44  ;;  %5442 = vmatprep.subr.bf16.mxu0 %v9231_v0  ;;  %v556_v2 = vrot.slane %v6628_v32, 2  ;;  %v508_v44 = vrot.slane %v6672_v34, 2  ;;  %9443 = vst [vmem:[#allocation34_spill] sm:$0xff] %v6733_v25  ;;  %v658_v22 = vld [vmem:[%s9214_s1 + $0x130] sm:$0xff] }
  0x6f   : > { %5497 = vmatpush1.bf16.msra.mxu1 %v5496_v45  ;;  %4970 = vmatprep.mubr.f32.mxu1 %v6577_v48  ;;  %v403_v45 = vrot.slane %v6359_v56, 1  ;;  %v6647_v56 = vsel %vm507_vm0, %v549_v55, %v551_v14  ;;  %v6662_v55 = vsel %vm507_vm0, %v553_v27, %v554_v30  ;;  %v559_v14 = vrot.slane %v6635_v47, 2  ;;  %v6684_v27 = vld [vmem:[%s6275_s20 + $0x8] sm:$0xff] }
  0x70   : > { %5498 = vmatprep.subr.bf16.mxu1 %v9231_v0  ;;  %9432 = vst [vmem:[#allocation25_spill] sm:$0xff] %v6647_v56  ;;  %9433 = vst [vmem:[#allocation26_spill] sm:$0xff] %v6662_v55  ;;  %v5540_v36 = vpack.c.bf16 %v659_v4, %v658_v22 }
  0x71   : > { %5444 = vmatpush1.bf16.msra.mxu0 %v5443_v61  ;;  %v5502_v61 = vpack.c.bf16 %v635_v26, %v634_v15  ;;  %v6666_v15 = vld [vmem:[%s6275_s20 + $0x100] sm:$0x3]  ;;  %v6669_v26 = vld [vmem:[%s6275_s20 + $0x108] sm:$0xff] }
  0x72   : > { %4971 = vmatmul.mubr.f32.gmra.mrb[12].mxu1 %v6606_v5  ;;  %5445 = vmatprep.subr.bf16.mxu0 %v9231_v0  ;;  %v9434_v5 = vrot.slane %v6294_v28, 1  ;;  %v561_v60 = vrot.slane %v6666_v15, 2 }
  0x73   : > { %5500 = vmatpush1.bf16.msra.mxu1 %v5499_v9  ;;  %4973 = vmatprep.mubr.f32.mxu1 %v6620_v23  ;;  %v655_v9 = vld [vmem:[%s9214_s1 + $0x118] sm:$0xff]  ;;  %v511_v23 = vrot.slane %v6658_v19, 2 }
  0x74   : > { %5501 = vmatprep.subr.bf16.mxu1 %v9231_v0  ;;  %v6678_v48 = vsel %vm394_vm1, %v9434_v5, %v403_v45  ;;  %v6681_v0 = vld [vmem:[%s6275_s20 + $0x110] sm:$0xff]  ;;  %v5532_v63 = vpack.c.bf16 %v655_v9, %v654_v17  ;;  %v6693_v5 = vsel %vm507_vm0, %v554_v30, %v556_v2  ;;  %v5505_v45 = vpack.c.bf16 %v637_v52, %v636_v50  ;;  %v656_v17 = vld [vmem:[%s9214_s1 + $0x120] sm:$0xff]  ;;  %v639_v52 = vld [vmem:[%s9214_s1 + $0x98] sm:$0xff] }
  0x75   : > { %5447 = vmatpush1.bf16.msra.mxu0 %v5446_v42  ;;  %9435 = vst [vmem:[#allocation27_spill] sm:$0xff] %v6678_v48  ;;  %v509_v42 = vrot.slane %v6684_v27, 2  ;;  %9436 = vst [vmem:[#allocation28_spill] sm:$0xff] %v6693_v5  ;;  %v9437_v9 = vmov 0.0|0.0   ;;  %v6706_v30 = vsel %vm507_vm0, %v558_v3, %v559_v14  ;;  %v638_v50 = vld [vmem:[%s9214_s1 + $0x90] sm:$0xff]  ;;  %v564_v2 = vrot.slane %v6681_v0, 2 }
  0x76   : > { %4974 = vmatmul.mubr.f32.gmra.mrb[14].mxu1 %v6647_v56  ;;  %5529 = vmatprep.subr.bf16.mxu0 %v5528_v49  ;;  %v563_v56 = vrot.slane %v6669_v26, 2  ;;  %9438 = vst [vmem:[#allocation29_spill] sm:$0xff] %v6706_v30  ;;  %v6726_v3 = vld [vmem:[%s6275_s20 + $0x120] sm:$0xff] }
  0x77   : > { %5503 = vmatpush1.bf16.msra.mxu1 %v5502_v61  ;;  %4976 = vmatprep.mubr.f32.mxu1 %v6662_v55  ;;  %v657_v61 = vld [vmem:[%s9214_s1 + $0x128] sm:$0xff]  ;;  %v6716_v55 = vld [vmem:[%s6275_s20 + $0x118] sm:$0x3]  ;;  %v6719_v46 = vsel %vm507_vm0, %v508_v44, %v509_v42  ;;  %v6722_v43 = vsel %vm507_vm0, %v509_v42, %v511_v23  ;;  %9441 = vst [vmem:[#allocation32_spill] sm:$0xff] %v6726_v3 }
  0x78   : > { %799 = vmatmul.mubr.f32.vlgmr.msra.gmra.mrb[0].mxu0 %v6285_v24  ;;  %5504 = vmatprep.subr.bf16.mxu1 %v9437_v9  ;;  %9439 = vst [vmem:[#allocation30_spill] sm:$0xff] %v6719_v46  ;;  %9440 = vst [vmem:[#allocation31_spill] sm:$0xff] %v6722_v43  ;;  %v5536_v44 = vpack.c.bf16 %v657_v61, %v656_v17  ;;  %v6738_v23 = vsel %vm507_vm0, %v559_v14, %v561_v60  ;;  %v566_v42 = vrot.slane %v6716_v55, 2  ;;  %v640_v60 = vld [vmem:[%s9214_s1 + $0xa0] sm:$0xff]  ;;  %v641_v14 = vld [vmem:[%s9214_s1 + $0xa8] sm:$0xff] }
  0x79   : > { %5531 = vmatpush3.bf16.msra.mxu0 %v5528_v49  ;;  %803 = vmatprep.mubr.f32.mxu0 %v6678_v48  ;;  %9444 = vst [vmem:[#allocation35_spill] sm:$0xff] %v6738_v23  ;;  %v5508_v49 = vpack.c.bf16 %v639_v52, %v638_v50  ;;  %v568_v17 = vrot.slane %v6726_v3, 2  ;;  %v569_v61 = vrot.slane %v6729_v29, 2  ;;  %v6761_v50 = vld [vmem:[%s6275_s20 + $0x130] sm:$0x3]  ;;  %v6765_v52 = vld [vmem:[%s6275_s20 + $0x138] sm:$0xff] }
  0x7a   : > { %4977 = vmatmul.mubr.f32.gmra.mrb[16].mxu1 %v6693_v5  ;;  %5533 = vmatprep.subr.bf16.mxu0 %v5532_v63  ;;  %9446 = vst [vmem:[#allocation37_spill] sm:$0xff] %v6761_v50  ;;  %9447 = vst [vmem:[#allocation38_spill] sm:$0xff] %v6765_v52  ;;  %v410_v5 = vrot.slane %v6387_v6, 1  ;;  %v6778_v43 = vsel %vm507_vm0, %v564_v2, %v566_v42  ;;  %v643_v42 = vld [vmem:[%s9214_s1 + $0xb8] sm:$0xff]  ;;  %v573_v22 = vrot.slane %v6765_v52, 2  ;;  %v413_v46 = vrot.slane %v6418_v18, 1 }
  0x7b   : > { %5506 = vmatpush1.bf16.msra.mxu1 %v5505_v45  ;;  %4979 = vmatprep.mubr.f32.mxu1 %v6706_v30  ;;  %v6750_v45 = vsel %vm507_vm0, %v563_v56, %v564_v2  ;;  %v6768_v56 = vld [vmem:[%s6275_s20 + $0x140] sm:$0xff]  ;;  %v6772_v30 = vsel %vm394_vm1, %v406_v16, %v408_v13  ;;  %9450 = vst [vmem:[#allocation41_spill] sm:$0xff] %v6778_v43  ;;  %v661_v16 = vld [vmem:[%s9214_s1 + $0x148] sm:$0xff]  ;;  %v642_v2 = vld [vmem:[%s9214_s1 + $0xb0] sm:$0xff] }
  0x7c   : > { %804 = vmatmul.mubr.f32.gmra.mrb[2].mxu0 %v6294_v28  ;;  %5507 = vmatprep.subr.bf16.mxu1 %v9437_v9  ;;  %9445 = vst [vmem:[#allocation36_spill] sm:$0xff] %v6750_v45  ;;  %9448 = vst [vmem:[#allocation39_spill] sm:$0xff] %v6768_v56  ;;  %v660_v13 = vld [vmem:[%s9214_s1 + $0x140] sm:$0xff]  ;;  %v574_v4 = vrot.slane %v6768_v56, 2  ;;  %v663_v18 = vld [vmem:[%s9214_s1 + $0x158] sm:$0xff] }
  0x7d   : > { %808 = vmatprep.mubr.f32.mxu0 %v6733_v25  ;;  %5535 = vmatpush3.bf16.msra.mxu0 %v5532_v63  ;;  %9449 = vst [vmem:[#allocation40_spill] sm:$0xff] %v6772_v30  ;;  %v5511_v63 = vpack.c.bf16 %v641_v14, %v640_v60  ;;  %v6801_v60 = vld [vmem:[%s6275_s20 + $0x148] sm:$0x3]  ;;  %v6805_v14 = vld [vmem:[%s6275_s20 + $0x150] sm:$0xff]  ;;  %v5544_v52 = vpack.c.bf16 %v661_v16, %v660_v13 }
  0x7e   : > { %4980 = vmatmul.mubr.f32.gmra.mrb[18].mxu1 %v6738_v23  ;;  %5537 = vmatprep.subr.bf16.mxu0 %v5536_v44  ;;  %v571_v23 = vrot.slane %v6761_v50, 2  ;;  %9452 = vst [vmem:[#allocation43_spill] sm:$0xff] %v6801_v60  ;;  %9453 = vst [vmem:[#allocation44_spill] sm:$0xff] %v6805_v14  ;;  %v5514_v50 = vpack.c.bf16 %v643_v42, %v642_v2  ;;  %v578_v13 = vrot.slane %v6805_v14, 2  ;;  %v6840_v2 = vld [vmem:[%s6275_s20 + $0x160] sm:$0x3] }
  0x7f   : > { %5509 = vmatpush1.bf16.msra.mxu1 %v5508_v49  ;;  %4982 = vmatprep.mubr.f32.mxu1 %v6750_v45  ;;  %v6790_v49 = vsel %vm507_vm0, %v568_v17, %v569_v61  ;;  %v6808_v17 = vld [vmem:[%s6275_s20 + $0x158] sm:$0xff]  ;;  %v6812_v45 = vsel %vm394_vm1, %v410_v5, %v411_v10  ;;  %v662_v5 = vld [vmem:[%s9214_s1 + $0x150] sm:$0xff]  ;;  %9458 = vst [vmem:[#allocation49_spill] sm:$0xff] %v6840_v2  ;;  %v6844_v42 = vld [vmem:[%s6275_s20 + $0x168] sm:$0xff]  ;;  %v416_v14 = vrot.slane %v6424_v21, 1 }
  0x80   : > { %809 = vmatmul.mubr.f32.gmra.mrb[4].mxu0 %v6362_v58  ;;  %5510 = vmatprep.subr.bf16.mxu1 %v9437_v9  ;;  %9451 = vst [vmem:[#allocation42_spill] sm:$0xff] %v6790_v49  ;;  %9454 = vst [vmem:[#allocation45_spill] sm:$0xff] %v6808_v17  ;;  %v6817_v56 = vsel %vm507_vm0, %v569_v61, %v571_v23  ;;  %v644_v23 = vld [vmem:[%s9214_s1 + $0xc0] sm:$0xff]  ;;  %v645_v61 = vld [vmem:[%s9214_s1 + $0xc8] sm:$0xff]  ;;  %v579_v16 = vrot.slane %v6808_v17, 2  ;;  %v5548_v17 = vpack.c.bf16 %v663_v18, %v662_v5 }
  0x81   : > { %813 = vmatprep.mubr.f32.mxu0 %v6772_v30  ;;  %5539 = vmatpush3.bf16.msra.mxu0 %v5536_v44  ;;  %9455 = vst [vmem:[#allocation46_spill] sm:$0xff] %v6812_v45  ;;  %9456 = vst [vmem:[#allocation47_spill] sm:$0xff] %v6817_v56  ;;  %v576_v44 = vrot.slane %v6801_v60, 2  ;;  %v583_v5 = vrot.slane %v6844_v42, 2 }
  0x82   : > { %4983 = vmatmul.mubr.f32.gmra.mrb[20].mxu1 %v6778_v43  ;;  %5541 = vmatprep.subr.bf16.mxu0 %v5540_v36  ;;  %9459 = vst [vmem:[#allocation50_spill] sm:$0xff] %v6844_v42  ;;  %v415_v43 = vrot.slane %v6421_v20, 1 }
  0x83   : > { %5512 = vmatpush1.bf16.msra.mxu1 %v5511_v63  ;;  %4985 = vmatprep.mubr.f32.mxu1 %v6790_v49  ;;  %v6829_v63 = vsel %vm507_vm0, %v573_v22, %v574_v4  ;;  %v6847_v22 = vld [vmem:[%s6275_s20 + $0x170] sm:$0xff]  ;;  %v6851_v49 = vsel %vm394_vm1, %v411_v10, %v413_v46  ;;  %v6857_v60 = vsel %vm507_vm0, %v574_v4, %v576_v44  ;;  %v664_v10 = vld [vmem:[%s9214_s1 + $0x160] sm:$0xff]  ;;  %v665_v46 = vld [vmem:[%s9214_s1 + $0x168] sm:$0xff] }
  0x84   : > { %814 = vmatmul.mubr.f32.gmra.mrb[6].mxu0 %v6365_v59  ;;  %5513 = vmatprep.subr.bf16.mxu1 %v9437_v9  ;;  %9457 = vst [vmem:[#allocation48_spill] sm:$0xff] %v6829_v63  ;;  %9460 = vst [vmem:[#allocation51_spill] sm:$0xff] %v6847_v22  ;;  %v646_v4 = vld [vmem:[%s9214_s1 + $0xd0] sm:$0xff]  ;;  %v647_v44 = vld [vmem:[%s9214_s1 + $0xd8] sm:$0xff]  ;;  %v584_v18 = vrot.slane %v6847_v22, 2  ;;  %v5552_v42 = vpack.c.bf16 %v665_v46, %v664_v10 }
  0x85   : > { %818 = vmatprep.mubr.f32.mxu0 %v6812_v45  ;;  %5543 = vmatpush3.bf16.msra.mxu0 %v5540_v36  ;;  %9461 = vst [vmem:[#allocation52_spill] sm:$0xff] %v6851_v49  ;;  %9462 = vst [vmem:[#allocation53_spill] sm:$0xff] %v6857_v60  ;;  %v5517_v36 = vpack.c.bf16 %v645_v61, %v644_v23  ;;  %v6880_v23 = vld [vmem:[%s6275_s20 + $0x178] sm:$0x3]  ;;  %v6884_v61 = vld [vmem:[%s6275_s20 + $0x180] sm:$0xff]  ;;  %v5520_v29 = vpack.c.bf16 %v647_v44, %v646_v4  ;;  %v420_v44 = vrot.slane %v6455_v39, 1 }
  0x86   : > { %4986 = vmatmul.mubr.f32.gmra.mrb[22].mxu1 %v6817_v56  ;;  %5545 = vmatprep.subr.bf16.mxu0 %v5544_v52  ;;  %v581_v56 = vrot.slane %v6840_v2, 2  ;;  %v418_v2 = vrot.slane %v6452_v35, 1  ;;  %v586_v3 = vrot.slane %v6880_v23, 2  ;;  %v667_v35 = vld [vmem:[%s9214_s1 + $0x178] sm:$0xff]  ;;  %v6919_v46 = vld [vmem:[%s6275_s20 + $0x190] sm:$0x3] }
  0x87   : > { %5515 = vmatpush1.bf16.msra.mxu1 %v5514_v50  ;;  %4988 = vmatprep.mubr.f32.mxu1 %v6829_v63  ;;  %v6869_v50 = vsel %vm507_vm0, %v578_v13, %v579_v16  ;;  %v6887_v13 = vld [vmem:[%s6275_s20 + $0x188] sm:$0xff]  ;;  %v6891_v63 = vsel %vm394_vm1, %v415_v43, %v416_v14  ;;  %v6908_v43 = vsel %vm507_vm0, %v583_v5, %v584_v18  ;;  %v421_v5 = vrot.slane %v6458_v40, 1 }
  0x88   : > { %819 = vmatmul.mubr.f32.gmra.mrb[8].mxu0 %v6387_v6  ;;  %5516 = vmatprep.subr.bf16.mxu1 %v9437_v9  ;;  %9463 = vst [vmem:[#allocation54_spill] sm:$0xff] %v6869_v50  ;;  %9464 = vst [vmem:[#allocation55_spill] sm:$0xff] %v6887_v13  ;;  %v6896_v22 = vsel %vm507_vm0, %v579_v16, %v581_v56  ;;  %v648_v56 = vld [vmem:[%s9214_s1 + $0xe0] sm:$0xff]  ;;  %v649_v16 = vld [vmem:[%s9214_s1 + $0xe8] sm:$0xff]  ;;  %v679_v10 = vrot.slane %v6887_v13, 2  ;;  %v6924_v4 = vsel %vm394_vm1, %v416_v14, %v418_v2 }
  0x89   : > { %823 = vmatprep.mubr.f32.mxu0 %v6851_v49  ;;  %5547 = vmatpush3.bf16.msra.mxu0 %v5544_v52  ;;  %9465 = vst [vmem:[#allocation56_spill] sm:$0xff] %v6891_v63  ;;  %9466 = vst [vmem:[#allocation57_spill] sm:$0xff] %v6896_v22  ;;  %v666_v52 = vld [vmem:[%s9214_s1 + $0x170] sm:$0xff]  ;;  %v5523_v13 = vpack.c.bf16 %v649_v16, %v648_v56  ;;  %v4606_v14 = vld [vmem:[%s9214_s1 + $0x400] sm:$0xff]  ;;  %v6955_v56 = vsel %vm394_vm1, %v420_v44, %v421_v5  ;;  %v423_v16 = vrot.slane %v6486_v51, 1 }
  0x8a   : > { %4989 = vmatmul.mubr.f32.gmra.mrb[24].mxu1 %v6857_v60  ;;  %5549 = vmatprep.subr.bf16.mxu0 %v5548_v17  ;;  %9467 = vst [vmem:[#allocation58_spill] sm:$0xff] %v6908_v43  ;;  %9468 = vst [vmem:[#allocation59_spill] sm:$0xff] %v6924_v4  ;;  %v6930_v60 = vsel %vm507_vm0, %v584_v18, %v586_v3  ;;  %v4607_v2 = vld [vmem:[%s9214_s1 + $0x408] sm:$0xff]  ;;  %v650_v3 = vld [vmem:[%s9214_s1 + $0xf0] sm:$0xff]  ;;  %v398_v44 = vrot.slane %v6658_v19, 1  ;;  %v426_v19 = vrot.slane %v6492_v54, 1 }
  0x8b   : > { %5518 = vmatpush1.bf16.msra.mxu1 %v5517_v36  ;;  %4991 = vmatprep.mubr.f32.mxu1 %v6869_v50  ;;  %v678_v36 = vrot.slane %v6884_v61, 2  ;;  %v5556_v50 = vpack.c.bf16 %v667_v35, %v666_v52  ;;  %v651_v18 = vld [vmem:[%s9214_s1 + $0xf8] sm:$0xff]  ;;  %v395_v52 = vrot.slane %v6672_v34, 1  ;;  %v396_v35 = vrot.slane %v6684_v27, 1  ;;  %9469 = vst [vmem:[#allocation60_spill] sm:$0xff] %v6955_v56  ;;  %v4574_v51 = vld [vmem:[%s9214_s1 + $0x300] sm:$0xff] }
  0x8c   : > { %824 = vmatmul.mubr.f32.gmra.mrb[10].mxu0 %v6390_v7  ;;  %5519 = vmatprep.subr.bf16.mxu1 %v9437_v9 }
  0x8d   : > { %828 = vmatprep.mubr.f32.mxu0 %v6891_v63  ;;  %5551 = vmatpush3.bf16.msra.mxu0 %v5548_v17  ;;  %v681_v17 = vrot.slane %v6919_v46, 2 }
  0x8e   : > { %4992 = vmatmul.mubr.f32.gmra.mrb[26].mxu1 %v6896_v22  ;;  %5553 = vmatprep.subr.bf16.mxu0 %v5552_v42  ;;  %v5526_v22 = vpack.c.bf16 %v651_v18, %v650_v3  ;;  %v428_v3 = vrot.slane %v6520_v8, 1 }
  0x8f   : > { %5521 = vmatpush1.bf16.msra.mxu1 %v5520_v29  ;;  %4994 = vmatprep.mubr.f32.mxu1 %v6908_v43  ;;  %v6942_v29 = vsel %vm507_vm0, %v678_v36, %v679_v10  ;;  %v6958_v36 = vpack.c.bf16 %v4607_v2, %v4606_v14  ;;  %v6962_v43 = vsel %vm507_vm0, %v679_v10, %v681_v17  ;;  %v425_v17 = vrot.slane %v6489_v53, 1 }
  0x90   : > { %829 = vmatmul.mubr.f32.gmra.mrb[12].mxu0 %v6421_v20  ;;  %5522 = vmatprep.subr.bf16.mxu1 %v9437_v9  ;;  %v6977_v10 = vsel %vm394_vm1, %v421_v5, %v423_v16  ;;  %v399_v2 = vsel %vm394_vm1, %v396_v35, %v398_v44  ;;  %v4577_v5 = vld [vmem:[%s9214_s1 + $0x318] sm:$0xff]  ;;  %v7008_v8 = vsel %vm394_vm1, %v426_v19, %v428_v3  ;;  %v431_v16 = vrot.slane %v6526_v12, 1  ;;  %v4580_v44 = vld [vmem:[%s9214_s1 + $0x330] sm:$0xff] }
  0x91   : > { %833 = vmatprep.mubr.f32.mxu0 %v6924_v4  ;;  %5555 = vmatpush3.bf16.msra.mxu0 %v5552_v42  ;;  %v397_v42 = vsel %vm394_vm1, %v395_v52, %v396_v35  ;;  %9470 = vst [vmem:[#allocation61_spill] sm:$0xff] %v6977_v10  ;;  %v4578_v52 = vld [vmem:[%s9214_s1 + $0x320] sm:$0xff]  ;;  %9472 = vst [vmem:[#allocation63_spill] sm:$0xff] %v7008_v8  ;;  %v430_v35 = vrot.slane %v6523_v11, 1 }
  0x92   : > { %4995 = vmatmul.mubr.f32.gmra.mrb[28].mxu1 %v6930_v60  ;;  %5557 = vmatprep.subr.bf16.mxu0 %v5556_v50 }
  0x93   : > { %5524 = vmatpush1.bf16.msra.mxu1 %v5523_v13  ;;  %4997 = vmatprep.mubr.f32.mxu1 %v6942_v29  ;;  %v4575_v13 = vld [vmem:[%s9214_s1 + $0x308] sm:$0xff] }
  0x94   : > { %834 = vmatmul.mubr.f32.gmra.mrb[14].mxu0 %v6424_v21  ;;  %5525 = vmatprep.subr.bf16.mxu1 %v9437_v9  ;;  %v5561_v14 = vpack.c.bf16 %v4575_v13, %v4574_v51  ;;  %v7024_v51 = vsel %vm394_vm1, %v430_v35, %v431_v16  ;;  %v433_v13 = vrot.slane %v6554_v31, 1  ;;  %v440_v35 = vrot.slane %v6591_v62, 1 }
  0x95   : > { %838 = vmatprep.mubr.f32.mxu0 %v6955_v56  ;;  %5559 = vmatpush3.bf16.msra.mxu0 %v5556_v50  ;;  %v4576_v50 = vld [vmem:[%s9214_s1 + $0x310] sm:$0xff]  ;;  %9473 = vst [vmem:[#allocation64_spill] sm:$0xff] %v7024_v51 }
  0x96   : > { %4998 = vmatmul.mubr.f32.gmra.mrb[30].mxu1 %v6962_v43  ;;  %5609 = vmatprep.subr.bf16.mxu0 %v6958_v36  ;;  %v5564_v18 = vpack.c.bf16 %v4577_v5, %v4576_v50  ;;  %v7039_v31 = vsel %vm394_vm1, %v431_v16, %v433_v13  ;;  %v4584_v5 = vld [vmem:[%s9214_s1 + $0x350] sm:$0xff]  ;;  %v441_v16 = vrot.slane %v6594_v1, 1  ;;  %v443_v13 = vrot.slane %v6628_v32, 1 }
  0x97   : > { %5527 = vmatpush1.bf16.msra.mxu1 %v5526_v22  ;;  %1248 = vmatprep.mubr.f32.mxu1 %v397_v42  ;;  %v6994_v22 = vsel %vm394_vm1, %v425_v17, %v426_v19  ;;  %v4582_v19 = vld [vmem:[%s9214_s1 + $0x340] sm:$0xff]  ;;  %9474 = vst [vmem:[#allocation65_spill] sm:$0xff] %v7039_v31 }
  0x98   : > { %839 = vmatmul.mubr.f32.gmra.mrb[16].mxu0 %v6455_v39  ;;  %5560 = vmatprep.subr.bf16.mxu1 %v9437_v9  ;;  %9471 = vst [vmem:[#allocation62_spill] sm:$0xff] %v6994_v22  ;;  %v7101_v32 = vsel %vm394_vm1, %v441_v16, %v443_v13  ;;  %v4598_v13 = vld [vmem:[%s9214_s1 + $0x3c0] sm:$0xff] }
  0x99   : > { %843 = vmatprep.mubr.f32.mxu0 %v6977_v10  ;;  %9478 = vst [vmem:[#allocation69_spill] sm:$0xff] %v7101_v32 }
  0x9a   : > { %1249 = vmatmul.mubr.f32.vlgmr.msra.gmra.mrb[32].mxu1 %v6672_v34  ;;  %v4579_v34 = vld [vmem:[%s9214_s1 + $0x328] sm:$0xff] }
  0x9b   : > { %1253 = vmatprep.mubr.f32.mxu1 %v399_v2  ;;  %5562 = vmatpush1.bf16.msra.mxu1 %v5561_v14  ;;  %v5567_v42 = vpack.c.bf16 %v4579_v34, %v4578_v52  ;;  %v435_v14 = vrot.slane %v6557_v33, 1  ;;  %v436_v2 = vrot.slane %v6560_v38, 1  ;;  %v4586_v34 = vld [vmem:[%s9214_s1 + $0x360] sm:$0xff] }
  0x9c   : > { %844 = vmatmul.mubr.f32.gmra.mrb[18].mxu0 %v6458_v40  ;;  %5563 = vmatprep.subr.bf16.mxu1 %v9437_v9 }
  0x9d   : > { %848 = vmatprep.mubr.f32.mxu0 %v6994_v22  ;;  %v7055_v3 = vsel %vm394_vm1, %v435_v14, %v436_v2  ;;  %v446_v14 = vrot.slane %v6635_v47, 1 }
  0x9e   : > { %1254 = vmatmul.mubr.f32.gmra.mrb[34].mxu1 %v6684_v27  ;;  %v4581_v27 = vld [vmem:[%s9214_s1 + $0x338] sm:$0xff]  ;;  %9475 = vst [vmem:[#allocation66_spill] sm:$0xff] %v7055_v3 }
  0x9f   : > { %1258 = vmatprep.mubr.f32.mxu1 %v6315_v37  ;;  %5565 = vmatpush1.bf16.msra.mxu1 %v5564_v18  ;;  %v5570_v17 = vpack.c.bf16 %v4581_v27, %v4580_v44  ;;  %v438_v18 = vrot.slane %v6588_v57, 1  ;;  %v4588_v44 = vld [vmem:[%s9214_s1 + $0x370] sm:$0xff]  ;;  %v7086_v27 = vsel %vm394_vm1, %v440_v35, %v441_v16 }
  0xa0   : > { %849 = vmatmul.mubr.f32.gmra.mrb[20].mxu0 %v6489_v53  ;;  %5566 = vmatprep.subr.bf16.mxu1 %v9437_v9  ;;  %9477 = vst [vmem:[#allocation68_spill] sm:$0xff] %v7086_v27  ;;  %v4596_v16 = vld [vmem:[%s9214_s1 + $0x3b0] sm:$0xff] }
  0xa1   : > { %853 = vmatprep.mubr.f32.mxu0 %v7008_v8  ;;  %v7070_v57 = vsel %vm394_vm1, %v436_v2, %v438_v18 }
  0xa2   : > { %1259 = vmatmul.mubr.f32.gmra.mrb[36].mxu1 %v6285_v24  ;;  %v4583_v24 = vld [vmem:[%s9214_s1 + $0x348] sm:$0xff]  ;;  %9476 = vst [vmem:[#allocation67_spill] sm:$0xff] %v7070_v57 }
  0xa3   : > { %1263 = vmatprep.mubr.f32.mxu1 %v6678_v48  ;;  %5568 = vmatpush1.bf16.msra.mxu1 %v5567_v42  ;;  %v5573_v50 = vpack.c.bf16 %v4583_v24, %v4582_v19  ;;  %v4590_v19 = vld [vmem:[%s9214_s1 + $0x380] sm:$0xff]  ;;  %v445_v24 = vrot.slane %v6631_v41, 1 }
  0xa4   : > { %854 = vmatmul.mubr.f32.gmra.mrb[22].mxu0 %v6492_v54  ;;  %5569 = vmatprep.subr.bf16.mxu1 %v9437_v9 }
  0xa5   : > { %858 = vmatprep.mubr.f32.mxu0 %v7024_v51 }
  0xa6   : > { %1264 = vmatmul.mubr.f32.gmra.mrb[38].mxu1 %v6294_v28  ;;  %v4585_v28 = vld [vmem:[%s9214_s1 + $0x358] sm:$0xff] }
  0xa7   : > { %1268 = vmatprep.mubr.f32.mxu1 %v6733_v25  ;;  %5571 = vmatpush1.bf16.msra.mxu1 %v5570_v17  ;;  %v5576_v52 = vpack.c.bf16 %v4585_v28, %v4584_v5  ;;  %v7117_v5 = vsel %vm394_vm1, %v445_v24, %v446_v14  ;;  %v448_v28 = vrot.slane %v6666_v15, 1 }
  0xa8   : > { %859 = vmatmul.mubr.f32.gmra.mrb[24].mxu0 %v6523_v11  ;;  %5572 = vmatprep.subr.bf16.mxu1 %v9437_v9  ;;  %9479 = vst [vmem:[#allocation70_spill] sm:$0xff] %v7117_v5 }
  0xa9   : > { %863 = vmatprep.mubr.f32.mxu0 %v7039_v31  ;;  %v7132_v15 = vsel %vm394_vm1, %v446_v14, %v448_v28 }
  0xaa   : > { %1269 = vmatmul.mubr.f32.gmra.mrb[40].mxu1 %v6362_v58  ;;  %v4587_v58 = vld [vmem:[%s9214_s1 + $0x368] sm:$0xff]  ;;  %9480 = vst [vmem:[#allocation71_spill] sm:$0xff] %v7132_v15 }
  0xab   : > { %1273 = vmatprep.mubr.f32.mxu1 %v6772_v30  ;;  %5574 = vmatpush1.bf16.msra.mxu1 %v5573_v50  ;;  %v5579_v42 = vpack.c.bf16 %v4587_v58, %v4586_v34  ;;  %v4592_v50 = vld [vmem:[%s9214_s1 + $0x390] sm:$0xff]  ;;  %v450_v34 = vrot.slane %v6669_v26, 1  ;;  %v451_v58 = vrot.slane %v6681_v0, 1 }
  0xac   : > { %864 = vmatmul.mubr.f32.gmra.mrb[26].mxu0 %v6526_v12  ;;  %5575 = vmatprep.subr.bf16.mxu1 %v9437_v9 }
  0xad   : > { %868 = vmatprep.mubr.f32.mxu0 %v7055_v3 }
  0xae   : > { %1274 = vmatmul.mubr.f32.gmra.mrb[42].mxu1 %v6365_v59  ;;  %v4589_v59 = vld [vmem:[%s9214_s1 + $0x378] sm:$0xff] }
  0xaf   : > { %1278 = vmatprep.mubr.f32.mxu1 %v6812_v45  ;;  %5577 = vmatpush1.bf16.msra.mxu1 %v5576_v52  ;;  %v5582_v17 = vpack.c.bf16 %v4589_v59, %v4588_v44  ;;  %v4594_v52 = vld [vmem:[%s9214_s1 + $0x3a0] sm:$0xff]  ;;  %v453_v44 = vrot.slane %v6716_v55, 1 }
  0xb0   : > { %869 = vmatmul.mubr.f32.gmra.mrb[28].mxu0 %v6557_v33  ;;  %5578 = vmatprep.subr.bf16.mxu1 %v9437_v9 }
  0xb1   : > { %873 = vmatprep.mubr.f32.mxu0 %v7070_v57  ;;  %v7163_v55 = vsel %vm394_vm1, %v451_v58, %v453_v44  ;;  %v4604_v44 = vld [vmem:[%s9214_s1 + $0x3f0] sm:$0xff] }
  0xb2   : > { %1279 = vmatmul.mubr.f32.gmra.mrb[44].mxu1 %v6387_v6  ;;  %v4591_v6 = vld [vmem:[%s9214_s1 + $0x388] sm:$0xff]  ;;  %9482 = vst [vmem:[#allocation73_spill] sm:$0xff] %v7163_v55 }
  0xb3   : > { %1283 = vmatprep.mubr.f32.mxu1 %v6851_v49  ;;  %5580 = vmatpush1.bf16.msra.mxu1 %v5579_v42  ;;  %v5585_v2 = vpack.c.bf16 %v4591_v6, %v4590_v19  ;;  %v7148_v42 = vsel %vm394_vm1, %v450_v34, %v451_v58  ;;  %v9484_v6 = vld [vmem:[#allocation33_spill] sm:$0xff]  ;;  %v9488_v34 = vld [vmem:[#allocation38_spill] sm:$0xff] }
  0xb4   : > { %874 = vmatmul.mubr.f32.gmra.mrb[30].mxu0 %v6560_v38  ;;  %5581 = vmatprep.subr.bf16.mxu1 %v9437_v9  ;;  %9481 = vst [vmem:[#allocation72_spill] sm:$0xff] %v7148_v42  ;;  %v456_v24 = vrot.slane %v9484_v6, 1  ;;  %v460_v58 = vrot.slane %v9488_v34, 1 }
  0xb5   : > { %878 = vmatprep.mubr.f32.mxu0 %v7086_v27 }
  0xb6   : > { %1284 = vmatmul.mubr.f32.gmra.mrb[46].mxu1 %v6390_v7  ;;  %v4593_v7 = vld [vmem:[%s9214_s1 + $0x398] sm:$0xff] }
  0xb7   : > { %1288 = vmatprep.mubr.f32.mxu1 %v6891_v63  ;;  %5583 = vmatpush1.bf16.msra.mxu1 %v5582_v17  ;;  %v5588_v18 = vpack.c.bf16 %v4593_v7, %v4592_v50  ;;  %v9483_v17 = vld [vmem:[#allocation32_spill] sm:$0xff]  ;;  %v9486_v7 = vld [vmem:[#allocation37_spill] sm:$0xff] }
  0xb8   : > { %879 = vmatmul.mubr.f32.gmra.mrb[32].mxu0 %v6591_v62  ;;  %5584 = vmatprep.subr.bf16.mxu1 %v9437_v9  ;;  %v455_v19 = vrot.slane %v9483_v17, 1  ;;  %v458_v28 = vrot.slane %v9486_v7, 1 }
  0xb9   : > { %883 = vmatprep.mubr.f32.mxu0 %v7101_v32 }
  0xba   : > { %1289 = vmatmul.mubr.f32.gmra.mrb[48].mxu1 %v6421_v20  ;;  %v4595_v20 = vld [vmem:[%s9214_s1 + $0x3a8] sm:$0xff]  ;;  %v7179_v50 = vsel %vm394_vm1, %v455_v19, %v456_v24 }
  0xbb   : > { %1293 = vmatprep.mubr.f32.mxu1 %v6924_v4  ;;  %5586 = vmatpush1.bf16.msra.mxu1 %v5585_v2  ;;  %v5591_v35 = vpack.c.bf16 %v4595_v20, %v4594_v52  ;;  %v4600_v2 = vld [vmem:[%s9214_s1 + $0x3d0] sm:$0xff]  ;;  %9485 = vst [vmem:[#allocation32_spill] sm:$0xff] %v7179_v50  ;;  %v4602_v52 = vld [vmem:[%s9214_s1 + $0x3e0] sm:$0xff]  ;;  %v7194_v20 = vsel %vm394_vm1, %v456_v24, %v458_v28 }
  0xbc   : > { %884 = vmatmul.mubr.f32.gmra.mrb[34].mxu0 %v6594_v1  ;;  %5587 = vmatprep.subr.bf16.mxu1 %v9437_v9  ;;  %9487 = vst [vmem:[#allocation33_spill] sm:$0xff] %v7194_v20 }
  0xbd   : > { %888 = vmatprep.mubr.f32.mxu0 %v7117_v5 }
  0xbe   : > { %1294 = vmatmul.mubr.f32.gmra.mrb[50].mxu1 %v6424_v21  ;;  %v4597_v21 = vld [vmem:[%s9214_s1 + $0x3b8] sm:$0xff] }
  0xbf   : > { %1298 = vmatprep.mubr.f32.mxu1 %v6955_v56  ;;  %5589 = vmatpush1.bf16.msra.mxu1 %v5588_v18  ;;  %v5594_v59 = vpack.c.bf16 %v4597_v21, %v4596_v16 }
  0xc0   : > { %889 = vmatmul.mubr.f32.gmra.mrb[36].mxu0 %v6631_v41  ;;  %5590 = vmatprep.subr.bf16.mxu1 %v9437_v9 }
  0xc1   : > { %893 = vmatprep.mubr.f32.mxu0 %v7132_v15 }
  0xc2   : > { %1299 = vmatmul.mubr.f32.gmra.mrb[52].mxu1 %v6455_v39  ;;  %v4599_v39 = vld [vmem:[%s9214_s1 + $0x3c8] sm:$0xff] }
  0xc3   : > { %1303 = vmatprep.mubr.f32.mxu1 %v6977_v10  ;;  %5592 = vmatpush1.bf16.msra.mxu1 %v5591_v35  ;;  %v5597_v14 = vpack.c.bf16 %v4599_v39, %v4598_v13  ;;  %v9489_v35 = vld [vmem:[#allocation39_spill] sm:$0xff] }
  0xc4   : > { %894 = vmatmul.mubr.f32.gmra.mrb[38].mxu0 %v6635_v47  ;;  %5593 = vmatprep.subr.bf16.mxu1 %v9437_v9  ;;  %v461_v16 = vrot.slane %v9489_v35, 1  ;;  %v9491_v13 = vld [vmem:[#allocation43_spill] sm:$0xff] }
  0xc5   : > { %898 = vmatprep.mubr.f32.mxu0 %v7148_v42  ;;  %v463_v39 = vrot.slane %v9491_v13, 1 }
  0xc6   : > { %1304 = vmatmul.mubr.f32.gmra.mrb[54].mxu1 %v6458_v40  ;;  %v4601_v40 = vld [vmem:[%s9214_s1 + $0x3d8] sm:$0xff] }
  0xc7   : > { %1308 = vmatprep.mubr.f32.mxu1 %v6994_v22  ;;  %5595 = vmatpush1.bf16.msra.mxu1 %v5594_v59  ;;  %v5600_v18 = vpack.c.bf16 %v4601_v40, %v4600_v2  ;;  %v7210_v59 = vsel %vm394_vm1, %v460_v58, %v461_v16  ;;  %v7219_v24 = vsel %vm394_vm1, %v461_v16, %v463_v39  ;;  %v9494_v2 = vld [vmem:[#allocation45_spill] sm:$0xff]  ;;  %v9499_v58 = vld [vmem:[#allocation51_spill] sm:$0xff]  ;;  %v4611_v39 = vld [vmem:[%s9214_s1 + $0x428] sm:$0xff] }
  0xc8   : > { %899 = vmatmul.mubr.f32.gmra.mrb[40].mxu0 %v6669_v26  ;;  %5596 = vmatprep.subr.bf16.mxu1 %v9437_v9  ;;  %9490 = vst [vmem:[#allocation37_spill] sm:$0xff] %v7210_v59  ;;  %9492 = vst [vmem:[#allocation38_spill] sm:$0xff] %v7219_v24  ;;  %v466_v40 = vrot.slane %v9494_v2, 1 }
  0xc9   : > { %903 = vmatprep.mubr.f32.mxu0 %v7163_v55 }
  0xca   : > { %1309 = vmatmul.mubr.f32.gmra.mrb[56].mxu1 %v6489_v53  ;;  %v4603_v53 = vld [vmem:[%s9214_s1 + $0x3e8] sm:$0xff] }
  0xcb   : > { %1313 = vmatprep.mubr.f32.mxu1 %v7008_v8  ;;  %5598 = vmatpush1.bf16.msra.mxu1 %v5597_v14  ;;  %v5603_v21 = vpack.c.bf16 %v4603_v53, %v4602_v52  ;;  %v9498_v52 = vld [vmem:[#allocation50_spill] sm:$0xff] }
  0xcc   : > { %904 = vmatmul.mubr.f32.gmra.mrb[42].mxu0 %v6681_v0  ;;  %5599 = vmatprep.subr.bf16.mxu1 %v9437_v9  ;;  %v470_v53 = vrot.slane %v9498_v52, 1 }
  0xcd   : > { %908 = vmatprep.mubr.f32.mxu0 %v7179_v50 }
  0xce   : > { %1314 = vmatmul.mubr.f32.gmra.mrb[58].mxu1 %v6492_v54  ;;  %v4605_v54 = vld [vmem:[%s9214_s1 + $0x3f8] sm:$0xff] }
  0xcf   : > { %1318 = vmatprep.mubr.f32.mxu1 %v7024_v51  ;;  %5601 = vmatpush1.bf16.msra.mxu1 %v5600_v18  ;;  %v5606_v19 = vpack.c.bf16 %v4605_v54, %v4604_v44  ;;  %v671_v44 = vrot.slane %v6884_v61, 1  ;;  %v9502_v54 = vld [vmem:[#allocation55_spill] sm:$0xff] }
  0xd0   : > { %909 = vmatmul.mubr.f32.gmra.mrb[44].mxu0 %v9483_v17  ;;  %5602 = vmatprep.subr.bf16.mxu1 %v9437_v9 }
  0xd1   : > { %913 = vmatprep.mubr.f32.mxu0 %v7194_v20 }
  0xd2   : > { %1319 = vmatmul.mubr.f32.gmra.mrb[60].mxu1 %v6523_v11  ;;  %v9493_v11 = vld [vmem:[#allocation44_spill] sm:$0xff] }
  0xd3   : > { %1323 = vmatprep.mubr.f32.mxu1 %v7039_v31  ;;  %5604 = vmatpush1.bf16.msra.mxu1 %v5603_v21  ;;  %v465_v14 = vrot.slane %v9493_v11, 1 }
  0xd4   : > { %914 = vmatmul.mubr.f32.gmra.mrb[46].mxu0 %v9484_v6  ;;  %5605 = vmatprep.subr.bf16.mxu1 %v9437_v9 }
  0xd5   : > { %918 = vmatprep.mubr.f32.mxu0 %v7210_v59  ;;  %v7228_v7 = vsel %vm394_vm1, %v465_v14, %v466_v40  ;;  %v9507_v14 = vld [vmem:[#allocation9_spill] sm:$0xff] }
  0xd6   : > { %1324 = vmatmul.mubr.f32.gmra.mrb[62].mxu1 %v6526_v12  ;;  %9495 = vst [vmem:[#allocation39_spill] sm:$0xff] %v7228_v7  ;;  %v9496_v12 = vld [vmem:[#allocation49_spill] sm:$0xff] }
  0xd7   : > { %1328 = vmatprep.mubr.f32.mxu1 %v7055_v3  ;;  %5607 = vmatpush1.bf16.msra.mxu1 %v5606_v19  ;;  %v468_v28 = vrot.slane %v9496_v12, 1  ;;  %v9506_v19 = vld [vmem:[#allocation31_spill] sm:$0xff]  ;;  %v4613_v12 = vld [vmem:[%s9214_s1 + $0x438] sm:$0xff] }
  0xd8   : > { %919 = vmatmul.mubr.f32.gmra.mrb[48].mxu0 %v9488_v34 }
  0xd9   : > { %923 = vmatprep.mubr.f32.mxu0 %v7219_v24  ;;  %v7236_v18 = vsel %vm394_vm1, %v466_v40, %v468_v28  ;;  %v4612_v40 = vld [vmem:[%s9214_s1 + $0x430] sm:$0xff]  ;;  %v9508_v28 = vld [vmem:[#allocation11_spill] sm:$0xff] }
  0xda   : > { %1329 = vmatmul.mubr.f32.gmra.mrb[64].mxu1 %v6557_v33  ;;  %9497 = vst [vmem:[#allocation43_spill] sm:$0xff] %v7236_v18  ;;  %v471_v33 = vrot.slane %v9499_v58, 1 }
  0xdb   : > { %1333 = vmatprep.mubr.f32.mxu1 %v7070_v57 }
  0xdc   : > { %924 = vmatmul.mubr.f32.gmra.mrb[50].mxu0 %v9489_v35  ;;  %v7245_v16 = vsel %vm394_vm1, %v470_v53, %v471_v33  ;;  %v9509_v53 = vld [vmem:[#allocation12_spill] sm:$0xff] }
  0xdd   : > { %928 = vmatprep.mubr.f32.mxu0 %v7228_v7  ;;  %9500 = vst [vmem:[#allocation44_spill] sm:$0xff] %v7245_v16 }
  0xde   : > { %1334 = vmatmul.mubr.f32.gmra.mrb[66].mxu1 %v6560_v38  ;;  %v473_v38 = vrot.slane %v6880_v23, 1 }
  0xdf   : > { %1338 = vmatprep.mubr.f32.mxu1 %v7086_v27 }
  0xe0   : > { %929 = vmatmul.mubr.f32.gmra.mrb[52].mxu0 %v9493_v11  ;;  %v7253_v21 = vsel %vm394_vm1, %v471_v33, %v473_v38  ;;  %v4615_v33 = vld [vmem:[%s9214_s1 + $0x448] sm:$0xff]  ;;  %v9510_v38 = vld [vmem:[#allocation13_spill] sm:$0xff] }
  0xe1   : > { %933 = vmatprep.mubr.f32.mxu0 %v7236_v18  ;;  %9501 = vst [vmem:[#allocation45_spill] sm:$0xff] %v7253_v21 }
  0xe2   : > { %1339 = vmatmul.mubr.f32.gmra.mrb[68].mxu1 %v6591_v62  ;;  %v672_v62 = vrot.slane %v9502_v54, 1 }
  0xe3   : > { %1343 = vmatprep.mubr.f32.mxu1 %v7101_v32 }
  0xe4   : > { %934 = vmatmul.mubr.f32.gmra.mrb[54].mxu0 %v9494_v2  ;;  %v7262_v23 = vsel %vm394_vm1, %v671_v44, %v672_v62  ;;  %v9511_v44 = vld [vmem:[#allocation14_spill] sm:$0xff] }
  0xe5   : > { %938 = vmatprep.mubr.f32.mxu0 %v7245_v16  ;;  %9503 = vst [vmem:[#allocation49_spill] sm:$0xff] %v7262_v23 }
  0xe6   : > { %1344 = vmatmul.mubr.f32.gmra.mrb[70].mxu1 %v6594_v1  ;;  %v674_v1 = vrot.slane %v6919_v46, 1  ;;  %v9505_v46 = vld [vmem:[#allocation30_spill] sm:$0xff] }
  0xe7   : > { %1348 = vmatprep.mubr.f32.mxu1 %v7117_v5 }
  0xe8   : > { %939 = vmatmul.mubr.f32.gmra.mrb[56].mxu0 %v9498_v52  ;;  %v7270_v13 = vsel %vm394_vm1, %v672_v62, %v674_v1  ;;  %v4617_v62 = vld [vmem:[%s9214_s1 + $0x458] sm:$0xff]  ;;  %v9512_v1 = vld [vmem:[#allocation15_spill] sm:$0xff] }
  0xe9   : > { %943 = vmatprep.mubr.f32.mxu0 %v7253_v21  ;;  %9504 = vst [vmem:[#allocation50_spill] sm:$0xff] %v7270_v13 }
  0xea   : > { %1349 = vmatmul.mubr.f32.gmra.mrb[72].mxu1 %v6631_v41  ;;  %v4608_v41 = vld [vmem:[%s9214_s1 + $0x410] sm:$0xff] }
  0xeb   : > { %1353 = vmatprep.mubr.f32.mxu1 %v7132_v15 }
  0xec   : > { %944 = vmatmul.mubr.f32.gmra.mrb[58].mxu0 %v9499_v58 }
  0xed   : > { %948 = vmatprep.mubr.f32.mxu0 %v7262_v23 }
  0xee   : > { %1354 = vmatmul.mubr.f32.gmra.mrb[74].mxu1 %v6635_v47  ;;  %v4609_v47 = vld [vmem:[%s9214_s1 + $0x418] sm:$0xff] }
  0xef   : > { %1358 = vmatprep.mubr.f32.mxu1 %v7148_v42 }
  0xf0   : > { %949 = vmatmul.mubr.f32.gmra.mrb[60].mxu0 %v6884_v61  ;;  %v5612_v61 = vpack.c.bf16 %v4609_v47, %v4608_v41  ;;  %v9513_v41 = vld [vmem:[#allocation16_spill] sm:$0xff]  ;;  %v4618_v47 = vld [vmem:[%s9214_s1 + $0x460] sm:$0xff] }
  0xf1   : > { %953 = vmatprep.mubr.f32.mxu0 %v7270_v13 }
  0xf2   : > { %1359 = vmatmul.mubr.f32.gmra.mrb[76].mxu1 %v6669_v26  ;;  %v4610_v26 = vld [vmem:[%s9214_s1 + $0x420] sm:$0xff] }
  0xf3   : > { %1363 = vmatprep.mubr.f32.mxu1 %v7163_v55 }
  0xf4   : > { %954 = vmatmul.mubr.f32.gmra.mrb[62].mxu0 %v9502_v54  ;;  %v4616_v54 = vld [vmem:[%s9214_s1 + $0x450] sm:$0xff] }
  0xf5   : > { %5032 = vmatprep.mubr.f32.mxu0 %v9505_v46  ;;  %v4619_v46 = vld [vmem:[%s9214_s1 + $0x468] sm:$0xff] }
  0xf6   : > { %1364 = vmatmul.mubr.f32.gmra.mrb[78].mxu1 %v6681_v0  ;;  %v5616_v0 = vpack.c.bf16 %v4611_v39, %v4610_v26  ;;  %v9515_v26 = vld [vmem:[#allocation18_spill] sm:$0xff]  ;;  %v4620_v39 = vld [vmem:[%s9214_s1 + $0x470] sm:$0xff] }
  0xf7   : > { %1368 = vmatprep.mubr.f32.mxu1 %v7179_v50 }
  0xf8   : > { %5033 = vmatmul.mubr.f32.vlgmr.msra.gmra.mrb[64].mxu0 %v9506_v19  ;;  %v4621_v19 = vld [vmem:[%s9214_s1 + $0x478] sm:$0xff] }
  0xf9   : > { %5611 = vmatpush3.bf16.msra.mxu0 %v6958_v36  ;;  %5035 = vmatprep.mubr.f32.mxu0 %v9507_v14  ;;  %v5620_v36 = vpack.c.bf16 %v4613_v12, %v4612_v40  ;;  %v9516_v14 = vld [vmem:[#allocation19_spill] sm:$0xff]  ;;  %v9518_v40 = vld [vmem:[#allocation21_spill] sm:$0xff]  ;;  %v9519_v12 = vld [vmem:[#allocation22_spill] sm:$0xff] }
  0xfa   : > { %1369 = vmatmul.mubr.f32.gmra.mrb[80].mxu1 %v9483_v17  ;;  %5613 = vmatprep.subr.bf16.mxu0 %v5612_v61  ;;  %v4614_v17 = vld [vmem:[%s9214_s1 + $0x440] sm:$0xff] }
  0xfb   : > { %1373 = vmatprep.mubr.f32.mxu1 %v7194_v20 }
  0xfc   : > { %5036 = vmatmul.mubr.f32.gmra.mrb[66].mxu0 %v9508_v28  ;;  %v9520_v28 = vld [vmem:[#allocation23_spill] sm:$0xff] }
  0xfd   : > { %5038 = vmatprep.mubr.f32.mxu0 %v9509_v53  ;;  %5615 = vmatpush3.bf16.msra.mxu0 %v5612_v61  ;;  %v9514_v61 = vld [vmem:[#allocation17_spill] sm:$0xff] }
  0xfe   : > { %1374 = vmatmul.mubr.f32.gmra.mrb[82].mxu1 %v9484_v6  ;;  %5617 = vmatprep.subr.bf16.mxu0 %v5616_v0  ;;  %v5624_v6 = vpack.c.bf16 %v4615_v33, %v4614_v17  ;;  %v9523_v17 = vld [vmem:[#allocation26_spill] sm:$0xff]  ;;  %v9524_v33 = vld [vmem:[#allocation28_spill] sm:$0xff] }
  0xff   : > { %1378 = vmatprep.mubr.f32.mxu1 %v7210_v59 }
 0x100   : > { %5039 = vmatmul.mubr.f32.gmra.mrb[68].mxu0 %v9510_v38 }
 0x101   : > { %5041 = vmatprep.mubr.f32.mxu0 %v9511_v44  ;;  %5619 = vmatpush3.bf16.msra.mxu0 %v5616_v0  ;;  %v9517_v0 = vld [vmem:[#allocation20_spill] sm:$0xff] }
 0x102   : > { %1379 = vmatmul.mubr.f32.gmra.mrb[84].mxu1 %v9488_v34  ;;  %5621 = vmatprep.subr.bf16.mxu0 %v5620_v36  ;;  %v5628_v34 = vpack.c.bf16 %v4617_v62, %v4616_v54  ;;  %v5938_v54 = vld [vmem:[%s6275_s20 + $0x38] sm:$0xff]  ;;  %v9527_v62 = vld [vmem:[#allocation36_spill] sm:$0xff] }
 0x103   : > { %1383 = vmatprep.mubr.f32.mxu1 %v7219_v24 }
 0x104   : > { %5042 = vmatmul.mubr.f32.gmra.mrb[70].mxu0 %v9512_v1 }
 0x105   : > { %5044 = vmatprep.mubr.f32.mxu0 %v9513_v41  ;;  %5623 = vmatpush3.bf16.msra.mxu0 %v5620_v36  ;;  %v9521_v36 = vld [vmem:[#allocation24_spill] sm:$0xff] }
 0x106   : > { %1384 = vmatmul.mubr.f32.gmra.mrb[86].mxu1 %v9489_v35  ;;  %5625 = vmatprep.subr.bf16.mxu0 %v5624_v6  ;;  %v5632_v35 = vpack.c.bf16 %v4619_v46, %v4618_v47  ;;  %v9528_v47 = vld [vmem:[#allocation41_spill] sm:$0xff]  ;;  %v9529_v46 = vld [vmem:[#allocation42_spill] sm:$0xff] }
 0x107   : > { %1388 = vmatprep.mubr.f32.mxu1 %v7228_v7 }
 0x108   : > { %5045 = vmatmul.mubr.f32.gmra.mrb[72].mxu0 %v9514_v61 }
 0x109   : > { %5047 = vmatprep.mubr.f32.mxu0 %v9515_v26  ;;  %5627 = vmatpush3.bf16.msra.mxu0 %v5624_v6  ;;  %v9525_v6 = vld [vmem:[#allocation29_spill] sm:$0xff] }
 0x10a   : > { %1389 = vmatmul.mubr.f32.gmra.mrb[88].mxu1 %v9493_v11  ;;  %5629 = vmatprep.subr.bf16.mxu0 %v5628_v34  ;;  %v5636_v11 = vpack.c.bf16 %v4621_v19, %v4620_v39  ;;  %v9530_v39 = vld [vmem:[#allocation47_spill] sm:$0xff]  ;;  %v9531_v19 = vld [vmem:[#allocation48_spill] sm:$0xff] }
 0x10b   : > { %1393 = vmatprep.mubr.f32.mxu1 %v7236_v18 }
 0x10c   : > { %5048 = vmatmul.mubr.f32.gmra.mrb[74].mxu0 %v9516_v14 }
 0x10d   : > { %5050 = vmatprep.mubr.f32.mxu0 %v9517_v0  ;;  %5631 = vmatpush3.bf16.msra.mxu0 %v5628_v34  ;;  %v5939_v34 = vld [vmem:[%s6275_s20 + $0x48] sm:$0xff] }
 0x10e   : > { %1394 = vmatmul.mubr.f32.gmra.mrb[90].mxu1 %v9494_v2  ;;  %5633 = vmatprep.subr.bf16.mxu0 %v5632_v35  ;;  %v9522_v2 = vld [vmem:[#allocation25_spill] sm:$0xff] }
 0x10f   : > { %1398 = vmatprep.mubr.f32.mxu1 %v7245_v16 }
 0x110   : > { %5051 = vmatmul.mubr.f32.gmra.mrb[76].mxu0 %v9518_v40 }
 0x111   : > { %5053 = vmatprep.mubr.f32.mxu0 %v9519_v12  ;;  %5635 = vmatpush3.bf16.msra.mxu0 %v5632_v35  ;;  %v5940_v35 = vld [vmem:[%s6275_s20 + $0x50] sm:$0xff] }
 0x112   : > { %1399 = vmatmul.mubr.f32.gmra.mrb[92].mxu1 %v9498_v52  ;;  %5637 = vmatprep.subr.bf16.mxu0 %v5636_v11  ;;  %v5937_v52 = vld [vmem:[%s6275_s20 + $0x30] sm:$0xff] }
 0x113   : > { %1403 = vmatprep.mubr.f32.mxu1 %v7253_v21 }
 0x114   : > { %5054 = vmatmul.mubr.f32.gmra.mrb[78].mxu0 %v9520_v28 }
 0x115   : > { %5056 = vmatprep.mubr.f32.mxu0 %v9521_v36  ;;  %5639 = vmatpush3.bf16.msra.mxu0 %v5636_v11  ;;  %v5941_v11 = vld [vmem:[%s6275_s20 + $0x60] sm:$0xff] }
 0x116   : > { %1404 = vmatmul.mubr.f32.gmra.mrb[94].mxu1 %v9499_v58  ;;  %5640 = vmatprep.subr.bf16.mxu0 %v9437_v9  ;;  %v9526_v58 = vld [vmem:[#allocation35_spill] sm:$0xff] }
 0x117   : > { %1764 = vmatprep.mubr.f32.mxu1 %v6733_v25 }
 0x118   : > { %5057 = vmatmul.mubr.f32.gmra.mrb[80].mxu0 %v9522_v2 }
 0x119   : > { %5059 = vmatprep.mubr.f32.mxu0 %v9523_v17 }
 0x11a   : > { %1765 = vmatmul.mubr.f32.vlgmr.msra.gmra.mrb[96].mxu1 %v5937_v52  ;;  %v9532_v52 = vld [vmem:[#allocation53_spill] sm:$0xff] }
 0x11b   : > { %1769 = vmatprep.mubr.f32.mxu1 %v6772_v30 }
 0x11c   : > { %5060 = vmatmul.mubr.f32.gmra.mrb[82].mxu0 %v9524_v33 }
 0x11d   : > { %5062 = vmatprep.mubr.f32.mxu0 %v9525_v6 }
 0x11e   : > { %1770 = vmatmul.mubr.f32.gmra.mrb[98].mxu1 %v5938_v54  ;;  %v9533_v54 = vld [vmem:[#allocation54_spill] sm:$0xff] }
 0x11f   : > { %1774 = vmatprep.mubr.f32.mxu1 %v6812_v45  ;;  %v5942_v45 = vld [vmem:[%s6275_s20 + $0x68] sm:$0xff] }
 0x120   : > { %5063 = vmatmul.mubr.f32.gmra.mrb[84].mxu0 %v9526_v58 }
 0x121   : > { %5065 = vmatprep.mubr.f32.mxu0 %v9527_v62 }
 0x122   : > { %1775 = vmatmul.mubr.f32.gmra.mrb[100].mxu1 %v5939_v34 }
 0x123   : > { %1779 = vmatprep.mubr.f32.mxu1 %v6851_v49  ;;  %v9535_v49 = vld [vmem:[#allocation58_spill] sm:$0xff] }
 0x124   : > { %5066 = vmatmul.mubr.f32.gmra.mrb[86].mxu0 %v9528_v47 }
 0x125   : > { %5068 = vmatprep.mubr.f32.mxu0 %v9529_v46 }
 0x126   : > { %1780 = vmatmul.mubr.f32.gmra.mrb[102].mxu1 %v5940_v35 }
 0x127   : > { %1784 = vmatprep.mubr.f32.mxu1 %v6891_v63  ;;  %v9534_v63 = vld [vmem:[#allocation57_spill] sm:$0xff] }
 0x128   : > { %5069 = vmatmul.mubr.f32.gmra.mrb[88].mxu0 %v9530_v39 }
 0x129   : > { %5071 = vmatprep.mubr.f32.mxu0 %v9531_v19 }
 0x12a   : > { %1785 = vmatmul.mubr.f32.gmra.mrb[104].mxu1 %v5941_v11 }
 0x12b   : > { %1789 = vmatprep.mubr.f32.mxu1 %v6924_v4  ;;  %v5943_v4 = vld [vmem:[%s6275_s20 + $0x78] sm:$0xff] }
 0x12c   : > { %5072 = vmatmul.mubr.f32.gmra.mrb[90].mxu0 %v9532_v52 }
 0x12d   : > { %5074 = vmatprep.mubr.f32.mxu0 %v9533_v54  ;;  %v7379_v34 = vpop.f32.mrb[0].mxu1 }
 0x12e   : > { %1790 = vmatmul.mubr.f32.gmra.mrb[106].mxu1 %v5942_v45  ;;  %v1025_v35 = vpop.f32.mrb[1].mxu1 }
 0x12f   : > { %1794 = vmatprep.mubr.f32.mxu1 %v6955_v56  ;;  %v5944_v56 = vld [vmem:[%s6275_s20 + $0x80] sm:$0xff] }
 0x130   : > { %5075 = vmatmul.mubr.f32.gmra.mrb[92].mxu0 %v9534_v63 }
 0x131   : > { %5077 = vmatprep.mubr.f32.mxu0 %v9535_v49  ;;  %v7385_v11 = vpop.f32.mrb[2].mxu1 }
 0x132   : > { %1795 = vmatmul.mubr.f32.gmra.mrb[108].mxu1 %v5943_v4  ;;  %v7388_v25 = vpop.f32.mrb[3].mxu1 }
 0x133   : > { %1799 = vmatprep.mubr.f32.mxu1 %v6977_v10  ;;  %v5945_v10 = vld [vmem:[%s6275_s20 + $0x90] sm:$0xff] }
 0x134   : > { %5078 = vmatmul.mubr.f32.gmra.mrb[94].mxu0 %v6930_v60 }
 0x135   : > { %5112 = vmatprep.mubr.f32.mxu0 %v9509_v53  ;;  %v7393_v45 = vpop.f32.mrb[4].mxu1  ;;  %v5946_v53 = vld [vmem:[%s6275_s20 + $0x98] sm:$0xff] }
 0x136   : > { %1800 = vmatmul.mubr.f32.gmra.mrb[110].mxu1 %v5944_v56  ;;  %v7396_v30 = vpop.f32.mrb[5].mxu1 }
 0x137   : > { %1804 = vmatprep.mubr.f32.mxu1 %v6994_v22 }
 0x138   : > { %5113 = vmatmul.mubr.f32.vlgmr.msra.gmra.mrb[96].mxu0 %v9510_v38 }
 0x139   : > { %5115 = vmatprep.mubr.f32.mxu0 %v9511_v44  ;;  %v7401_v4 = vpop.f32.mrb[6].mxu1  ;;  %v5947_v44 = vld [vmem:[%s6275_s20 + $0xa8] sm:$0xff] }
 0x13a   : > { %1805 = vmatmul.mubr.f32.gmra.mrb[112].mxu1 %v5945_v10  ;;  %v7404_v37 = vpop.f32.mrb[7].mxu1 }
 0x13b   : > { %1809 = vmatprep.mubr.f32.mxu1 %v7008_v8 }
 0x13c   : > { %5116 = vmatmul.mubr.f32.gmra.mrb[98].mxu0 %v9512_v1 }
 0x13d   : > { %5118 = vmatprep.mubr.f32.mxu0 %v9513_v41  ;;  %v7409_v56 = vpop.f32.mrb[8].mxu1 }
 0x13e   : > { %1810 = vmatmul.mubr.f32.gmra.mrb[114].mxu1 %v5946_v53  ;;  %v7412_v38 = vpop.f32.mrb[9].mxu1  ;;  %v5948_v53 = vld [vmem:[%s6275_s20 + $0xb0] sm:$0xff] }
 0x13f   : > { %1814 = vmatprep.mubr.f32.mxu1 %v7024_v51 }
 0x140   : > { %5119 = vmatmul.mubr.f32.gmra.mrb[100].mxu0 %v9514_v61 }
 0x141   : > { %5121 = vmatprep.mubr.f32.mxu0 %v9515_v26  ;;  %v7417_v10 = vpop.f32.mrb[10].mxu1 }
 0x142   : > { %1815 = vmatmul.mubr.f32.gmra.mrb[116].mxu1 %v5947_v44  ;;  %v7420_v1 = vpop.f32.mrb[11].mxu1  ;;  %v5949_v44 = vld [vmem:[%s6275_s20 + $0xc0] sm:$0xff] }
 0x143   : > { %1819 = vmatprep.mubr.f32.mxu1 %v7039_v31 }
 0x144   : > { %5122 = vmatmul.mubr.f32.gmra.mrb[102].mxu0 %v9516_v14 }
 0x145   : > { %5124 = vmatprep.mubr.f32.mxu0 %v9517_v0  ;;  %v7425_v41 = vpop.f32.mrb[12].mxu1 }
 0x146   : > { %1820 = vmatmul.mubr.f32.gmra.mrb[118].mxu1 %v5948_v53  ;;  %v7428_v61 = vpop.f32.mrb[13].mxu1 }
 0x147   : > { %1824 = vmatprep.mubr.f32.mxu1 %v7055_v3 }
 0x148   : > { %5125 = vmatmul.mubr.f32.gmra.mrb[104].mxu0 %v9518_v40 }
 0x149   : > { %5127 = vmatprep.mubr.f32.mxu0 %v9519_v12  ;;  %v7433_v26 = vpop.f32.mrb[14].mxu1  ;;  %v5950_v12 = vld [vmem:[%s6275_s20 + $0xc8] sm:$0xff] }
 0x14a   : > { %1825 = vmatmul.mubr.f32.gmra.mrb[120].mxu1 %v5949_v44  ;;  %v7436_v14 = vpop.f32.mrb[15].mxu1 }
 0x14b   : > { %v800_v0 = vpop.f32.mrb[0].mxu0  ;;  %1829 = vmatprep.mubr.f32.mxu1 %v7070_v57 }
 0x14c   : > { %v802_v53 = vpop.f32.mrb[1].mxu0  ;;  %5128 = vmatmul.mubr.f32.gmra.mrb[106].mxu0 %v9520_v28  ;;  %v7440_v51 = vadd.f32 %v1025_v35, %v800_v0 }
 0x14d   : > { %5130 = vmatprep.mubr.f32.mxu0 %v9521_v36  ;;  %v7443_v40 = vpop.f32.mrb[16].mxu1  ;;  %v5951_v36 = vld [vmem:[%s6275_s20 + $0xd8] sm:$0xff] }
 0x14e   : > { %1830 = vmatmul.mubr.f32.gmra.mrb[122].mxu1 %v5950_v12  ;;  %v7446_v3 = vpop.f32.mrb[17].mxu1 }
 0x14f   : > { %v805_v44 = vpop.f32.mrb[2].mxu0  ;;  %1834 = vmatprep.mubr.f32.mxu1 %v7086_v27  ;;  %v5958_v27 = vld [vmem:[%s6275_s20 + $0x128] sm:$0xff] }
 0x150   : > { %v807_v31 = vpop.f32.mrb[3].mxu0  ;;  %5131 = vmatmul.mubr.f32.gmra.mrb[108].mxu0 %v9522_v2  ;;  %v7451_v53 = vadd.f32 %v7379_v34, %v805_v44 }
 0x151   : > { %5133 = vmatprep.mubr.f32.mxu0 %v9523_v17  ;;  %v7454_v28 = vpop.f32.mrb[18].mxu1  ;;  %v5952_v17 = vld [vmem:[%s6275_s20 + $0xe0] sm:$0xff] }
 0x152   : > { %1835 = vmatmul.mubr.f32.gmra.mrb[124].mxu1 %v5951_v36  ;;  %v7457_v35 = vpop.f32.mrb[19].mxu1 }
 0x153   : > { %v810_v0 = vpop.f32.mrb[4].mxu0  ;;  %1839 = vmatprep.mubr.f32.mxu1 %v7101_v32 }
 0x154   : > { %v812_v12 = vpop.f32.mrb[5].mxu0  ;;  %5134 = vmatmul.mubr.f32.gmra.mrb[110].mxu0 %v9524_v33  ;;  %v7462_v31 = vadd.f32 %v7388_v25, %v810_v0 }
 0x155   : > { %5136 = vmatprep.mubr.f32.mxu0 %v9525_v6  ;;  %v7465_v2 = vpop.f32.mrb[20].mxu1  ;;  %v5953_v6 = vld [vmem:[%s6275_s20 + $0xf0] sm:$0xff] }
 0x156   : > { %1840 = vmatmul.mubr.f32.gmra.mrb[126].mxu1 %v5952_v17  ;;  %v7468_v34 = vpop.f32.mrb[21].mxu1 }
 0x157   : > { %v815_v44 = vpop.f32.mrb[6].mxu0  ;;  %1844 = vmatprep.mubr.f32.mxu1 %v7117_v5  ;;  %v5956_v5 = vld [vmem:[%s6275_s20 + $0x110] sm:$0xff] }
 0x158   : > { %v817_v36 = vpop.f32.mrb[7].mxu0  ;;  %5137 = vmatmul.mubr.f32.gmra.mrb[112].mxu0 %v9526_v58  ;;  %v7473_v33 = vadd.f32 %v7385_v11, %v815_v44 }
 0x159   : > { %5139 = vmatprep.mubr.f32.mxu0 %v9527_v62  ;;  %v7476_v25 = vpop.f32.mrb[22].mxu1  ;;  %v5954_v62 = vld [vmem:[%s6275_s20 + $0xf8] sm:$0xff] }
 0x15a   : > { %1845 = vmatmul.mubr.f32.gmra.mrb[128].mxu1 %v5953_v6  ;;  %v7479_v0 = vpop.f32.mrb[23].mxu1 }
 0x15b   : > { %v820_v12 = vpop.f32.mrb[8].mxu0  ;;  %1849 = vmatprep.mubr.f32.mxu1 %v7132_v15  ;;  %v2760_v15 = vld [vmem:[#allocation3 + $0x180] sm:$0xff] }
 0x15c   : > { %v822_v17 = vpop.f32.mrb[9].mxu0  ;;  %5140 = vmatmul.mubr.f32.gmra.mrb[114].mxu0 %v9528_v47  ;;  %v7484_v58 = vadd.f32 %v7396_v30, %v820_v12  ;;  %v5955_v30 = vld [vmem:[%s6275_s20 + $0x108] sm:$0xff]  ;;  %v2792_v12 = vld [vmem:[#allocation3 + $0x280] sm:$0xff] }
 0x15d   : > { %v7486_v11 = vpop.f32.mrb[24].mxu1  ;;  %5142 = vmatprep.mubr.f32.mxu0 %v9529_v46 }
 0x15e   : > { %1850 = vmatmul.mubr.f32.gmra.mrb[130].mxu1 %v5954_v62  ;;  %v7490_v44 = vpop.f32.mrb[25].mxu1  ;;  %v2793_v62 = vld [vmem:[#allocation3 + $0x288] sm:$0xff] }
 0x15f   : > { %v825_v36 = vpop.f32.mrb[10].mxu0  ;;  %1854 = vmatprep.mubr.f32.mxu1 %v7148_v42 }
 0x160   : > { %v827_v6 = vpop.f32.mrb[11].mxu0  ;;  %5143 = vmatmul.mubr.f32.gmra.mrb[116].mxu0 %v9530_v39  ;;  %v7495_v17 = vadd.f32 %v7393_v45, %v825_v36  ;;  %v5688_v39 = vpack.c.bf16 %v2793_v62, %v2792_v12  ;;  %v2762_v12 = vld [vmem:[#allocation3 + $0x190] sm:$0xff]  ;;  %v2763_v62 = vld [vmem:[#allocation3 + $0x198] sm:$0xff] }
 0x161   : > { %v7497_v47 = vpop.f32.mrb[26].mxu1  ;;  %5145 = vmatprep.mubr.f32.mxu0 %v9531_v19  ;;  %v2761_v6 = vld [vmem:[#allocation3 + $0x188] sm:$0xff] }
 0x162   : > { %1855 = vmatmul.mubr.f32.gmra.mrb[132].mxu1 %v5955_v30  ;;  %v7501_v46 = vpop.f32.mrb[27].mxu1  ;;  %v5641_v36 = vpack.c.bf16 %v2761_v6, %v2760_v15  ;;  %5689 = vmatprep.subr.bf16.mxu1 %v5688_v39  ;;  %v5644_v15 = vpack.c.bf16 %v2763_v62, %v2762_v12  ;;  %v7535_v12 = vld [vmem:[%s6275_s20 + $0x1a8] sm:$0x3] }
 0x163   : > { %v830_v42 = vpop.f32.mrb[12].mxu0  ;;  %1859 = vmatprep.mubr.f32.mxu1 %v7163_v55  ;;  %v7515_v55 = vld [vmem:[%s6275_s20 + $0x198] sm:$0xff]  ;;  %5691 = vmatpush3.bf16.msra.mxu1 %v5688_v39 }
 0x164   : > { %v832_v45 = vpop.f32.mrb[13].mxu0  ;;  %5146 = vmatmul.mubr.f32.gmra.mrb[118].mxu0 %v9532_v52  ;;  %v7506_v19 = vadd.f32 %v7404_v37, %v830_v42  ;;  %v7519_v37 = vld [vmem:[%s6275_s20 + $0x1a0] sm:$0xff]  ;;  %v1644_v6 = vrot.slane %v7515_v55, 2 }
 0x165   : > { %v7508_v30 = vpop.f32.mrb[28].mxu1  ;;  %5148 = vmatprep.mubr.f32.mxu0 %v9533_v54  ;;  %5642 = vmatpush1.bf16.msra.mxu0 %v5641_v36  ;;  %v5957_v45 = vld [vmem:[%s6275_s20 + $0x120] sm:$0xff]  ;;  %v1645_v39 = vrot.slane %v7519_v37, 2 }
 0x166   : > { %1860 = vmatmul.mubr.f32.gmra.mrb[134].mxu1 %v5956_v5  ;;  %v7512_v32 = vpop.f32.mrb[29].mxu1  ;;  %5643 = vmatprep.subr.bf16.mxu0 %v9437_v9 }
 0x167   : > { %v835_v52 = vpop.f32.mrb[14].mxu0  ;;  %1864 = vmatprep.mubr.f32.mxu1 %v7179_v50  ;;  %v1647_v50 = vrot.slane %v7535_v12, 2  ;;  %v1646_v57 = vsel %vm507_vm0, %v1644_v6, %v1645_v39  ;;  %v2794_v6 = vld [vmem:[#allocation3 + $0x290] sm:$0xff] }
 0x168   : > { %v837_v42 = vpop.f32.mrb[15].mxu0  ;;  %5149 = vmatmul.mubr.f32.gmra.mrb[120].mxu0 %v9534_v63  ;;  %v7523_v5 = vadd.f32 %v7401_v4, %v835_v52  ;;  %v2764_v63 = vld [vmem:[#allocation3 + $0x1a0] sm:$0xff]  ;;  %v2765_v4 = vld [vmem:[#allocation3 + $0x1a8] sm:$0xff] }
 0x169   : > { %v7526_v54 = vpop.f32.mrb[30].mxu1  ;;  %5151 = vmatprep.mubr.f32.mxu0 %v9535_v49  ;;  %5645 = vmatpush1.bf16.msra.mxu0 %v5644_v15  ;;  %v5647_v49 = vpack.c.bf16 %v2765_v4, %v2764_v63  ;;  %v2766_v63 = vld [vmem:[#allocation3 + $0x1b0] sm:$0xff] }
 0x16a   : > { %1865 = vmatmul.mubr.f32.gmra.mrb[136].mxu1 %v5957_v45  ;;  %v7531_v36 = vpop.f32.mrb[31].mxu1  ;;  %5646 = vmatprep.subr.bf16.mxu0 %v9437_v9 }
 0x16b   : > { %v840_v62 = vpop.f32.mrb[16].mxu0  ;;  %1869 = vmatprep.mubr.f32.mxu1 %v7194_v20 }
 0x16c   : > { %v842_v52 = vpop.f32.mrb[17].mxu0  ;;  %5152 = vmatmul.mubr.f32.gmra.mrb[122].mxu0 %v6930_v60  ;;  %v7541_v42 = vadd.f32 %v7412_v38, %v840_v62  ;;  %v2767_v60 = vld [vmem:[#allocation3 + $0x1b8] sm:$0xff] }
 0x16d   : > { %v1250_v45 = vpop.f32.mrb[32].mxu1  ;;  %5154 = vmatprep.mubr.f32.mxu0 %v6942_v29  ;;  %5648 = vmatpush1.bf16.msra.mxu0 %v5647_v49  ;;  %v5650_v29 = vpack.c.bf16 %v2767_v60, %v2766_v63  ;;  %v2795_v62 = vld [vmem:[#allocation3 + $0x298] sm:$0xff]  ;;  %v5959_v52 = vld [vmem:[%s6275_s20 + $0x138] sm:$0xff]  ;;  %v2768_v60 = vld [vmem:[#allocation3 + $0x1c0] sm:$0xff] }
 0x16e   : > { %v7546_v15 = vadd.f32 %v1250_v45, %v7440_v51  ;;  %1870 = vmatmul.mubr.f32.gmra.mrb[138].mxu1 %v5958_v27  ;;  %v1252_v20 = vpop.f32.mrb[33].mxu1  ;;  %5649 = vmatprep.subr.bf16.mxu0 %v9437_v9  ;;  %v5692_v63 = vpack.c.bf16 %v2795_v62, %v2794_v6  ;;  %v2771_v6 = vld [vmem:[#allocation3 + $0x1d8] sm:$0xff] }
 0x16f   : > { %v845_v4 = vpop.f32.mrb[18].mxu0  ;;  %1874 = vmatprep.mubr.f32.mxu1 %v7210_v59  ;;  %v1648_v20 = vsel %vm507_vm0, %v1645_v39, %v1647_v50 }
 0x170   : > { %v847_v38 = vpop.f32.mrb[19].mxu0  ;;  %5155 = vmatmul.mubr.f32.gmra.mrb[124].mxu0 %v6962_v43  ;;  %v7554_v51 = vadd.f32 %v7409_v56, %v845_v4  ;;  %v2769_v43 = vld [vmem:[#allocation3 + $0x1c8] sm:$0xff]  ;;  %5693 = vmatprep.subr.bf16.mxu1 %v5692_v63  ;;  %v5960_v4 = vld [vmem:[%s6275_s20 + $0x140] sm:$0xff] }
 0x171   : > { %v1255_v27 = vpop.f32.mrb[34].mxu1  ;;  %5157 = vmatprep.mubr.f32.mxu0 %v1646_v57  ;;  %5651 = vmatpush1.bf16.msra.mxu0 %v5650_v29  ;;  %v5653_v57 = vpack.c.bf16 %v2769_v43, %v2768_v60  ;;  %v2772_v43 = vld [vmem:[#allocation3 + $0x1e0] sm:$0xff] }
 0x172   : > { %v7558_v49 = vadd.f32 %v1255_v27, %v7451_v53  ;;  %1875 = vmatmul.mubr.f32.gmra.mrb[140].mxu1 %v5959_v52  ;;  %v1257_v45 = vpop.f32.mrb[35].mxu1  ;;  %5652 = vmatprep.subr.bf16.mxu0 %v9437_v9  ;;  %v2770_v27 = vld [vmem:[#allocation3 + $0x1d0] sm:$0xff] }
 0x173   : > { %v850_v38 = vpop.f32.mrb[20].mxu0  ;;  %1879 = vmatprep.mubr.f32.mxu1 %v7219_v24  ;;  %5695 = vmatpush3.bf16.msra.mxu1 %v5692_v63  ;;  %v5961_v63 = vld [vmem:[%s6275_s20 + $0x150] sm:$0xff] }
 0x174   : > { %v852_v50 = vpop.f32.mrb[21].mxu0  ;;  %5158 = vmatmul.mubr.f32.gmra.mrb[126].mxu0 %v1648_v20  ;;  %v7564_v56 = vadd.f32 %v7420_v1, %v850_v38  ;;  %v5656_v1 = vpack.c.bf16 %v2771_v6, %v2770_v27  ;;  %v2773_v38 = vld [vmem:[#allocation3 + $0x1e8] sm:$0xff]  ;;  %v2774_v6 = vld [vmem:[#allocation3 + $0x1f0] sm:$0xff] }
 0x175   : > { %v1260_v53 = vpop.f32.mrb[36].mxu1  ;;  %5654 = vmatpush1.bf16.msra.mxu0 %v5653_v57  ;;  %v5659_v50 = vpack.c.bf16 %v2773_v38, %v2772_v43  ;;  %v5963_v38 = vld [vmem:[%s6275_s20 + $0x168] sm:$0xff] }
 0x176   : > { %v7567_v39 = vadd.f32 %v1260_v53, %v7462_v31  ;;  %1880 = vmatmul.mubr.f32.gmra.mrb[142].mxu1 %v5960_v4  ;;  %v1262_v29 = vpop.f32.mrb[37].mxu1  ;;  %5655 = vmatprep.subr.bf16.mxu0 %v9437_v9 }
 0x177   : > { %v855_v62 = vpop.f32.mrb[22].mxu0  ;;  %1884 = vmatprep.mubr.f32.mxu1 %v7228_v7  ;;  %v5962_v29 = vld [vmem:[%s6275_s20 + $0x158] sm:$0xff] }
 0x178   : > { %v857_v20 = vpop.f32.mrb[23].mxu0  ;;  %v7573_v52 = vadd.f32 %v7417_v10, %v855_v62  ;;  %v2775_v62 = vld [vmem:[#allocation3 + $0x1f8] sm:$0xff] }
 0x179   : > { %v1265_v45 = vpop.f32.mrb[38].mxu1  ;;  %5657 = vmatpush1.bf16.msra.mxu0 %v5656_v1  ;;  %v5662_v20 = vpack.c.bf16 %v2775_v62, %v2774_v6 }
 0x17a   : > { %v7576_v31 = vadd.f32 %v1265_v45, %v7473_v33  ;;  %1885 = vmatmul.mubr.f32.gmra.mrb[144].mxu1 %v5961_v63  ;;  %v1267_v60 = vpop.f32.mrb[39].mxu1  ;;  %5658 = vmatprep.subr.bf16.mxu0 %v9437_v9 }
 0x17b   : > { %v860_v57 = vpop.f32.mrb[24].mxu0  ;;  %1889 = vmatprep.mubr.f32.mxu1 %v7236_v18  ;;  %v2797_v60 = vld [vmem:[#allocation3 + $0x2a8] sm:$0xff]  ;;  %v2728_v18 = vld [vmem:[#allocation3 + $0x110] sm:$0xff] }
 0x17c   : > { %v862_v53 = vpop.f32.mrb[25].mxu0  ;;  %v7582_v10 = vadd.f32 %v7428_v61, %v860_v57 }
 0x17d   : > { %v1270_v4 = vpop.f32.mrb[40].mxu1  ;;  %5660 = vmatpush1.bf16.msra.mxu0 %v5659_v50  ;;  %v2776_v53 = vld [vmem:[#allocation3 + $0x200] sm:$0xff] }
 0x17e   : > { %v7585_v33 = vadd.f32 %v1270_v4, %v7484_v58  ;;  %1890 = vmatmul.mubr.f32.gmra.mrb[146].mxu1 %v5962_v29  ;;  %v1272_v27 = vpop.f32.mrb[41].mxu1  ;;  %5661 = vmatprep.subr.bf16.mxu0 %v9437_v9  ;;  %v2796_v58 = vld [vmem:[#allocation3 + $0x2a0] sm:$0xff]  ;;  %v2777_v4 = vld [vmem:[#allocation3 + $0x208] sm:$0xff] }
 0x17f   : > { %v865_v1 = vpop.f32.mrb[26].mxu0  ;;  %1894 = vmatprep.mubr.f32.mxu1 %v7245_v16  ;;  %v5696_v50 = vpack.c.bf16 %v2797_v60, %v2796_v58 }
 0x180   : > { %v867_v45 = vpop.f32.mrb[27].mxu0  ;;  %v7591_v61 = vadd.f32 %v7425_v41, %v865_v1  ;;  %v5665_v41 = vpack.c.bf16 %v2777_v4, %v2776_v53  ;;  %v5964_v1 = vld [vmem:[%s6275_s20 + $0x170] sm:$0xff]  ;;  %v5965_v4 = vld [vmem:[%s6275_s20 + $0x180] sm:$0xff] }
 0x181   : > { %v1275_v63 = vpop.f32.mrb[42].mxu1  ;;  %5663 = vmatpush1.bf16.msra.mxu0 %v5662_v20  ;;  %5697 = vmatprep.subr.bf16.mxu1 %v5696_v50  ;;  %v2778_v45 = vld [vmem:[#allocation3 + $0x210] sm:$0xff] }
 0x182   : > { %v7594_v43 = vadd.f32 %v1275_v63, %v7495_v17  ;;  %1895 = vmatmul.mubr.f32.gmra.mrb[148].mxu1 %v5963_v38  ;;  %v1277_v57 = vpop.f32.mrb[43].mxu1  ;;  %5664 = vmatprep.subr.bf16.mxu0 %v9437_v9  ;;  %v2779_v63 = vld [vmem:[#allocation3 + $0x218] sm:$0xff]  ;;  %v1637_v38 = vrot.slane %v7515_v55, 1 }
 0x183   : > { %v870_v29 = vpop.f32.mrb[28].mxu0  ;;  %1899 = vmatprep.mubr.f32.mxu1 %v7253_v21  ;;  %5699 = vmatpush3.bf16.msra.mxu1 %v5696_v50  ;;  %v1638_v57 = vrot.slane %v7519_v37, 1 }
 0x184   : > { %v872_v27 = vpop.f32.mrb[29].mxu0  ;;  %v7600_v6 = vadd.f32 %v7436_v14, %v870_v29  ;;  %v5668_v14 = vpack.c.bf16 %v2779_v63, %v2778_v45  ;;  %v1640_v45 = vrot.slane %v7535_v12, 1 }
 0x185   : > { %v1280_v17 = vpop.f32.mrb[44].mxu1  ;;  %5666 = vmatpush1.bf16.msra.mxu0 %v5665_v41  ;;  %v2780_v41 = vld [vmem:[#allocation3 + $0x220] sm:$0xff]  ;;  %v2781_v27 = vld [vmem:[#allocation3 + $0x228] sm:$0xff] }
 0x186   : > { %v7603_v62 = vadd.f32 %v1280_v17, %v7506_v19  ;;  %1900 = vmatmul.mubr.f32.gmra.mrb[150].mxu1 %v5964_v1  ;;  %v1282_v20 = vpop.f32.mrb[45].mxu1  ;;  %5667 = vmatprep.subr.bf16.mxu0 %v9437_v9  ;;  %v5671_v1 = vpack.c.bf16 %v2781_v27, %v2780_v41  ;;  %v2782_v41 = vld [vmem:[#allocation3 + $0x230] sm:$0xff]  ;;  %v2783_v27 = vld [vmem:[#allocation3 + $0x238] sm:$0xff] }
 0x187   : > { %v875_v58 = vpop.f32.mrb[30].mxu0  ;;  %1904 = vmatprep.mubr.f32.mxu1 %v7262_v23 }
 0x188   : > { %v877_v60 = vpop.f32.mrb[31].mxu0  ;;  %v7611_v19 = vadd.f32 %v7433_v26, %v875_v58  ;;  %v2798_v58 = vld [vmem:[#allocation3 + $0x2b0] sm:$0xff] }
 0x189   : > { %v1285_v50 = vpop.f32.mrb[46].mxu1  ;;  %5669 = vmatpush1.bf16.msra.mxu0 %v5668_v14  ;;  %v2799_v60 = vld [vmem:[#allocation3 + $0x2b8] sm:$0xff] }
 0x18a   : > { %v7614_v53 = vadd.f32 %v1285_v50, %v7523_v5  ;;  %1905 = vmatmul.mubr.f32.gmra.mrb[152].mxu1 %v5965_v4  ;;  %v1287_v29 = vpop.f32.mrb[47].mxu1  ;;  %5670 = vmatprep.subr.bf16.mxu0 %v9437_v9  ;;  %v1639_v5 = vsel %vm394_vm1, %v1637_v38, %v1638_v57  ;;  %v5966_v50 = vld [vmem:[%s6275_s20 + $0x188] sm:$0xff]  ;;  %v5674_v38 = vpack.c.bf16 %v2783_v27, %v2782_v41  ;;  %s9003_s20 = scalar_lea.vmem [#allocation6], %s4524_s15 }
 0x18b   : > { %v880_v17 = vpop.f32.mrb[32].mxu0  ;;  %1909 = vmatprep.mubr.f32.mxu1 %v7270_v13  ;;  %v5700_v29 = vpack.c.bf16 %v2799_v60, %v2798_v58  ;;  %v2784_v60 = vld [vmem:[#allocation3 + $0x240] sm:$0xff]  ;;  %v2803_v27 = vld [vmem:[#allocation3 + $0x2d8] sm:$0xff]  ;;  %s4444_s22 = sshll.u32 %s9003_s20, 4  ;;  %s9167_s22 = int_to_ptr.vmem [resolvable:$true] %s4444_s22 }
 0x18c   : > { %v7620_v26 = vadd.f32 %v7446_v3, %v880_v17  ;;  %v882_v20 = vpop.f32.mrb[33].mxu0  ;;  %s6024_s28 = scalar_lea.vmem %s9167_s22, 4096  ;;  %p6031_p2 = scmp.lt.s32.totalorder %s9167_s22, %s6029_s17 }
 0x18d   : > { %v1290_v63 = vpop.f32.mrb[48].mxu1  ;;  %5672 = vmatpush1.bf16.msra.mxu0 %v5671_v1  ;;  %v1641_v20 = vsel %vm394_vm1, %v1638_v57, %v1640_v45  ;;  %5701 = vmatprep.subr.bf16.mxu1 %v5700_v29  ;;  %p6025_p6 = scmp.ne.s32.totalorder %s9167_s22, %s6024_s28  ;;  %p6032_p3 = scmp.lt.s32.totalorder %s6030_s18, %s6024_s28 }
 0x18e   : > { %v7625_v14 = vadd.f32 %v1290_v63, %v7541_v42  ;;  %1910 = vmatmul.mubr.f32.gmra.mrb[154].mxu1 %v5966_v50  ;;  %v1292_v4 = vpop.f32.mrb[49].mxu1  ;;  %5673 = vmatprep.subr.bf16.mxu0 %v9437_v9  ;;  %v2800_v63 = vld [vmem:[#allocation3 + $0x2c0] sm:$0xff]  ;;  %v2801_v50 = vld [vmem:[#allocation3 + $0x2c8] sm:$0xff] }
 0x18f   : > { %v885_v3 = vpop.f32.mrb[34].mxu0  ;;  %1914 = vmatprep.mubr.f32.mxu1 %v1639_v5  ;;  %5703 = vmatpush3.bf16.msra.mxu1 %v5700_v29  ;;  %v5704_v58 = vpack.c.bf16 %v2801_v50, %v2800_v63  ;;  %v2785_v4 = vld [vmem:[#allocation3 + $0x248] sm:$0xff]  ;;  %v6096_v63 = vmov 0.0   ;;  %p6026_p10 = pnand %p6025_p6, %p9684_p9  ;;  %p6033_p4 = por %p6032_p3, %p6031_p2 }
 0x190   : > { %v7630_v12 = vadd.f32 %v7443_v40, %v885_v3  ;;  %v887_v17 = vpop.f32.mrb[35].mxu0  ;;  %v5677_v57 = vpack.c.bf16 %v2785_v4, %v2784_v60  ;;  %2300 = vst [vmem:[#allocation2 + $0x18] sm:$0x1] %v6096_v63  ;;  %2292 = vst [vmem:[#allocation2] sm:$0xff] %v6096_v63 }
 0x191   : > { %v1295_v42 = vpop.f32.mrb[50].mxu1  ;;  %5675 = vmatpush1.bf16.msra.mxu0 %v5674_v38  ;;  %5705 = vmatprep.subr.bf16.mxu1 %v5704_v58  ;;  %v2786_v17 = vld [vmem:[#allocation3 + $0x250] sm:$0xff]  ;;  %2293 = vst [vmem:[#allocation2 + $0x8] sm:$0xff] %v6096_v63  ;;  %2294 = vst [vmem:[#allocation2 + $0x10] sm:$0x3] %v6096_v63  ;;  %p6027_p12 = pneg %p6026_p10 }
 0x192   : > { %v7634_v1 = vadd.f32 %v1295_v42, %v7554_v51  ;;  %1915 = vmatmul.mubr.f32.gmra.mrb[156].mxu1 %v7515_v55  ;;  %v1297_v5 = vpop.f32.mrb[51].mxu1  ;;  %5676 = vmatprep.subr.bf16.mxu0 %v9437_v9  ;;  %v2802_v51 = vld [vmem:[#allocation3 + $0x2d0] sm:$0xff]  ;;  %2296 = vst [vmem:[#allocation2 + $0x198] sm:$0xff] %v6096_v63  ;;  %2298 = vst [vmem:[#allocation2 + $0x1a8] sm:$0x3] %v6096_v63 }
 0x193   : > { %v890_v40 = vpop.f32.mrb[36].mxu0  ;;  %1919 = vmatprep.mubr.f32.mxu1 %v1641_v20  ;;  %5707 = vmatpush3.bf16.msra.mxu1 %v5704_v58  ;;  %v5708_v38 = vpack.c.bf16 %v2803_v27, %v2802_v51  ;;  %v2787_v20 = vld [vmem:[#allocation3 + $0x258] sm:$0xff]  ;;  %2301 = vst [vmem:[#allocation2 + $0x30] sm:$0x1] %v6096_v63  ;;  %2302 = vst [vmem:[#allocation2 + $0x48] sm:$0x1] %v6096_v63  ;;  %p6034_p7 = pnand %p6033_p4, %p6027_p12 }
 0x194   : > { %v7639_v45 = vadd.f32 %v7457_v35, %v890_v40  ;;  %v892_v29 = vpop.f32.mrb[37].mxu0  ;;  %v5680_v35 = vpack.c.bf16 %v2787_v20, %v2786_v17  ;;  %2303 = vst [vmem:[#allocation2 + $0x60] sm:$0x1] %v6096_v63  ;;  %2304 = vst [vmem:[#allocation2 + $0x78] sm:$0x1] %v6096_v63  ;;  %v2804_v5 = vld [vmem:[#allocation3 + $0x2e0] sm:$0xff] }
 0x195   : > { %v1300_v41 = vpop.f32.mrb[52].mxu1  ;;  %5678 = vmatpush1.bf16.msra.mxu0 %v5677_v57  ;;  %2305 = vst [vmem:[#allocation2 + $0x90] sm:$0x1] %v6096_v63  ;;  %2306 = vst [vmem:[#allocation2 + $0xa8] sm:$0x1] %v6096_v63  ;;  %5709 = vmatprep.subr.bf16.mxu1 %v5708_v38  ;;  %v2805_v58 = vld [vmem:[#allocation3 + $0x2e8] sm:$0xff] }
 0x196   : > { %v7642_v55 = vadd.f32 %v1300_v41, %v7564_v56  ;;  %1920 = vmatmul.mubr.f32.gmra.mrb[158].mxu1 %v7519_v37  ;;  %v1302_v3 = vpop.f32.mrb[53].mxu1  ;;  %5679 = vmatprep.subr.bf16.mxu0 %v9437_v9  ;;  %2307 = vst [vmem:[#allocation2 + $0xc0] sm:$0x1] %v6096_v63  ;;  %2308 = vst [vmem:[#allocation2 + $0xd8] sm:$0x1] %v6096_v63  ;;  %v5712_v40 = vpack.c.bf16 %v2805_v58, %v2804_v5  ;;  %v2788_v57 = vld [vmem:[#allocation3 + $0x260] sm:$0xff] }
 0x197   : > { %v895_v42 = vpop.f32.mrb[38].mxu0  ;;  %2309 = vst [vmem:[#allocation2 + $0xf0] sm:$0x1] %v6096_v63  ;;  %2310 = vst [vmem:[#allocation2 + $0x108] sm:$0x1] %v6096_v63  ;;  %5711 = vmatpush3.bf16.msra.mxu1 %v5708_v38  ;;  %v2789_v29 = vld [vmem:[#allocation3 + $0x268] sm:$0xff] }
 0x198   : > { %2311 = vst [vmem:[#allocation2 + $0x120] sm:$0x1] %v6096_v63  ;;  %2312 = vst [vmem:[#allocation2 + $0x138] sm:$0x1] %v6096_v63  ;;  %v7647_v37 = vadd.f32 %v7454_v28, %v895_v42  ;;  %v897_v56 = vpop.f32.mrb[39].mxu0  ;;  %v5683_v41 = vpack.c.bf16 %v2789_v29, %v2788_v57  ;;  %5713 = vmatprep.subr.bf16.mxu1 %v5712_v40  ;;  %v2806_v38 = vld [vmem:[#allocation3 + $0x2f0] sm:$0xff] }
 0x199   : > { %2313 = vst [vmem:[#allocation2 + $0x150] sm:$0x1] %v6096_v63  ;;  %2314 = vst [vmem:[#allocation2 + $0x168] sm:$0x1] %v6096_v63  ;;  %v1305_v50 = vpop.f32.mrb[54].mxu1  ;;  %5681 = vmatpush1.bf16.msra.mxu0 %v5680_v35  ;;  %v2807_v17 = vld [vmem:[#allocation3 + $0x2f8] sm:$0xff] }
 0x19a   : > { %2315 = vst [vmem:[#allocation2 + $0x180] sm:$0x1] %v6096_v63  ;;  %2318 = vst [vmem:[#allocation2 + $0x29] sm:$0x1] %v6096_v63  ;;  %v7650_v60 = vadd.f32 %v1305_v50, %v7573_v52  ;;  %v1307_v4 = vpop.f32.mrb[55].mxu1  ;;  %5682 = vmatprep.subr.bf16.mxu0 %v9437_v9  ;;  %v5716_v42 = vpack.c.bf16 %v2807_v17, %v2806_v38  ;;  %v2790_v35 = vld [vmem:[#allocation3 + $0x270] sm:$0xff] }
 0x19b   : > { %2319 = vst [vmem:[#allocation2 + $0x41] sm:$0x1] %v6096_v63  ;;  %2320 = vst [vmem:[#allocation2 + $0x59] sm:$0x1] %v6096_v63  ;;  %v900_v28 = vpop.f32.mrb[40].mxu0  ;;  %5715 = vmatpush3.bf16.msra.mxu1 %v5712_v40 }
 0x19c   : > { %2321 = vst [vmem:[#allocation2 + $0x71] sm:$0x1] %v6096_v63  ;;  %2322 = vst [vmem:[#allocation2 + $0x89] sm:$0x1] %v6096_v63  ;;  %v7654_v51 = vadd.f32 %v7468_v34, %v900_v28  ;;  %v902_v27 = vpop.f32.mrb[41].mxu0  ;;  %5717 = vmatprep.subr.bf16.mxu1 %v5716_v42 }
 0x19d   : > { %2323 = vst [vmem:[#allocation2 + $0xa1] sm:$0x1] %v6096_v63  ;;  %2324 = vst [vmem:[#allocation2 + $0xb9] sm:$0x1] %v6096_v63  ;;  %v1310_v3 = vpop.f32.mrb[56].mxu1  ;;  %5684 = vmatpush1.bf16.msra.mxu0 %v5683_v41 }
 0x19e   : > { %2325 = vst [vmem:[#allocation2 + $0xd1] sm:$0x1] %v6096_v63  ;;  %2326 = vst [vmem:[#allocation2 + $0xe9] sm:$0x1] %v6096_v63  ;;  %v7657_v52 = vadd.f32 %v1310_v3, %v7582_v10  ;;  %v1312_v20 = vpop.f32.mrb[57].mxu1  ;;  %5685 = vmatprep.subr.bf16.mxu0 %v9437_v9 }
 0x19f   : > { %2327 = vst [vmem:[#allocation2 + $0x101] sm:$0x1] %v6096_v63  ;;  %2328 = vst [vmem:[#allocation2 + $0x119] sm:$0x1] %v6096_v63  ;;  %v905_v56 = vpop.f32.mrb[42].mxu0  ;;  %5719 = vmatpush3.bf16.msra.mxu1 %v5716_v42 }
 0x1a0   : > { %2329 = vst [vmem:[#allocation2 + $0x131] sm:$0x1] %v6096_v63  ;;  %2330 = vst [vmem:[#allocation2 + $0x149] sm:$0x1] %v6096_v63  ;;  %v1131_v34 = vadd.f32 %v7465_v2, %v905_v56  ;;  %v907_v5 = vpop.f32.mrb[43].mxu0  ;;  %5720 = vmatprep.subr.bf16.mxu1 %v9437_v9 }
 0x1a1   : > { %2331 = vst [vmem:[#allocation2 + $0x161] sm:$0x1] %v6096_v63  ;;  %2332 = vst [vmem:[#allocation2 + $0x179] sm:$0x1] %v6096_v63  ;;  %v1315_v58 = vpop.f32.mrb[58].mxu1  ;;  %v2727_v5 = vld [vmem:[#allocation3 + $0x108] sm:$0xff] }
 0x1a2   : > { %2333 = vst [vmem:[#allocation2 + $0x191] sm:$0x1] %v6096_v63  ;;  %2299 = vst [vmem:[#allocation2] sm:$0x1] %v6096_v63  ;;  %v7662_v4 = vadd.f32 %v1315_v58, %v7591_v61  ;;  %v1317_v10 = vpop.f32.mrb[59].mxu1 }
 0x1a3   : > { %2316 = vst [vmem:[#allocation2 + $0x198] sm:$0x1] %v6096_v63  ;;  %2317 = vst [vmem:[#allocation2 + $0x11] sm:$0x1] %v6096_v63  ;;  %v910_v40 = vpop.f32.mrb[44].mxu0 }
 0x1a4   : > { %2334 = vst [vmem:[#allocation2 + $0x1a9] sm:$0x1] %v6096_v63  ;;  %v2791_v63 = vld [vmem:[#allocation3 + $0x278] sm:$0xff]  ;;  %v1136_v57 = vadd.f32 %v7479_v0, %v910_v40  ;;  %v912_v29 = vpop.f32.mrb[45].mxu0 }
 0x1a5   : > { %v5686_v50 = vpack.c.bf16 %v2791_v63, %v2790_v35  ;;  %v1320_v28 = vpop.f32.mrb[60].mxu1 }
 0x1a6   : > { %v7667_v41 = vadd.f32 %v1320_v28, %v7600_v6  ;;  %v1322_v2 = vpop.f32.mrb[61].mxu1 }
 0x1a7   : > { %5687 = vmatpush1.bf16.msra.mxu0 %v5686_v50  ;;  %v915_v27 = vpop.f32.mrb[46].mxu0  ;;  %v2726_v50 = vld [vmem:[#allocation3 + $0x100] sm:$0xff] }
 0x1a8   : > { %v1141_v3 = vadd.f32 %v7476_v25, %v915_v27  ;;  %v917_v38 = vpop.f32.mrb[47].mxu0  ;;  %v7677_v10 = vpack.c.bf16 %v2727_v5, %v2726_v50 }
 0x1a9   : > { %v1325_v17 = vpop.f32.mrb[62].mxu1 }
 0x1aa   : > { %v7671_v61 = vadd.f32 %v1325_v17, %v7611_v19  ;;  %v1327_v20 = vpop.f32.mrb[63].mxu1  ;;  %5769 = vmatprep.subr.bf16.mxu0 %v7677_v10 }
 0x1ab   : > { %v920_v42 = vpop.f32.mrb[48].mxu0 }
 0x1ac   : > { %v1146_v35 = vadd.f32 %v7490_v44, %v920_v42  ;;  %v922_v63 = vpop.f32.mrb[49].mxu0 }
 0x1ad   : > { %v1330_v0 = vpop.f32.mrb[64].mxu1 }
 0x1ae   : > { %v7675_v56 = vadd.f32 %v1330_v0, %v7620_v26  ;;  %v1332_v6 = vpop.f32.mrb[65].mxu1 }
 0x1af   : > { %v925_v58 = vpop.f32.mrb[50].mxu0 }
 0x1b0   : > { %v1151_v25 = vadd.f32 %v7486_v11, %v925_v58  ;;  %v927_v40 = vpop.f32.mrb[51].mxu0 }
 0x1b1   : > { %v1335_v19 = vpop.f32.mrb[66].mxu1 }
 0x1b2   : > { %v7682_v29 = vadd.f32 %v1335_v19, %v7630_v12  ;;  %v1337_v44 = vpop.f32.mrb[67].mxu1 }
 0x1b3   : > { %v930_v28 = vpop.f32.mrb[52].mxu0 }
 0x1b4   : > { %v1156_v26 = vadd.f32 %v7501_v46, %v930_v28  ;;  %v932_v2 = vpop.f32.mrb[53].mxu0 }
 0x1b5   : > { %v1340_v27 = vpop.f32.mrb[68].mxu1 }
 0x1b6   : > { %v7686_v38 = vadd.f32 %v1340_v27, %v7639_v45  ;;  %v1342_v17 = vpop.f32.mrb[69].mxu1 }
 0x1b7   : > { %v935_v20 = vpop.f32.mrb[54].mxu0 }
 0x1b8   : > { %v1161_v11 = vadd.f32 %v7497_v47, %v935_v20  ;;  %v937_v42 = vpop.f32.mrb[55].mxu0 }
 0x1b9   : > { %v1345_v63 = vpop.f32.mrb[70].mxu1 }
 0x1ba   : > { %v7690_v0 = vadd.f32 %v1345_v63, %v7647_v37  ;;  %v1347_v12 = vpop.f32.mrb[71].mxu1 }
 0x1bb   : > { %v940_v6 = vpop.f32.mrb[56].mxu0 }
 0x1bc   : > { %v1166_v50 = vadd.f32 %v7512_v32, %v940_v6  ;;  %v942_v5 = vpop.f32.mrb[57].mxu0 }
 0x1bd   : > { %v1350_v46 = vpop.f32.mrb[72].mxu1 }
 0x1be   : > { %v7694_v58 = vadd.f32 %v1350_v46, %v7654_v51  ;;  %v1352_v45 = vpop.f32.mrb[73].mxu1 }
 0x1bf   : > { %v945_v40 = vpop.f32.mrb[58].mxu0 }
 0x1c0   : > { %v1171_v19 = vadd.f32 %v7508_v30, %v945_v40  ;;  %v947_v44 = vpop.f32.mrb[59].mxu0 }
 0x1c1   : > { %v1355_v47 = vpop.f32.mrb[74].mxu1 }
 0x1c2   : > { %v7697_v28 = vadd.f32 %v1355_v47, %v1131_v34  ;;  %v1357_v2 = vpop.f32.mrb[75].mxu1 }
 0x1c3   : > { %v950_v37 = vpop.f32.mrb[60].mxu0 }
 0x1c4   : > { %v1176_v27 = vadd.f32 %v7531_v36, %v950_v37  ;;  %v952_v17 = vpop.f32.mrb[61].mxu0 }
 0x1c5   : > { %v1360_v20 = vpop.f32.mrb[76].mxu1 }
 0x1c6   : > { %v7700_v32 = vadd.f32 %v1360_v20, %v1136_v57  ;;  %v1362_v42 = vpop.f32.mrb[77].mxu1 }
 0x1c7   : > { %v955_v63 = vpop.f32.mrb[62].mxu0 }
 0x1c8   : > { %v1181_v51 = vadd.f32 %v7526_v54, %v955_v63  ;;  %v957_v12 = vpop.f32.mrb[63].mxu0 }
 0x1c9   : > { %v1365_v6 = vpop.f32.mrb[78].mxu1 }
 0x1ca   : > { %v7703_v5 = vadd.f32 %v1365_v6, %v1141_v3  ;;  %v1367_v30 = vpop.f32.mrb[79].mxu1 }
 0x1cb   : > { %v5034_v46 = vpop.f32.mrb[64].mxu0 }
 0x1cc   : > { %v7706_v34 = vadd.f32 %v5034_v46, %v7558_v49  ;;  %v1475_v45 = vpop.f32.mrb[65].mxu0 }
 0x1cd   : > { %v1370_v40 = vpop.f32.mrb[80].mxu1  ;;  %v7709_v36 = vadd.f32 %v1475_v45, %v7546_v15 }
 0x1ce   : > { %v7711_v57 = vadd.f32 %v1370_v40, %v1146_v35  ;;  %v1372_v44 = vpop.f32.mrb[81].mxu1 }
 0x1cf   : > { %v5037_v47 = vpop.f32.mrb[66].mxu0 }
 0x1d0   : > { %v7714_v54 = vadd.f32 %v5037_v47, %v7576_v31  ;;  %v1485_v2 = vpop.f32.mrb[67].mxu0 }
 0x1d1   : > { %v1375_v3 = vpop.f32.mrb[82].mxu1  ;;  %v7717_v37 = vadd.f32 %v1485_v2, %v7567_v39 }
 0x1d2   : > { %v7719_v17 = vadd.f32 %v1375_v3, %v1151_v25  ;;  %v1377_v49 = vpop.f32.mrb[83].mxu1 }
 0x1d3   : > { %v5040_v20 = vpop.f32.mrb[68].mxu0 }
 0x1d4   : > { %v7722_v42 = vadd.f32 %v5040_v20, %v7594_v43  ;;  %v1495_v15 = vpop.f32.mrb[69].mxu0 }
 0x1d5   : > { %v1380_v35 = vpop.f32.mrb[84].mxu1  ;;  %v7725_v63 = vadd.f32 %v1495_v15, %v7585_v33 }
 0x1d6   : > { %v7727_v12 = vadd.f32 %v1380_v35, %v1156_v26  ;;  %v1382_v31 = vpop.f32.mrb[85].mxu1 }
 0x1d7   : > { %v5043_v6 = vpop.f32.mrb[70].mxu0 }
 0x1d8   : > { %v7730_v30 = vadd.f32 %v5043_v6, %v7614_v53  ;;  %v1505_v39 = vpop.f32.mrb[71].mxu0 }
 0x1d9   : > { %v1385_v25 = vpop.f32.mrb[86].mxu1  ;;  %v7733_v46 = vadd.f32 %v1505_v39, %v7603_v62 }
 0x1da   : > { %v1386_v45 = vadd.f32 %v1385_v25, %v1161_v11  ;;  %v1387_v43 = vpop.f32.mrb[87].mxu1 }
 0x1db   : > { %v5046_v40 = vpop.f32.mrb[72].mxu0 }
 0x1dc   : > { %v7736_v44 = vadd.f32 %v5046_v40, %v7634_v1  ;;  %v1515_v33 = vpop.f32.mrb[73].mxu0 }
 0x1dd   : > { %v1390_v47 = vpop.f32.mrb[88].mxu1  ;;  %v7739_v26 = vadd.f32 %v1515_v33, %v7625_v14 }
 0x1de   : > { %v1391_v2 = vadd.f32 %v1390_v47, %v1166_v50  ;;  %v1392_v3 = vpop.f32.mrb[89].mxu1 }
 0x1df   : > { %v5049_v53 = vpop.f32.mrb[74].mxu0 }
 0x1e0   : > { %v7742_v49 = vadd.f32 %v5049_v53, %v7650_v60  ;;  %v1525_v20 = vpop.f32.mrb[75].mxu0 }
 0x1e1   : > { %v1395_v62 = vpop.f32.mrb[90].mxu1  ;;  %v7745_v11 = vadd.f32 %v1525_v20, %v7642_v55 }
 0x1e2   : > { %v1396_v15 = vadd.f32 %v1395_v62, %v1171_v19  ;;  %v1397_v35 = vpop.f32.mrb[91].mxu1 }
 0x1e3   : > { %v5052_v1 = vpop.f32.mrb[76].mxu0 }
 0x1e4   : > { %v7748_v31 = vadd.f32 %v5052_v1, %v7662_v4  ;;  %v1535_v6 = vpop.f32.mrb[77].mxu0 }
 0x1e5   : > { %v1400_v14 = vpop.f32.mrb[92].mxu1  ;;  %v7751_v50 = vadd.f32 %v1535_v6, %v7657_v52 }
 0x1e6   : > { %v1401_v39 = vadd.f32 %v1400_v14, %v1176_v27  ;;  %v1402_v25 = vpop.f32.mrb[93].mxu1 }
 0x1e7   : > { %v5055_v60 = vpop.f32.mrb[78].mxu0 }
 0x1e8   : > { %v7754_v43 = vadd.f32 %v5055_v60, %v7671_v61  ;;  %v1545_v40 = vpop.f32.mrb[79].mxu0 }
 0x1e9   : > { %v1405_v55 = vpop.f32.mrb[94].mxu1  ;;  %v7757_v19 = vadd.f32 %v1545_v40, %v7667_v41 }
 0x1ea   : > { %v1406_v33 = vadd.f32 %v1405_v55, %v1181_v51  ;;  %v1407_v47 = vpop.f32.mrb[95].mxu1 }
 0x1eb   : > { %v5058_v4 = vpop.f32.mrb[80].mxu0 }
 0x1ec   : > { %v7760_v3 = vadd.f32 %v5058_v4, %v7682_v29  ;;  %v1555_v53 = vpop.f32.mrb[81].mxu0 }
 0x1ed   : > { %v7763_v52 = vadd.f32 %v1555_v53, %v7675_v56  ;;  %v1766_v27 = vpop.f32.mrb[96].mxu1 }
 0x1ee   : > { %v1768_v20 = vpop.f32.mrb[97].mxu1 }
 0x1ef   : > { %v5061_v62 = vpop.f32.mrb[82].mxu0 }
 0x1f0   : > { %v7766_v61 = vadd.f32 %v5061_v62, %v7690_v0  ;;  %v1565_v35 = vpop.f32.mrb[83].mxu0 }
 0x1f1   : > { %v7769_v41 = vadd.f32 %v1565_v35, %v7686_v38  ;;  %v1771_v51 = vpop.f32.mrb[98].mxu1 }
 0x1f2   : > { %v1773_v1 = vpop.f32.mrb[99].mxu1 }
 0x1f3   : > { %v5064_v6 = vpop.f32.mrb[84].mxu0 }
 0x1f4   : > { %v7772_v29 = vadd.f32 %v5064_v6, %v7697_v28  ;;  %v1575_v14 = vpop.f32.mrb[85].mxu0 }
 0x1f5   : > { %v7775_v56 = vadd.f32 %v1575_v14, %v7694_v58  ;;  %v1776_v25 = vpop.f32.mrb[100].mxu1 }
 0x1f6   : > { %v1778_v60 = vpop.f32.mrb[101].mxu1 }
 0x1f7   : > { %v5067_v40 = vpop.f32.mrb[86].mxu0 }
 0x1f8   : > { %v7778_v0 = vadd.f32 %v5067_v40, %v7703_v5  ;;  %v1585_v55 = vpop.f32.mrb[87].mxu0 }
 0x1f9   : > { %v7781_v38 = vadd.f32 %v1585_v55, %v7700_v32  ;;  %v1781_v47 = vpop.f32.mrb[102].mxu1 }
 0x1fa   : > { %v1783_v4 = vpop.f32.mrb[103].mxu1 }
 0x1fb   : > { %v5070_v53 = vpop.f32.mrb[88].mxu0 }
 0x1fc   : > { %v7784_v28 = vadd.f32 %v5070_v53, %v7719_v17  ;;  %v1595_v20 = vpop.f32.mrb[89].mxu0 }
 0x1fd   : > { %v7787_v58 = vadd.f32 %v1595_v20, %v7711_v57  ;;  %v1786_v62 = vpop.f32.mrb[104].mxu1 }
 0x1fe   : > { %v1788_v35 = vpop.f32.mrb[105].mxu1 }
 0x1ff   : > { %v5073_v1 = vpop.f32.mrb[90].mxu0 }
 0x200   : > { %v7789_v6 = vadd.f32 %v5073_v1, %v1386_v45  ;;  %v1605_v5 = vpop.f32.mrb[91].mxu0 }
 0x201   : > { %v7792_v14 = vadd.f32 %v1605_v5, %v7727_v12  ;;  %v1791_v32 = vpop.f32.mrb[106].mxu1 }
 0x202   : > { %v1793_v60 = vpop.f32.mrb[107].mxu1 }
 0x203   : > { %v5076_v40 = vpop.f32.mrb[92].mxu0 }
 0x204   : > { %v7794_v55 = vadd.f32 %v5076_v40, %v1396_v15  ;;  %v1615_v17 = vpop.f32.mrb[93].mxu0  ;;  %v7807_v15 = vld [vmem:[%s9215_s2] ss:$0 sm:$0xff] }
 0x205   : > { %v7796_v4 = vadd.f32 %v1615_v17, %v1391_v2  ;;  %v7798_v53 = vpop.f32.mrb[108].mxu1 }
 0x206   : > { %9536 = vst [vmem:[#allocation51_spill] sm:$0xff] %v7794_v55  ;;  %v1798_v57 = vpop.f32.mrb[109].mxu1 }
 0x207   : > { %v5079_v20 = vpop.f32.mrb[94].mxu0 }
 0x208   : > { %v7800_v35 = vadd.f32 %v5079_v20, %v1406_v33  ;;  %v1625_v45 = vpop.f32.mrb[95].mxu0 }
 0x209   : > { %v7802_v1 = vadd.f32 %v1625_v45, %v1401_v39  ;;  %v1801_v13 = vpop.f32.mrb[110].mxu1  ;;  %v7815_v39 = vld [vmem:[%s9216_s3] ss:$0 sm:$0xff] }
 0x20a   : > { %9537 = vst [vmem:[#allocation55_spill] sm:$0xff] %v7800_v35  ;;  %v1803_v12 = vpop.f32.mrb[111].mxu1 }
 0x20b   : > { %9538 = vst [vmem:[#allocation30_spill] sm:$0xff] %v7802_v1  ;;  %v5114_v5 = vpop.f32.mrb[96].mxu0 }
 0x20c   : > { %v1997_v23 = vadd.f32 %v5114_v5, %v1771_v51  ;;  %v1991_v60 = vpop.f32.mrb[97].mxu0 }
 0x20d   : > { %v1992_v2 = vadd.f32 %v1991_v60, %v1766_v27  ;;  %v7809_v40 = vpop.f32.mrb[112].mxu1 }
 0x20e   : > { %v2151_v17 = vadd.f32 %v1997_v23, %v7706_v34  ;;  %v1808_v33 = vpop.f32.mrb[113].mxu1 }
 0x20f   : > { %v2150_v57 = vadd.f32 %v1992_v2, %v7709_v36  ;;  %v5117_v51 = vpop.f32.mrb[98].mxu0 }
 0x210   : > { %v2190_v20 = vmul.f32 %v7807_v15, %v2151_v17  ;;  %v2007_v45 = vadd.f32 %v5117_v51, %v1781_v47  ;;  %v2001_v12 = vpop.f32.mrb[99].mxu0 }
 0x211   : > { %v2189_v5 = vmul.f32 %v7807_v15, %v2150_v57  ;;  %v2002_v27 = vadd.f32 %v2001_v12, %v1776_v25  ;;  %v7820_v60 = vpop.f32.mrb[114].mxu1  ;;  %v2729_v57 = vld [vmem:[#allocation3 + $0x118] sm:$0xff] }
 0x212   : > { %v2229_v23 = vadd.f32 %v7815_v39, %v2190_v20  ;;  %v2153_v34 = vadd.f32 %v2007_v45, %v7714_v54  ;;  %v1813_v33 = vpop.f32.mrb[115].mxu1  ;;  %v2730_v54 = vld [vmem:[#allocation3 + $0x120] sm:$0xff]  ;;  %v2731_v45 = vld [vmem:[#allocation3 + $0x128] sm:$0xff] }
 0x213   : > { %v2228_v21 = vadd.f32 %v7815_v39, %v2189_v5  ;;  %v2152_v16 = vadd.f32 %v2002_v27, %v7717_v37  ;;  %v5120_v36 = vpop.f32.mrb[100].mxu0  ;;  %v7830_v33 = vld [vmem:[#allocation3] sm:$0xff]  ;;  %v7851_v59 = vpack.c.bf16 %v2731_v45, %v2730_v54 }
 0x214   : > { %v2261_v2 = vmax.f32 %v2229_v23, 0.0  ;;  %v2192_v17 = vmul.f32 %v7807_v15, %v2153_v34  ;;  %v2017_v47 = vadd.f32 %v5120_v36, %v1791_v32  ;;  %v2011_v51 = vpop.f32.mrb[101].mxu0  ;;  %v7834_v32 = vld [vmem:[#allocation3 + $0x8] sm:$0xff]  ;;  %v7836_v23 = vld [vmem:[#allocation3 + $0x10] sm:$0xff]  ;;  %v7842_v36 = vpack.c.bf16 %v2729_v57, %v2728_v18 }
 0x215   : > { %v2260_v25 = vmax.f32 %v2228_v21, 0.0  ;;  %v2191_v12 = vmul.f32 %v7807_v15, %v2152_v16  ;;  %v2012_v7 = vadd.f32 %v2011_v51, %v1786_v62  ;;  %v7828_v20 = vpop.f32.mrb[116].mxu1  ;;  %v7838_v21 = vld [vmem:[#allocation3 + $0x18] sm:$0xff] }
 0x216   : > { %2337 = vst [vmem:[#allocation2 + $0x21] sm:$0xff] %v2261_v2  ;;  %v2231_v37 = vadd.f32 %v7815_v39, %v2192_v17  ;;  %v2155_v5 = vadd.f32 %v2017_v47, %v7722_v42  ;;  %v1818_v27 = vpop.f32.mrb[117].mxu1  ;;  %v7844_v2 = vld [vmem:[#allocation3 + $0x20] sm:$0xff]  ;;  %v7846_v17 = vld [vmem:[#allocation3 + $0x28] sm:$0xff]  ;;  %v7848_v42 = vld [vmem:[#allocation3 + $0x30] sm:$0xff] }
 0x217   : > { %2336 = vst [vmem:[#allocation2 + $0x19] sm:$0xff] %v2260_v25  ;;  %v2230_v16 = vadd.f32 %v7815_v39, %v2191_v12  ;;  %v2154_v62 = vadd.f32 %v2012_v7, %v7725_v63  ;;  %v5123_v34 = vpop.f32.mrb[102].mxu0  ;;  %v7853_v25 = vld [vmem:[#allocation3 + $0x38] sm:$0xff]  ;;  %v2732_v12 = vld [vmem:[#allocation3 + $0x130] sm:$0xff] }
 0x218   : > { %v2263_v47 = vmax.f32 %v2231_v37, 0.0  ;;  %v2194_v51 = vmul.f32 %v7807_v15, %v2155_v5  ;;  %v2027_v27 = vadd.f32 %v5123_v34, %v1801_v13  ;;  %v2021_v24 = vpop.f32.mrb[103].mxu0  ;;  %v2733_v7 = vld [vmem:[#allocation3 + $0x138] sm:$0xff]  ;;  %v7859_v37 = vld [vmem:[#allocation3 + $0x40] sm:$0xff]  ;;  %v7861_v5 = vld [vmem:[#allocation3 + $0x48] sm:$0xff] }
 0x219   : > { %v2262_v63 = vmax.f32 %v2230_v16, 0.0  ;;  %v2193_v18 = vmul.f32 %v7807_v15, %v2154_v62  ;;  %v2022_v57 = vadd.f32 %v2021_v24, %v7798_v53  ;;  %v1821_v22 = vpop.f32.mrb[118].mxu1  ;;  %v2734_v53 = vld [vmem:[#allocation3 + $0x140] sm:$0xff]  ;;  %v2735_v62 = vld [vmem:[#allocation3 + $0x148] sm:$0xff] }
 0x21a   : > { %2339 = vst [vmem:[#allocation2 + $0x39] sm:$0xff] %v2263_v47  ;;  %v2233_v13 = vadd.f32 %v7815_v39, %v2194_v51  ;;  %v2157_v54 = vadd.f32 %v2027_v27, %v7730_v30  ;;  %v1823_v45 = vpop.f32.mrb[119].mxu1  ;;  %v7873_v51 = vpack.c.bf16 %v2733_v7, %v2732_v12  ;;  %v7881_v1 = vpack.c.bf16 %v2735_v62, %v2734_v53 }
 0x21b   : > { %2338 = vst [vmem:[#allocation2 + $0x31] sm:$0xff] %v2262_v63  ;;  %v2232_v34 = vadd.f32 %v7815_v39, %v2193_v18  ;;  %v2156_v8 = vadd.f32 %v2022_v57, %v7733_v46  ;;  %v5126_v48 = vpop.f32.mrb[104].mxu0 }
 0x21c   : > { %v2265_v30 = vmax.f32 %v2233_v13, 0.0  ;;  %v2196_v27 = vmul.f32 %v7807_v15, %v2157_v54  ;;  %v2037_v45 = vadd.f32 %v5126_v48, %v7820_v60  ;;  %v2031_v16 = vpop.f32.mrb[105].mxu0 }
 0x21d   : > { %v2264_v63 = vmax.f32 %v2232_v34, 0.0  ;;  %v2195_v18 = vmul.f32 %v7807_v15, %v2156_v8  ;;  %v2032_v46 = vadd.f32 %v2031_v16, %v7809_v40  ;;  %v1826_v57 = vpop.f32.mrb[120].mxu1  ;;  %v2373_v35 = vld [vmem:[#allocation2 + $0x28] sm:$0x3] }
 0x21e   : > { %2341 = vst [vmem:[#allocation2 + $0x51] sm:$0xff] %v2265_v30  ;;  %v2235_v12 = vadd.f32 %v7815_v39, %v2196_v27  ;;  %v2159_v7 = vadd.f32 %v2037_v45, %v7736_v44  ;;  %v1828_v13 = vpop.f32.mrb[121].mxu1  ;;  %v2371_v48 = vld [vmem:[#allocation2 + $0x18] sm:$0xff]  ;;  %v2372_v60 = vld [vmem:[#allocation2 + $0x20] sm:$0xff]  ;;  %v2590_v54 = vrot.slane %v2373_v35, 2  ;;  %v2478_v47 = vrot.slane %v2373_v35, 1 }
 0x21f   : > { %2340 = vst [vmem:[#allocation2 + $0x49] sm:$0xff] %v2264_v63  ;;  %v2234_v34 = vadd.f32 %v7815_v39, %v2195_v18  ;;  %v2158_v8 = vadd.f32 %v2032_v46, %v7739_v26  ;;  %v5129_v40 = vpop.f32.mrb[106].mxu0  ;;  %v2475_v16 = vrot.slane %v2371_v48, 1  ;;  %v2476_v24 = vrot.slane %v2372_v60, 1 }
 0x220   : > { %v2267_v53 = vmax.f32 %v2235_v12, 0.0  ;;  %v2198_v62 = vmul.f32 %v7807_v15, %v2159_v7  ;;  %v2047_v30 = vadd.f32 %v5129_v40, %v1821_v22  ;;  %v2041_v27 = vpop.f32.mrb[107].mxu0  ;;  %v2587_v55 = vrot.slane %v2371_v48, 2 }
 0x221   : > { %v2266_v44 = vmax.f32 %v2234_v34, 0.0  ;;  %v2197_v45 = vmul.f32 %v7807_v15, %v2158_v8  ;;  %v2042_v13 = vadd.f32 %v2041_v27, %v7828_v20  ;;  %v7891_v35 = vsel %vm394_vm1, %v2475_v16, %v2476_v24  ;;  %v1831_v63 = vpop.f32.mrb[122].mxu1 }
 0x222   : > { %2343 = vst [vmem:[#allocation2 + $0x69] sm:$0xff] %v2267_v53  ;;  %v2237_v26 = vadd.f32 %v7815_v39, %v2198_v62  ;;  %v2161_v18 = vadd.f32 %v2047_v30, %v7742_v49  ;;  %2872 = vmatprep.mubr.f32.mxu0 %v7891_v35  ;;  %v2588_v46 = vrot.slane %v2372_v60, 2  ;;  %v7897_v22 = vsel %vm394_vm1, %v2476_v24, %v2478_v47  ;;  %v1833_v12 = vpop.f32.mrb[123].mxu1  ;;  %v7899_v7 = vld [vmem:[#allocation2 + $0x30] sm:$0xff]  ;;  %v7901_v34 = vld [vmem:[#allocation2 + $0x38] sm:$0xff] }
 0x223   : > { %2342 = vst [vmem:[#allocation2 + $0x61] sm:$0xff] %v2266_v44  ;;  %v2236_v20 = vadd.f32 %v7815_v39, %v2197_v45  ;;  %v2160_v8 = vadd.f32 %v2042_v13, %v7745_v11  ;;  %v5132_v40 = vpop.f32.mrb[108].mxu0  ;;  %2873 = vmatmul.mubr.f32.vlgmr.msra.gmra.mrb[128].mxu0 %v2371_v48  ;;  %v2592_v49 = vrot.slane %v7899_v7, 2  ;;  %v2593_v16 = vrot.slane %v7901_v34, 2  ;;  %v7907_v53 = vld [vmem:[#allocation2 + $0x40] sm:$0x3] }
 0x224   : > { %v2269_v24 = vmax.f32 %v2237_v26, 0.0  ;;  %v2200_v47 = vmul.f32 %v7807_v15, %v2161_v18  ;;  %v7911_v62 = vsel %vm507_vm0, %v2587_v55, %v2588_v46  ;;  %v2057_v30 = vadd.f32 %v5132_v40, %v1831_v63  ;;  %v2051_v27 = vpop.f32.mrb[109].mxu0  ;;  %2877 = vmatprep.mubr.f32.mxu0 %v7897_v22  ;;  %5771 = vmatpush3.bf16.msra.mxu0 %v7677_v10 }
 0x225   : > { %v2268_v11 = vmax.f32 %v2236_v20, 0.0  ;;  %v2199_v48 = vmul.f32 %v7807_v15, %v2160_v8  ;;  %5192 = vmatprep.mubr.f32.mxu1 %v7911_v62  ;;  %v7918_v44 = vsel %vm507_vm0, %v2588_v46, %v2590_v54  ;;  %v2052_v45 = vadd.f32 %v2051_v27, %v1826_v57  ;;  %v1836_v13 = vpop.f32.mrb[124].mxu1  ;;  %5773 = vmatprep.subr.bf16.mxu0 %v7842_v36  ;;  %v7937_v40 = vld [vmem:[#allocation2 + $0x58] sm:$0x3] }
 0x226   : > { %9539 = vst [vmem:[#allocation31_spill] sm:$0xff] %v7918_v44  ;;  %2345 = vst [vmem:[#allocation2 + $0x81] sm:$0xff] %v2269_v24  ;;  %v2239_v55 = vadd.f32 %v7815_v39, %v2200_v47  ;;  %v2163_v63 = vadd.f32 %v2057_v30, %v7748_v31  ;;  %5193 = vmatmul.mubr.f32.vlgmr.msra.gmra.mrb[160].mxu1 %v7918_v44  ;;  %v7925_v10 = vsel %vm507_vm0, %v2592_v49, %v2593_v16  ;;  %v1838_v26 = vpop.f32.mrb[125].mxu1  ;;  %v7928_v12 = vld [vmem:[#allocation2 + $0x48] sm:$0xff]  ;;  %v7935_v8 = vld [vmem:[#allocation2 + $0x50] sm:$0xff] }
 0x227   : > { %9540 = vst [vmem:[#allocation9_spill] sm:$0xff] %v7925_v10  ;;  %v2595_v18 = vrot.slane %v7907_v53, 2  ;;  %2344 = vst [vmem:[#allocation2 + $0x79] sm:$0xff] %v2268_v11  ;;  %v2238_v57 = vadd.f32 %v7815_v39, %v2199_v48  ;;  %v2162_v54 = vadd.f32 %v2052_v45, %v7751_v50  ;;  %5195 = vmatprep.mubr.f32.mxu1 %v7925_v10  ;;  %v5135_v46 = vpop.f32.mrb[110].mxu0  ;;  %2878 = vmatmul.mubr.f32.gmra.mrb[130].mxu0 %v2372_v60 }
 0x228   : > { %v2480_v31 = vrot.slane %v7899_v7, 1  ;;  %v2481_v20 = vrot.slane %v7901_v34, 1  ;;  %v2271_v49 = vmax.f32 %v2239_v55, 0.0  ;;  %v2202_v24 = vmul.f32 %v7807_v15, %v2163_v63  ;;  %v2061_v30 = vpop.f32.mrb[111].mxu0  ;;  %5775 = vmatpush3.bf16.msra.mxu0 %v7842_v36 }
 0x229   : > { %v7941_v47 = vsel %vm507_vm0, %v2593_v16, %v2595_v18  ;;  %v2597_v50 = vrot.slane %v7928_v12, 2  ;;  %v9542_v60 = vpack.c.bf16 %v7834_v32, %v7830_v33  ;;  %v2270_v27 = vmax.f32 %v2238_v57, 0.0  ;;  %v1841_v48 = vpop.f32.mrb[126].mxu1  ;;  %5777 = vmatprep.subr.bf16.mxu0 %v7851_v59 }
 0x22a   : > { %9541 = vst [vmem:[#allocation11_spill] sm:$0xff] %v7941_v47  ;;  %v2201_v11 = vmul.f32 %v7807_v15, %v2162_v54  ;;  %v2062_v45 = vadd.f32 %v2061_v30, %v1836_v13  ;;  %v7950_v55 = vsel %vm394_vm1, %v2480_v31, %v2481_v20  ;;  %2347 = vst [vmem:[#allocation2 + $0x99] sm:$0xff] %v2271_v49  ;;  %5196 = vmatmul.mubr.f32.gmra.mrb[162].mxu1 %v7941_v47  ;;  %v1843_v32 = vpop.f32.mrb[127].mxu1  ;;  %v7959_v63 = vld [vmem:[#allocation2 + $0x60] sm:$0xff]  ;;  %v7961_v26 = vld [vmem:[#allocation2 + $0x68] sm:$0xff] }
 0x22b   : > { %5722 = vmatpush1.bf16.msra.mxu1 %v9542_v60  ;;  %v2241_v16 = vadd.f32 %v7815_v39, %v2202_v24  ;;  %v2067_v36 = vadd.f32 %v5135_v46, %v1841_v48  ;;  %2882 = vmatprep.mubr.f32.mxu0 %v7950_v55  ;;  %v2598_v33 = vrot.slane %v7935_v8, 2  ;;  %v2600_v13 = vrot.slane %v7937_v40, 2  ;;  %2346 = vst [vmem:[#allocation2 + $0x91] sm:$0xff] %v2270_v27  ;;  %v5138_v54 = vpop.f32.mrb[112].mxu0  ;;  %v7968_v49 = vld [vmem:[#allocation2 + $0x70] sm:$0x3] }
 0x22c   : > { %5723 = vmatprep.subr.bf16.mxu1 %v9437_v9  ;;  %v2240_v18 = vadd.f32 %v7815_v39, %v2201_v11  ;;  %v2164_v57 = vadd.f32 %v2062_v45, %v7757_v19  ;;  %2883 = vmatmul.mubr.f32.gmra.mrb[132].mxu0 %v7899_v7  ;;  %v2483_v46 = vrot.slane %v7907_v53, 1  ;;  %v2602_v31 = vrot.slane %v7959_v63, 2  ;;  %v2071_v11 = vpop.f32.mrb[113].mxu0 }
 0x22d   : > { %v2273_v24 = vmax.f32 %v2241_v16, 0.0  ;;  %v2165_v30 = vadd.f32 %v2067_v36, %v7754_v43  ;;  %v7972_v60 = vsel %vm507_vm0, %v2597_v50, %v2598_v33  ;;  %v7975_v27 = vsel %vm507_vm0, %v2598_v33, %v2600_v13  ;;  %5779 = vmatpush3.bf16.msra.mxu0 %v7851_v59  ;;  %v1846_v48 = vpop.f32.mrb[128].mxu1  ;;  %v7987_v45 = vld [vmem:[#allocation2 + $0x88] sm:$0x3] }
 0x22e   : > { %9543 = vst [vmem:[#allocation12_spill] sm:$0xff] %v7972_v60  ;;  %9544 = vst [vmem:[#allocation13_spill] sm:$0xff] %v7975_v27  ;;  %v9545_v19 = vpack.c.bf16 %v7838_v21, %v7836_v23  ;;  %v2272_v7 = vmax.f32 %v2240_v18, 0.0  ;;  %v2203_v53 = vmul.f32 %v7807_v15, %v2164_v57  ;;  %5198 = vmatprep.mubr.f32.mxu1 %v7972_v60  ;;  %v2603_v50 = vrot.slane %v7961_v26, 2  ;;  %v1848_v21 = vpop.f32.mrb[129].mxu1  ;;  %v7995_v36 = vld [vmem:[#allocation2 + $0x78] sm:$0xff] }
 0x22f   : > { %v7984_v43 = vsel %vm394_vm1, %v2481_v20, %v2483_v46  ;;  %2349 = vst [vmem:[#allocation2 + $0xb1] sm:$0xff] %v2273_v24  ;;  %v2204_v59 = vmul.f32 %v7807_v15, %v2165_v30  ;;  %5199 = vmatmul.mubr.f32.gmra.mrb[164].mxu1 %v7975_v27  ;;  %v2072_v23 = vadd.f32 %v2071_v11, %v1846_v48  ;;  %v2605_v16 = vrot.slane %v7968_v49, 2  ;;  %v7997_v33 = vld [vmem:[#allocation2 + $0x80] sm:$0xff]  ;;  %v8006_v46 = vpop.f32.mrb[114].mxu0 }
 0x230   : > { %5725 = vmatpush1.bf16.msra.mxu1 %v9545_v19  ;;  %2887 = vmatprep.mubr.f32.mxu0 %v7984_v43  ;;  %v2485_v20 = vrot.slane %v7928_v12, 1  ;;  %2348 = vst [vmem:[#allocation2 + $0xa9] sm:$0xff] %v2272_v7  ;;  %v2242_v32 = vadd.f32 %v7815_v39, %v2203_v53  ;;  %v8001_v13 = vsel %vm507_vm0, %v2602_v31, %v2603_v50  ;;  %v2486_v18 = vrot.slane %v7935_v8, 1  ;;  %v2736_v7 = vld [vmem:[#allocation3 + $0x150] sm:$0xff] }
 0x231   : > { %5726 = vmatprep.subr.bf16.mxu1 %v9437_v9  ;;  %9546 = vst [vmem:[#allocation14_spill] sm:$0xff] %v8001_v13  ;;  %2888 = vmatmul.mubr.f32.gmra.mrb[134].mxu0 %v7901_v34  ;;  %v2607_v57 = vrot.slane %v7995_v36, 2  ;;  %v2243_v24 = vadd.f32 %v7815_v39, %v2204_v59  ;;  %v2166_v30 = vadd.f32 %v2072_v23, %v7763_v52  ;;  %v2608_v31 = vrot.slane %v7997_v33, 2  ;;  %v2081_v34 = vpop.f32.mrb[115].mxu0  ;;  %v1851_v48 = vpop.f32.mrb[130].mxu1 }
 0x232   : > { %5781 = vmatprep.subr.bf16.mxu0 %v7873_v51  ;;  %5201 = vmatprep.mubr.f32.mxu1 %v8001_v13  ;;  %v8013_v11 = vsel %vm507_vm0, %v2603_v50, %v2605_v16  ;;  %v9548_v19 = vpack.c.bf16 %v7846_v17, %v7844_v2  ;;  %v2274_v53 = vmax.f32 %v2242_v32, 0.0  ;;  %v8020_v21 = vsel %vm394_vm1, %v2485_v20, %v2486_v18  ;;  %v8024_v23 = vld [vmem:[#allocation2 + $0xa0] sm:$0x3]  ;;  %v1853_v20 = vpop.f32.mrb[131].mxu1  ;;  %v8034_v32 = vld [vmem:[#allocation2 + $0x90] sm:$0xff] }
 0x233   : > { %9547 = vst [vmem:[#allocation15_spill] sm:$0xff] %v8013_v11  ;;  %v2610_v52 = vrot.slane %v7987_v45, 2  ;;  %v2488_v59 = vrot.slane %v7937_v40, 1  ;;  %5783 = vmatpush3.bf16.msra.mxu0 %v7873_v51  ;;  %v2275_v50 = vmax.f32 %v2243_v24, 0.0  ;;  %v2205_v2 = vmul.f32 %v7807_v15, %v2166_v30  ;;  %5202 = vmatmul.mubr.f32.gmra.mrb[166].mxu1 %v8013_v11  ;;  %v8036_v40 = vld [vmem:[#allocation2 + $0x98] sm:$0xff]  ;;  %v8048_v30 = vpop.f32.mrb[116].mxu0 }
 0x234   : > { %5728 = vmatpush1.bf16.msra.mxu1 %v9548_v19  ;;  %v2077_v17 = vadd.f32 %v5138_v54, %v1851_v48  ;;  %2892 = vmatprep.mubr.f32.mxu0 %v8020_v21  ;;  %v8032_v16 = vsel %vm507_vm0, %v2607_v57, %v2608_v31  ;;  %v2737_v19 = vld [vmem:[#allocation3 + $0x158] sm:$0xff]  ;;  %2350 = vst [vmem:[#allocation2 + $0xc1] sm:$0xff] %v2274_v53  ;;  %v2612_v57 = vrot.slane %v8034_v32, 2  ;;  %v2613_v24 = vrot.slane %v8036_v40, 2  ;;  %v8050_v48 = vld [vmem:[#allocation3 + $0x50] sm:$0xff] }
 0x235   : > { %5729 = vmatprep.subr.bf16.mxu1 %v9437_v9  ;;  %9549 = vst [vmem:[#allocation16_spill] sm:$0xff] %v8032_v16  ;;  %5204 = vmatprep.mubr.f32.mxu1 %v8032_v16  ;;  %v8041_v51 = vsel %vm507_vm0, %v2608_v31, %v2610_v52  ;;  %v8044_v54 = vsel %vm394_vm1, %v2486_v18, %v2488_v59  ;;  %2351 = vst [vmem:[#allocation2 + $0xc9] sm:$0xff] %v2275_v50  ;;  %v2490_v18 = vrot.slane %v7959_v63, 1  ;;  %v8057_v31 = vpop.f32.mrb[117].mxu0  ;;  %v8062_v59 = vld [vmem:[#allocation3 + $0x58] sm:$0xff]  ;;  %v8064_v16 = vld [vmem:[#allocation3 + $0x60] sm:$0xff] }
 0x236   : > { %2893 = vmatmul.mubr.f32.gmra.mrb[136].mxu0 %v7928_v12  ;;  %9550 = vst [vmem:[#allocation17_spill] sm:$0xff] %v8041_v51  ;;  %v2244_v53 = vadd.f32 %v7815_v39, %v2205_v2  ;;  %v2167_v20 = vadd.f32 %v2077_v17, %v7760_v3  ;;  %v2615_v12 = vrot.slane %v8024_v23, 2  ;;  %v9551_v52 = vpack.c.bf16 %v7853_v25, %v7848_v42  ;;  %v8066_v50 = vld [vmem:[#allocation3 + $0x68] sm:$0xff]  ;;  %v1856_v2 = vpop.f32.mrb[132].mxu1  ;;  %v2738_v25 = vld [vmem:[#allocation3 + $0x160] sm:$0xff] }
 0x237   : > { %2897 = vmatprep.mubr.f32.mxu0 %v8044_v54  ;;  %v8069_v3 = vsel %vm507_vm0, %v2612_v57, %v2613_v24  ;;  %v2491_v17 = vrot.slane %v7961_v26, 1  ;;  %v8072_v11 = vld [vmem:[#allocation2 + $0xb8] sm:$0x3]  ;;  %v2493_v13 = vrot.slane %v7968_v49, 1  ;;  %5785 = vmatprep.subr.bf16.mxu0 %v7881_v1  ;;  %v5788_v42 = vpack.c.bf16 %v2737_v19, %v2736_v7  ;;  %v1858_v57 = vpop.f32.mrb[133].mxu1  ;;  %v8082_v10 = vld [vmem:[#allocation2 + $0xa8] sm:$0xff] }
 0x238   : > { %5731 = vmatpush1.bf16.msra.mxu1 %v9551_v52  ;;  %9552 = vst [vmem:[#allocation18_spill] sm:$0xff] %v8069_v3  ;;  %v2276_v52 = vmax.f32 %v2244_v53, 0.0  ;;  %v2206_v27 = vmul.f32 %v7807_v15, %v2167_v20  ;;  %v2082_v60 = vadd.f32 %v2081_v34, %v1856_v2  ;;  %v8080_v47 = vsel %vm507_vm0, %v2613_v24, %v2615_v12  ;;  %v8084_v44 = vld [vmem:[#allocation2 + $0xb0] sm:$0xff]  ;;  %v2739_v49 = vld [vmem:[#allocation3 + $0x168] sm:$0xff]  ;;  %v8095_v53 = vpop.f32.mrb[118].mxu0 }
 0x239   : > { %5732 = vmatprep.subr.bf16.mxu1 %v9437_v9  ;;  %5205 = vmatmul.mubr.f32.gmra.mrb[168].mxu1 %v8041_v51  ;;  %9553 = vst [vmem:[#allocation19_spill] sm:$0xff] %v8080_v47  ;;  %v8090_v7 = vsel %vm394_vm1, %v2490_v18, %v2491_v17  ;;  %v2617_v34 = vrot.slane %v8082_v10, 2  ;;  %v2618_v19 = vrot.slane %v8084_v44, 2  ;;  %v2620_v24 = vrot.slane %v8072_v11, 2  ;;  %v8100_v12 = vpop.f32.mrb[119].mxu0  ;;  %v1861_v2 = vpop.f32.mrb[134].mxu1 }
 0x23a   : > { %5787 = vmatpush3.bf16.msra.mxu0 %v7881_v1  ;;  %5207 = vmatprep.mubr.f32.mxu1 %v8069_v3  ;;  %2352 = vst [vmem:[#allocation2 + $0xd9] sm:$0xff] %v2276_v52  ;;  %v2245_v20 = vadd.f32 %v7815_v39, %v2206_v27  ;;  %v2168_v1 = vadd.f32 %v2082_v60, %v7769_v41 }
 0x23b   : > { %2898 = vmatmul.mubr.f32.gmra.mrb[138].mxu0 %v7935_v8  ;;  %v9554_v8 = vpack.c.bf16 %v7861_v5, %v7859_v37  ;;  %v5736_v18 = vpack.c.bf16 %v8062_v59, %v8050_v48  ;;  %v8108_v57 = vsel %vm507_vm0, %v2617_v34, %v2618_v19  ;;  %v5739_v41 = vpack.c.bf16 %v8066_v50, %v8064_v16  ;;  %v1863_v5 = vpop.f32.mrb[135].mxu1  ;;  %v8116_v48 = vld [vmem:[#allocation2 + $0xc0] sm:$0xff] }
 0x23c   : > { %2902 = vmatprep.mubr.f32.mxu0 %v8090_v7  ;;  %9555 = vst [vmem:[#allocation20_spill] sm:$0xff] %v8108_v57  ;;  %5789 = vmatprep.subr.bf16.mxu0 %v5788_v42  ;;  %v5792_v60 = vpack.c.bf16 %v2739_v49, %v2738_v25  ;;  %v2277_v27 = vmax.f32 %v2245_v20, 0.0  ;;  %v2207_v52 = vmul.f32 %v7807_v15, %v2168_v1  ;;  %v2495_v59 = vrot.slane %v7995_v36, 1  ;;  %v2740_v34 = vld [vmem:[#allocation3 + $0x170] sm:$0xff]  ;;  %v8127_v25 = vld [vmem:[#allocation2 + $0xc8] sm:$0xff]  ;;  %v8133_v20 = vpop.f32.mrb[120].mxu0 }
 0x23d   : > { %5734 = vmatpush1.bf16.msra.mxu1 %v9554_v8  ;;  %v2087_v37 = vadd.f32 %v8006_v46, %v1861_v2  ;;  %v2741_v8 = vld [vmem:[#allocation3 + $0x178] sm:$0xff]  ;;  %v8122_v16 = vsel %vm507_vm0, %v2618_v19, %v2620_v24  ;;  %v8125_v50 = vsel %vm394_vm1, %v2491_v17, %v2493_v13  ;;  %v2622_v46 = vrot.slane %v8116_v48, 2  ;;  %v8130_v49 = vld [vmem:[#allocation2 + $0xd0] sm:$0x3]  ;;  %v8140_v19 = vpop.f32.mrb[121].mxu0  ;;  %v1866_v24 = vpop.f32.mrb[136].mxu1 }
 0x23e   : > { %5735 = vmatprep.subr.bf16.mxu1 %v9437_v9  ;;  %5208 = vmatmul.mubr.f32.gmra.mrb[170].mxu1 %v8080_v47  ;;  %9556 = vst [vmem:[#allocation21_spill] sm:$0xff] %v8122_v16  ;;  %2353 = vst [vmem:[#allocation2 + $0xe1] sm:$0xff] %v2277_v27  ;;  %v2246_v1 = vadd.f32 %v7815_v39, %v2207_v52  ;;  %v2623_v13 = vrot.slane %v8127_v25, 2  ;;  %v2625_v17 = vrot.slane %v8130_v49, 2  ;;  %v2708_v2 = vld [vmem:[#allocation3 + $0x70] sm:$0xff]  ;;  %v2709_v5 = vld [vmem:[#allocation3 + $0x78] sm:$0xff] }
 0x23f   : > { %5791 = vmatpush3.bf16.msra.mxu0 %v5788_v42  ;;  %5210 = vmatprep.mubr.f32.mxu1 %v8108_v57  ;;  %v2496_v42 = vrot.slane %v7997_v33, 1  ;;  %v5796_v27 = vpack.c.bf16 %v2741_v8, %v2740_v34  ;;  %v1868_v47 = vpop.f32.mrb[137].mxu1  ;;  %v2498_v8 = vrot.slane %v7987_v45, 1 }
 0x240   : > { %2903 = vmatmul.mubr.f32.gmra.mrb[140].mxu0 %v7959_v63  ;;  %v2169_v63 = vadd.f32 %v2087_v37, %v7766_v61  ;;  %5793 = vmatprep.subr.bf16.mxu0 %v5792_v60  ;;  %v2278_v57 = vmax.f32 %v2246_v1, 0.0  ;;  %v2092_v61 = vadd.f32 %v8057_v31, %v1866_v24  ;;  %v8147_v37 = vsel %vm507_vm0, %v2622_v46, %v2623_v13  ;;  %v8158_v1 = vpop.f32.mrb[122].mxu0  ;;  %v2711_v24 = vld [vmem:[#allocation3 + $0x88] sm:$0xff] }
 0x241   : > { %2907 = vmatprep.mubr.f32.mxu0 %v8125_v50  ;;  %5737 = vmatpush1.bf16.msra.mxu1 %v5736_v18  ;;  %9557 = vst [vmem:[#allocation22_spill] sm:$0xff] %v8147_v37  ;;  %v8152_v18 = vsel %vm507_vm0, %v2623_v13, %v2625_v17  ;;  %v8155_v34 = vsel %vm394_vm1, %v2495_v59, %v2496_v42  ;;  %v2500_v13 = vrot.slane %v8034_v32, 1  ;;  %v2710_v17 = vld [vmem:[#allocation3 + $0x80] sm:$0xff] }
 0x242   : > { %5738 = vmatprep.subr.bf16.mxu1 %v9437_v9  ;;  %v2208_v52 = vmul.f32 %v7807_v15, %v2169_v63  ;;  %5211 = vmatmul.mubr.f32.gmra.mrb[172].mxu1 %v8122_v16  ;;  %9558 = vst [vmem:[#allocation23_spill] sm:$0xff] %v8152_v18  ;;  %2354 = vst [vmem:[#allocation2 + $0xf1] sm:$0xff] %v2278_v57  ;;  %v2170_v47 = vadd.f32 %v2092_v61, %v7775_v56  ;;  %v1871_v63 = vpop.f32.mrb[138].mxu1  ;;  %v2501_v61 = vrot.slane %v8036_v40, 1 }
 0x243   : > { %5795 = vmatpush3.bf16.msra.mxu0 %v5792_v60  ;;  %5213 = vmatprep.mubr.f32.mxu1 %v8147_v37  ;;  %v8163_v60 = vld [vmem:[#allocation2 + $0xd8] sm:$0xff]  ;;  %v5742_v46 = vpack.c.bf16 %v2709_v5, %v2708_v2  ;;  %v2097_v57 = vadd.f32 %v8048_v30, %v1871_v63  ;;  %v1873_v56 = vpop.f32.mrb[139].mxu1  ;;  %v5745_v63 = vpack.c.bf16 %v2711_v24, %v2710_v17  ;;  %v2713_v37 = vld [vmem:[#allocation3 + $0x98] sm:$0xff]  ;;  %v2503_v24 = vrot.slane %v8024_v23, 1 }
 0x244   : > { %2908 = vmatmul.mubr.f32.gmra.mrb[142].mxu0 %v7961_v26  ;;  %v2247_v31 = vadd.f32 %v7815_v39, %v2208_v52  ;;  %v8165_v26 = vpop.f32.mrb[123].mxu0  ;;  %5797 = vmatprep.subr.bf16.mxu0 %v5796_v27  ;;  %v2209_v59 = vmul.f32 %v7807_v15, %v2170_v47  ;;  %v2627_v5 = vrot.slane %v8163_v60, 2  ;;  %v8204_v17 = vsel %vm394_vm1, %v2500_v13, %v2501_v61 }
 0x245   : > { %2912 = vmatprep.mubr.f32.mxu0 %v8155_v34  ;;  %5740 = vmatpush1.bf16.msra.mxu1 %v5739_v41  ;;  %v8174_v41 = vsel %vm394_vm1, %v2496_v42, %v2498_v8  ;;  %v8176_v2 = vld [vmem:[#allocation2 + $0xe0] sm:$0xff]  ;;  %v8179_v52 = vld [vmem:[#allocation2 + $0xe8] sm:$0x3]  ;;  %v8182_v30 = vpop.f32.mrb[124].mxu0  ;;  %v1876_v47 = vpop.f32.mrb[140].mxu1 }
 0x246   : > { %5741 = vmatprep.subr.bf16.mxu1 %v9437_v9  ;;  %v2279_v45 = vmax.f32 %v2247_v31, 0.0  ;;  %5214 = vmatmul.mubr.f32.gmra.mrb[174].mxu1 %v8152_v18  ;;  %v2628_v42 = vrot.slane %v8176_v2, 2  ;;  %v2630_v8 = vrot.slane %v8179_v52, 2  ;;  %v8190_v31 = vpop.f32.mrb[125].mxu0  ;;  %v2712_v18 = vld [vmem:[#allocation3 + $0x90] sm:$0xff] }
 0x247   : > { %5799 = vmatpush3.bf16.msra.mxu0 %v5796_v27  ;;  %v2248_v27 = vadd.f32 %v7815_v39, %v2209_v59  ;;  %v2102_v59 = vadd.f32 %v8100_v12, %v1876_v47  ;;  %v5748_v13 = vpack.c.bf16 %v2713_v37, %v2712_v18  ;;  %v2505_v18 = vrot.slane %v8082_v10, 1 }
 0x248   : > { %2913 = vmatmul.mubr.f32.gmra.mrb[144].mxu0 %v7995_v36  ;;  %5800 = vmatprep.subr.bf16.mxu0 %v9437_v9  ;;  %2355 = vst [vmem:[#allocation2 + $0xf9] sm:$0xff] %v2279_v45  ;;  %v2171_v36 = vadd.f32 %v2097_v57, %v7772_v29  ;;  %v8196_v29 = vsel %vm507_vm0, %v2627_v5, %v2628_v42  ;;  %v1878_v57 = vpop.f32.mrb[141].mxu1 }
 0x249   : > { %2917 = vmatprep.mubr.f32.mxu0 %v8174_v41  ;;  %5743 = vmatpush1.bf16.msra.mxu1 %v5742_v46  ;;  %v2280_v56 = vmax.f32 %v2248_v27, 0.0  ;;  %9559 = vst [vmem:[#allocation24_spill] sm:$0xff] %v8196_v29  ;;  %v8201_v46 = vsel %vm507_vm0, %v2628_v42, %v2630_v8  ;;  %v8207_v27 = vpop.f32.mrb[126].mxu0  ;;  %v2172_v5 = vadd.f32 %v2102_v59, %v7781_v38  ;;  %v1881_v42 = vpop.f32.mrb[142].mxu1  ;;  %v2714_v38 = vld [vmem:[#allocation3 + $0xa0] sm:$0xff] }
 0x24a   : > { %5744 = vmatprep.subr.bf16.mxu1 %v9437_v9  ;;  %v2210_v45 = vmul.f32 %v7807_v15, %v2171_v36  ;;  %5216 = vmatprep.mubr.f32.mxu1 %v8196_v29  ;;  %9560 = vst [vmem:[#allocation25_spill] sm:$0xff] %v8201_v46  ;;  %v8215_v36 = vpop.f32.mrb[127].mxu0  ;;  %v2107_v47 = vadd.f32 %v8095_v53, %v1881_v42  ;;  %v2506_v53 = vrot.slane %v8084_v44, 1 }
 0x24b   : > { %2356 = vst [vmem:[#allocation2 + $0x109] sm:$0xff] %v2280_v56  ;;  %5217 = vmatmul.mubr.f32.gmra.mrb[176].mxu1 %v8201_v46  ;;  %v2211_v23 = vmul.f32 %v7807_v15, %v2172_v5  ;;  %v1883_v56 = vpop.f32.mrb[143].mxu1  ;;  %v8222_v59 = vsel %vm394_vm1, %v2501_v61, %v2503_v24 }
 0x24c   : > { %2918 = vmatmul.mubr.f32.gmra.mrb[146].mxu0 %v7997_v33  ;;  %v2249_v12 = vadd.f32 %v7815_v39, %v2210_v45  ;;  %v8213_v33 = vld [vmem:[#allocation2 + $0xf0] sm:$0xff]  ;;  %v2715_v45 = vld [vmem:[#allocation3 + $0xa8] sm:$0xff]  ;;  %v2173_v5 = vadd.f32 %v2107_v47, %v7778_v0  ;;  %v2716_v0 = vld [vmem:[#allocation3 + $0xb0] sm:$0xff] }
 0x24d   : > { %2922 = vmatprep.mubr.f32.mxu0 %v8204_v17  ;;  %5746 = vmatpush1.bf16.msra.mxu1 %v5745_v63  ;;  %v2632_v63 = vrot.slane %v8213_v33, 2  ;;  %v1886_v24 = vpop.f32.mrb[144].mxu1  ;;  %v5751_v42 = vpack.c.bf16 %v2715_v45, %v2714_v38  ;;  %v2717_v47 = vld [vmem:[#allocation3 + $0xb8] sm:$0xff]  ;;  %v8248_v38 = vsel %vm394_vm1, %v2505_v18, %v2506_v53 }
 0x24e   : > { %v2281_v8 = vmax.f32 %v2249_v12, 0.0  ;;  %5747 = vmatprep.subr.bf16.mxu1 %v9437_v9  ;;  %v2250_v12 = vadd.f32 %v7815_v39, %v2211_v23  ;;  %v2212_v46 = vmul.f32 %v7807_v15, %v2173_v5  ;;  %v2112_v29 = vadd.f32 %v8140_v19, %v1886_v24  ;;  %v1888_v23 = vpop.f32.mrb[145].mxu1  ;;  %v2719_v24 = vld [vmem:[#allocation3 + $0xc8] sm:$0xff] }
 0x24f   : > { %v8224_v57 = vld [vmem:[#allocation2 + $0xf8] sm:$0xff]  ;;  %v8227_v37 = vld [vmem:[#allocation2 + $0x100] sm:$0x3]  ;;  %v2508_v19 = vrot.slane %v8072_v11, 1  ;;  %v5754_v5 = vpack.c.bf16 %v2717_v47, %v2716_v0  ;;  %v2510_v23 = vrot.slane %v8116_v48, 1 }
 0x250   : > { %2923 = vmatmul.mubr.f32.gmra.mrb[148].mxu0 %v8034_v32  ;;  %9561 = vst [vmem:[#allocation26_spill] sm:$0xff] %v8224_v57  ;;  %2357 = vst [vmem:[#allocation2 + $0x111] sm:$0xff] %v2281_v8  ;;  %v2633_v32 = vrot.slane %v8224_v57, 2  ;;  %v2635_v61 = vrot.slane %v8227_v37, 2  ;;  %v2282_v56 = vmax.f32 %v2250_v12, 0.0  ;;  %v2251_v45 = vadd.f32 %v7815_v39, %v2212_v46  ;;  %v2718_v46 = vld [vmem:[#allocation3 + $0xc0] sm:$0xff] }
 0x251   : > { %2927 = vmatprep.mubr.f32.mxu0 %v8222_v59  ;;  %5749 = vmatpush1.bf16.msra.mxu1 %v5748_v13 }
 0x252   : > { %v8239_v8 = vsel %vm507_vm0, %v2632_v63, %v2633_v32  ;;  %5750 = vmatprep.subr.bf16.mxu1 %v9437_v9  ;;  %v8245_v13 = vsel %vm507_vm0, %v2633_v32, %v2635_v61  ;;  %2358 = vst [vmem:[#allocation2 + $0x121] sm:$0xff] %v2282_v56  ;;  %v2174_v63 = vadd.f32 %v2112_v29, %v7787_v58  ;;  %v8255_v12 = vld [vmem:[#allocation2 + $0x108] sm:$0xff]  ;;  %v2283_v32 = vmax.f32 %v2251_v45, 0.0 }
 0x253   : > { %9562 = vst [vmem:[#allocation28_spill] sm:$0xff] %v8239_v8  ;;  %5219 = vmatprep.mubr.f32.mxu1 %v8239_v8  ;;  %9563 = vst [vmem:[#allocation29_spill] sm:$0xff] %v8255_v12  ;;  %v8262_v58 = vsel %vm394_vm1, %v2506_v53, %v2508_v19  ;;  %v5757_v45 = vpack.c.bf16 %v2719_v24, %v2718_v46 }
 0x254   : > { %2928 = vmatmul.mubr.f32.gmra.mrb[150].mxu0 %v8036_v40  ;;  %5220 = vmatmul.mubr.f32.gmra.mrb[178].mxu1 %v8245_v13  ;;  %v1891_v40 = vpop.f32.mrb[146].mxu1  ;;  %v2213_v18 = vmul.f32 %v7807_v15, %v2174_v63  ;;  %9564 = vst [vmem:[#allocation35_spill] sm:$0xff] %v8262_v58  ;;  %2359 = vst [vmem:[#allocation2 + $0x129] sm:$0xff] %v2283_v32 }
 0x255   : > { %2932 = vmatprep.mubr.f32.mxu0 %v8248_v38  ;;  %5752 = vmatpush1.bf16.msra.mxu1 %v5751_v42  ;;  %v2117_v61 = vadd.f32 %v8133_v20, %v1891_v40  ;;  %v1893_v11 = vpop.f32.mrb[147].mxu1  ;;  %v2637_v42 = vrot.slane %v8255_v12, 2  ;;  %v2511_v20 = vrot.slane %v8127_v25, 1 }
 0x256   : > { %5753 = vmatprep.subr.bf16.mxu1 %v9437_v9  ;;  %v2252_v0 = vadd.f32 %v7815_v39, %v2213_v18  ;;  %v1896_v19 = vpop.f32.mrb[148].mxu1 }
 0x257   : > { %v8264_v29 = vld [vmem:[#allocation2 + $0x110] sm:$0xff]  ;;  %v8267_v56 = vld [vmem:[#allocation2 + $0x118] sm:$0x3]  ;;  %v2175_v47 = vadd.f32 %v2117_v61, %v7784_v28  ;;  %v2122_v11 = vadd.f32 %v8165_v26, %v1896_v19  ;;  %v1898_v18 = vpop.f32.mrb[149].mxu1  ;;  %v2720_v28 = vld [vmem:[#allocation3 + $0xd0] sm:$0xff]  ;;  %v8288_v46 = vsel %vm394_vm1, %v2510_v23, %v2511_v20  ;;  %v2513_v26 = vrot.slane %v8130_v49, 1 }
 0x258   : > { %2933 = vmatmul.mubr.f32.gmra.mrb[152].mxu0 %v8082_v10  ;;  %9565 = vst [vmem:[#allocation36_spill] sm:$0xff] %v8264_v29  ;;  %v2638_v10 = vrot.slane %v8264_v29, 2  ;;  %v2640_v53 = vrot.slane %v8267_v56, 2  ;;  %v2284_v63 = vmax.f32 %v2252_v0, 0.0  ;;  %v2721_v61 = vld [vmem:[#allocation3 + $0xd8] sm:$0xff]  ;;  %9567 = vst [vmem:[#allocation42_spill] sm:$0xff] %v8288_v46 }
 0x259   : > { %2937 = vmatprep.mubr.f32.mxu0 %v8262_v58  ;;  %5755 = vmatpush1.bf16.msra.mxu1 %v5754_v5  ;;  %v2214_v40 = vmul.f32 %v7807_v15, %v2175_v47  ;;  %v8295_v0 = vld [vmem:[#allocation2 + $0x120] sm:$0xff]  ;;  %v5760_v47 = vpack.c.bf16 %v2721_v61, %v2720_v28  ;;  %v2723_v19 = vld [vmem:[#allocation3 + $0xe8] sm:$0xff]  ;;  %v2515_v61 = vrot.slane %v8163_v60, 1 }
 0x25a   : > { %v8279_v32 = vsel %vm507_vm0, %v2637_v42, %v2638_v10  ;;  %5756 = vmatprep.subr.bf16.mxu1 %v9437_v9  ;;  %v8285_v5 = vsel %vm507_vm0, %v2638_v10, %v2640_v53  ;;  %2360 = vst [vmem:[#allocation2 + $0x139] sm:$0xff] %v2284_v63  ;;  %v2176_v42 = vadd.f32 %v2122_v11, %v7792_v14  ;;  %9568 = vst [vmem:[#allocation47_spill] sm:$0xff] %v8295_v0 }
 0x25b   : > { %5222 = vmatprep.mubr.f32.mxu1 %v8279_v32  ;;  %9566 = vst [vmem:[#allocation41_spill] sm:$0xff] %v8285_v5  ;;  %v2253_v24 = vadd.f32 %v7815_v39, %v2214_v40  ;;  %v2722_v39 = vld [vmem:[#allocation3 + $0xe0] sm:$0xff]  ;;  %v8302_v14 = vsel %vm394_vm1, %v2511_v20, %v2513_v26  ;;  %v8304_v63 = vld [vmem:[#allocation2 + $0x128] sm:$0xff] }
 0x25c   : > { %2938 = vmatmul.mubr.f32.gmra.mrb[154].mxu0 %v8084_v44  ;;  %5223 = vmatmul.mubr.f32.gmra.mrb[180].mxu1 %v8285_v5  ;;  %v1901_v44 = vpop.f32.mrb[150].mxu1  ;;  %v2215_v23 = vmul.f32 %v7807_v15, %v2176_v42  ;;  %v8307_v40 = vld [vmem:[#allocation2 + $0x130] sm:$0x3]  ;;  %v2516_v15 = vrot.slane %v8176_v2, 1  ;;  %v2643_v20 = vrot.slane %v8304_v63, 2  ;;  %v5763_v26 = vpack.c.bf16 %v2723_v19, %v2722_v39 }
 0x25d   : > { %2942 = vmatprep.mubr.f32.mxu0 %v8288_v46  ;;  %5758 = vmatpush1.bf16.msra.mxu1 %v5757_v45  ;;  %v2285_v10 = vmax.f32 %v2253_v24, 0.0  ;;  %v2127_v53 = vadd.f32 %v8158_v1, %v1901_v44  ;;  %v1903_v49 = vpop.f32.mrb[151].mxu1  ;;  %v2642_v45 = vrot.slane %v8295_v0, 2  ;;  %v8313_v1 = vld [vmem:[%s9216_s3] ss:$0 sm:$0xff]  ;;  %v2645_v18 = vrot.slane %v8307_v40, 2 }
 0x25e   : > { %5759 = vmatprep.subr.bf16.mxu1 %v9437_v9  ;;  %v2254_v11 = vadd.f32 %v8313_v1, %v2215_v23  ;;  %v1906_v28 = vpop.f32.mrb[152].mxu1  ;;  %v8324_v42 = vld [vmem:[%s9215_s2] ss:$0 sm:$0xff]  ;;  %v2725_v49 = vld [vmem:[#allocation3 + $0xf8] sm:$0xff]  ;;  %v8338_v39 = vsel %vm394_vm1, %v2515_v61, %v2516_v15  ;;  %v3758_v19 = vld [vmem:[#allocation3 + $0x400] sm:$0xff] }
 0x25f   : > { %2361 = vst [vmem:[#allocation2 + $0x141] sm:$0xff] %v2285_v10  ;;  %v8329_v10 = vsel %vm507_vm0, %v2642_v45, %v2643_v20  ;;  %v1908_v23 = vpop.f32.mrb[153].mxu1  ;;  %v3759_v45 = vld [vmem:[#allocation3 + $0x408] sm:$0xff] }
 0x260   : > { %2943 = vmatmul.mubr.f32.gmra.mrb[156].mxu0 %v8116_v48  ;;  %v2177_v48 = vadd.f32 %v2127_v53, %v7789_v6  ;;  %v2286_v24 = vmax.f32 %v2254_v11, 0.0  ;;  %v2132_v6 = vadd.f32 %v8190_v31, %v1906_v28  ;;  %9569 = vst [vmem:[#allocation48_spill] sm:$0xff] %v8329_v10  ;;  %v2724_v53 = vld [vmem:[#allocation3 + $0xf0] sm:$0xff]  ;;  %5225 = vmatprep.mubr.f32.mxu1 %v8329_v10  ;;  %v2518_v31 = vrot.slane %v8179_v52, 1 }
 0x261   : > { %2947 = vmatprep.mubr.f32.mxu0 %v8302_v14  ;;  %5761 = vmatpush1.bf16.msra.mxu1 %v5760_v47  ;;  %v8335_v47 = vsel %vm507_vm0, %v2643_v20, %v2645_v18  ;;  %v1911_v20 = vpop.f32.mrb[154].mxu1  ;;  %v5766_v18 = vpack.c.bf16 %v2725_v49, %v2724_v53  ;;  %v2521_v53 = vrot.slane %v8224_v57, 1  ;;  %v9571_v49 = vld [vmem:[#allocation51_spill] sm:$0xff] }
 0x262   : > { %v2216_v44 = vmul.f32 %v8324_v42, %v2177_v48  ;;  %5762 = vmatprep.subr.bf16.mxu1 %v9437_v9  ;;  %9570 = vst [vmem:[#allocation53_spill] sm:$0xff] %v8335_v47  ;;  %2362 = vst [vmem:[#allocation2 + $0x151] sm:$0xff] %v2286_v24  ;;  %v2178_v48 = vadd.f32 %v2132_v6, %v7796_v4  ;;  %5226 = vmatmul.mubr.f32.gmra.mrb[182].mxu1 %v8335_v47  ;;  %v1913_v23 = vpop.f32.mrb[155].mxu1 }
 0x263   : > { %v2137_v52 = vadd.f32 %v8182_v30, %v1911_v20  ;;  %v8350_v24 = vpack.c.bf16 %v3759_v45, %v3758_v19  ;;  %v8354_v4 = vsel %vm394_vm1, %v2516_v15, %v2518_v31  ;;  %v2520_v45 = vrot.slane %v8213_v33, 1 }
 0x264   : > { %2948 = vmatmul.mubr.f32.gmra.mrb[158].mxu0 %v8127_v25  ;;  %v2255_v11 = vadd.f32 %v8313_v1, %v2216_v44  ;;  %v8345_v25 = vld [vmem:[#allocation2 + $0x138] sm:$0xff]  ;;  %v2217_v61 = vmul.f32 %v8324_v42, %v2178_v48 }
 0x265   : > { %2952 = vmatprep.mubr.f32.mxu0 %v8338_v39  ;;  %5764 = vmatpush1.bf16.msra.mxu1 %v5763_v26  ;;  %v2647_v26 = vrot.slane %v8345_v25, 2  ;;  %v1916_v31 = vpop.f32.mrb[156].mxu1 }
 0x266   : > { %v2287_v28 = vmax.f32 %v2255_v11, 0.0  ;;  %5765 = vmatprep.subr.bf16.mxu1 %v9437_v9  ;;  %v8356_v44 = vld [vmem:[#allocation2 + $0x140] sm:$0xff]  ;;  %v8359_v6 = vld [vmem:[#allocation2 + $0x148] sm:$0x3]  ;;  %v2256_v30 = vadd.f32 %v8313_v1, %v2217_v61  ;;  %v2179_v11 = vadd.f32 %v2137_v52, %v9571_v49  ;;  %v2142_v23 = vadd.f32 %v8215_v36, %v1916_v31  ;;  %v1918_v61 = vpop.f32.mrb[157].mxu1 }
 0x267   : > { %v2648_v19 = vrot.slane %v8356_v44, 2  ;;  %v2650_v15 = vrot.slane %v8359_v6, 2 }
 0x268   : > { %2953 = vmatmul.mubr.f32.gmra.mrb[160].mxu0 %v8163_v60  ;;  %2363 = vst [vmem:[#allocation2 + $0x159] sm:$0xff] %v2287_v28  ;;  %v2288_v48 = vmax.f32 %v2256_v30, 0.0  ;;  %v2218_v20 = vmul.f32 %v8324_v42, %v2179_v11  ;;  %v2523_v30 = vrot.slane %v8227_v37, 1 }
 0x269   : > { %2957 = vmatprep.mubr.f32.mxu0 %v8354_v4  ;;  %5767 = vmatpush1.bf16.msra.mxu1 %v5766_v18  ;;  %v8371_v28 = vsel %vm507_vm0, %v2647_v26, %v2648_v19  ;;  %v8377_v52 = vsel %vm507_vm0, %v2648_v19, %v2650_v15  ;;  %v8380_v18 = vsel %vm394_vm1, %v2520_v45, %v2521_v53  ;;  %v9574_v26 = vld [vmem:[#allocation30_spill] sm:$0xff]  ;;  %v8387_v11 = vld [vmem:[#allocation2 + $0x150] sm:$0xff]  ;;  %v1921_v31 = vpop.f32.mrb[158].mxu1 }
 0x26a   : > { %9572 = vst [vmem:[#allocation54_spill] sm:$0xff] %v8371_v28  ;;  %5849 = vmatprep.subr.bf16.mxu1 %v8350_v24  ;;  %5228 = vmatprep.mubr.f32.mxu1 %v8371_v28  ;;  %9573 = vst [vmem:[#allocation57_spill] sm:$0xff] %v8377_v52  ;;  %v2257_v36 = vadd.f32 %v8313_v1, %v2218_v20  ;;  %v2180_v49 = vadd.f32 %v2142_v23, %v9574_v26  ;;  %v1923_v45 = vpop.f32.mrb[159].mxu1  ;;  %v2652_v20 = vrot.slane %v8387_v11, 2 }
 0x26b   : > { %2364 = vst [vmem:[#allocation2 + $0x169] sm:$0xff] %v2288_v48  ;;  %5229 = vmatmul.mubr.f32.gmra.mrb[184].mxu1 %v8377_v52  ;;  %v2147_v15 = vadd.f32 %v8207_v27, %v1921_v31  ;;  %v8393_v37 = vsel %vm394_vm1, %v2521_v53, %v2523_v30  ;;  %v2526_v26 = vrot.slane %v8264_v29, 1  ;;  %v2525_v30 = vrot.slane %v8255_v12, 1 }
 0x26c   : > { %2958 = vmatmul.mubr.f32.gmra.mrb[162].mxu0 %v8176_v2  ;;  %v2289_v61 = vmax.f32 %v2257_v36, 0.0  ;;  %v2219_v19 = vmul.f32 %v8324_v42, %v2180_v49  ;;  %9575 = vst [vmem:[#allocation58_spill] sm:$0xff] %v8393_v37  ;;  %v9576_v49 = vld [vmem:[#allocation55_spill] sm:$0xff] }
 0x26d   : > { %2962 = vmatprep.mubr.f32.mxu0 %v8380_v18  ;;  %v2181_v52 = vadd.f32 %v2147_v15, %v9576_v49  ;;  %v2528_v15 = vrot.slane %v8267_v56, 1  ;;  %v2531_v56 = vrot.slane %v8304_v63, 1 }
 0x26e   : > { %2365 = vst [vmem:[#allocation2 + $0x171] sm:$0xff] %v2289_v61  ;;  %v2258_v36 = vadd.f32 %v8313_v1, %v2219_v19  ;;  %v8417_v19 = vsel %vm394_vm1, %v2525_v30, %v2526_v26 }
 0x26f   : > { %v8395_v48 = vld [vmem:[#allocation2 + $0x158] sm:$0xff]  ;;  %v8398_v23 = vld [vmem:[#allocation2 + $0x160] sm:$0x3]  ;;  %v2220_v45 = vmul.f32 %v8324_v42, %v2181_v52  ;;  %9579 = vst [vmem:[#allocation55_spill] sm:$0xff] %v8417_v19 }
 0x270   : > { %2963 = vmatmul.mubr.f32.gmra.mrb[164].mxu0 %v8213_v33  ;;  %v2653_v27 = vrot.slane %v8395_v48, 2  ;;  %v2655_v53 = vrot.slane %v8398_v23, 2  ;;  %v2290_v31 = vmax.f32 %v2258_v36, 0.0 }
 0x271   : > { %2967 = vmatprep.mubr.f32.mxu0 %v8393_v37  ;;  %v2259_v36 = vadd.f32 %v8313_v1, %v2220_v45  ;;  %v3760_v37 = vld [vmem:[#allocation3 + $0x410] sm:$0xff] }
 0x272   : > { %v8409_v28 = vsel %vm507_vm0, %v2652_v20, %v2653_v27  ;;  %v8412_v61 = vsel %vm507_vm0, %v2653_v27, %v2655_v53  ;;  %2366 = vst [vmem:[#allocation2 + $0x181] sm:$0xff] %v2290_v31  ;;  %v8423_v42 = vld [vmem:[#allocation2 + $0x168] sm:$0xff]  ;;  %v8427_v20 = vsel %vm394_vm1, %v2526_v26, %v2528_v15  ;;  %v2530_v31 = vrot.slane %v8295_v0, 1 }
 0x273   : > { %9577 = vst [vmem:[#allocation51_spill] sm:$0xff] %v8409_v28  ;;  %9578 = vst [vmem:[#allocation30_spill] sm:$0xff] %v8412_v61  ;;  %5231 = vmatprep.mubr.f32.mxu1 %v8409_v28  ;;  %v2291_v52 = vmax.f32 %v2259_v36, 0.0  ;;  %v2657_v1 = vrot.slane %v8423_v42, 2  ;;  %v2533_v36 = vrot.slane %v8307_v40, 1 }
 0x274   : > { %2968 = vmatmul.mubr.f32.gmra.mrb[166].mxu0 %v8224_v57  ;;  %5232 = vmatmul.mubr.f32.gmra.mrb[186].mxu1 %v8412_v61  ;;  %9580 = vst [vmem:[#allocation74_spill] sm:$0xff] %v8427_v20  ;;  %v8448_v15 = vsel %vm394_vm1, %v2530_v31, %v2531_v56  ;;  %v2538_v57 = vrot.slane %v8359_v6, 1  ;;  %v3763_v6 = vld [vmem:[#allocation3 + $0x428] sm:$0xff] }
 0x275   : > { %2972 = vmatprep.mubr.f32.mxu0 %v8417_v19  ;;  %v8429_v49 = vld [vmem:[#allocation2 + $0x170] sm:$0xff]  ;;  %v8431_v27 = vld [vmem:[#allocation2 + $0x178] sm:$0x3]  ;;  %2367 = vst [vmem:[#allocation2 + $0x189] sm:$0xff] %v2291_v52  ;;  %9583 = vst [vmem:[#allocation77_spill] sm:$0xff] %v8448_v15  ;;  %v8465_v31 = vsel %vm394_vm1, %v2531_v56, %v2533_v36 }
 0x276   : > { %v2658_v53 = vrot.slane %v8429_v49, 2  ;;  %v2660_v30 = vrot.slane %v8431_v27, 2  ;;  %v8451_v52 = vld [vmem:[#allocation2] sm:$0xff]  ;;  %9587 = vst [vmem:[#allocation81_spill] sm:$0xff] %v8465_v31 }
 0x278   : > { %2973 = vmatmul.mubr.f32.gmra.mrb[168].mxu0 %v8255_v12  ;;  %v8440_v26 = vsel %vm507_vm0, %v2657_v1, %v2658_v53  ;;  %v8443_v45 = vsel %vm507_vm0, %v2658_v53, %v2660_v30  ;;  %v2470_v53 = vrot.slane %v8451_v52, 1  ;;  %v8458_v30 = vld [vmem:[#allocation2 + $0x8] sm:$0xff] }
 0x279   : > { %2977 = vmatprep.mubr.f32.mxu0 %v8427_v20  ;;  %9581 = vst [vmem:[#allocation75_spill] sm:$0xff] %v8440_v26  ;;  %9582 = vst [vmem:[#allocation76_spill] sm:$0xff] %v8443_v45  ;;  %5234 = vmatprep.mubr.f32.mxu1 %v8440_v26  ;;  %v8455_v1 = vld [vmem:[#allocation2 + $0x180] sm:$0xff]  ;;  %v8461_v20 = vrot.slane %v8458_v30, 1 }
 0x27a   : > { %5235 = vmatmul.mubr.f32.gmra.mrb[188].mxu1 %v8443_v45  ;;  %9584 = vst [vmem:[#allocation78_spill] sm:$0xff] %v8455_v1  ;;  %9585 = vst [vmem:[#allocation79_spill] sm:$0xff] %v8458_v30  ;;  %v8472_v45 = vld [vmem:[#allocation2 + $0x10] sm:$0x3]  ;;  %v2752_v26 = vrot.slane %v8455_v1, 2 }
 0x27b   : > { %9586 = vst [vmem:[#allocation80_spill] sm:$0xff] %v8461_v20  ;;  %v2472_v19 = vsel %vm394_vm1, %v2470_v53, %v8461_v20  ;;  %v2473_v28 = vrot.slane %v8472_v45, 1 }
 0x27c   : > { %2978 = vmatmul.mubr.f32.gmra.mrb[170].mxu0 %v8264_v29  ;;  %v8467_v40 = vld [vmem:[#allocation2 + $0x188] sm:$0xff]  ;;  %v8469_v29 = vld [vmem:[#allocation2 + $0x190] sm:$0x3] }
 0x27d   : > { %2982 = vmatprep.mubr.f32.mxu0 %v8448_v15  ;;  %9588 = vst [vmem:[#allocation82_spill] sm:$0xff] %v8467_v40  ;;  %v2536_v15 = vrot.slane %v8356_v44, 1  ;;  %v2753_v12 = vrot.slane %v8467_v40, 2  ;;  %v2755_v61 = vrot.slane %v8469_v29, 2 }
 0x27f   : > { %v8480_v56 = vsel %vm507_vm0, %v2752_v26, %v2753_v12  ;;  %v8483_v36 = vsel %vm507_vm0, %v2753_v12, %v2755_v61  ;;  %v3761_v26 = vld [vmem:[#allocation3 + $0x418] sm:$0xff]  ;;  %v2474_v12 = vsel %vm394_vm1, %v8461_v20, %v2473_v28  ;;  %v8500_v53 = vsel %vm394_vm1, %v2536_v15, %v2538_v57  ;;  %v5971_v20 = vld [vmem:[#allocation2 + $0x20] sm:$0xff] }
 0x280   : > { %2983 = vmatmul.mubr.f32.gmra.mrb[172].mxu0 %v8295_v0  ;;  %v2535_v0 = vrot.slane %v8345_v25, 1  ;;  %9589 = vst [vmem:[#allocation83_spill] sm:$0xff] %v8480_v56  ;;  %9590 = vst [vmem:[#allocation84_spill] sm:$0xff] %v8483_v36  ;;  %5237 = vmatprep.mubr.f32.mxu1 %v8480_v56  ;;  %v5852_v61 = vpack.c.bf16 %v3761_v26, %v3760_v37  ;;  %v3762_v56 = vld [vmem:[#allocation3 + $0x420] sm:$0xff]  ;;  %v2543_v37 = vrot.slane %v8398_v23, 1  ;;  %v3765_v26 = vld [vmem:[#allocation3 + $0x438] sm:$0xff] }
 0x281   : > { %2987 = vmatprep.mubr.f32.mxu0 %v8465_v31  ;;  %5238 = vmatmul.mubr.f32.gmra.mrb[190].mxu1 %v8483_v36  ;;  %v5856_v28 = vpack.c.bf16 %v3763_v6, %v3762_v56  ;;  %v3766_v6 = vld [vmem:[#allocation3 + $0x440] sm:$0xff]  ;;  %v3767_v23 = vld [vmem:[#allocation3 + $0x448] sm:$0xff]  ;;  %v8560_v36 = vld [vmem:[#allocation2 + $0x48] sm:$0xff] }
 0x282   : > { %v8491_v31 = vsel %vm394_vm1, %v2535_v0, %v2536_v15  ;;  %3322 = vmatprep.mubr.f32.mxu1 %v2472_v19  ;;  %v2541_v0 = vrot.slane %v8395_v48, 1  ;;  %v2540_v19 = vrot.slane %v8387_v11, 1  ;;  %v3764_v15 = vld [vmem:[#allocation3 + $0x430] sm:$0xff] }
 0x284   : > { %2988 = vmatmul.mubr.f32.gmra.mrb[174].mxu0 %v8304_v63  ;;  %v8509_v57 = vsel %vm394_vm1, %v2540_v19, %v2541_v0  ;;  %v8517_v56 = vsel %vm394_vm1, %v2541_v0, %v2543_v37  ;;  %v5970_v19 = vld [vmem:[#allocation2 + $0x18] sm:$0xff]  ;;  %v2548_v37 = vrot.slane %v8431_v27, 1 }
 0x285   : > { %2992 = vmatprep.mubr.f32.mxu0 %v8491_v31  ;;  %3323 = vmatmul.mubr.f32.vlgmr.msra.gmra.mrb[192].mxu1 %v8451_v52  ;;  %v3771_v27 = vld [vmem:[#allocation3 + $0x468] sm:$0xff] }
 0x286   : > { %3327 = vmatprep.mubr.f32.mxu1 %v2474_v12  ;;  %5851 = vmatpush3.bf16.msra.mxu1 %v8350_v24  ;;  %v5860_v24 = vpack.c.bf16 %v3765_v26, %v3764_v15  ;;  %v2546_v12 = vrot.slane %v8429_v49, 1  ;;  %v3768_v15 = vld [vmem:[#allocation3 + $0x450] sm:$0xff]  ;;  %v3769_v26 = vld [vmem:[#allocation3 + $0x458] sm:$0xff] }
 0x287   : > { %5853 = vmatprep.subr.bf16.mxu1 %v5852_v61 }
 0x288   : > { %2993 = vmatmul.mubr.f32.gmra.mrb[176].mxu0 %v8345_v25 }
 0x289   : > { %2997 = vmatprep.mubr.f32.mxu0 %v8500_v53  ;;  %3328 = vmatmul.mubr.f32.gmra.mrb[194].mxu1 %v8458_v30 }
 0x28a   : > { %3332 = vmatprep.mubr.f32.mxu1 %v7891_v35  ;;  %5855 = vmatpush3.bf16.msra.mxu1 %v5852_v61  ;;  %v2545_v35 = vrot.slane %v8423_v42, 1  ;;  %v5864_v61 = vpack.c.bf16 %v3767_v23, %v3766_v6  ;;  %v2746_v6 = vrot.slane %v8467_v40, 1  ;;  %v3770_v23 = vld [vmem:[#allocation3 + $0x460] sm:$0xff] }
 0x28b   : > { %5857 = vmatprep.subr.bf16.mxu1 %v5856_v28 }
 0x28c   : > { %2998 = vmatmul.mubr.f32.gmra.mrb[178].mxu0 %v8356_v44  ;;  %v8525_v0 = vsel %vm394_vm1, %v2545_v35, %v2546_v12  ;;  %v2748_v35 = vrot.slane %v8469_v29, 1 }
 0x28d   : > { %3002 = vmatprep.mubr.f32.mxu0 %v8509_v57  ;;  %3333 = vmatmul.mubr.f32.gmra.mrb[196].mxu1 %v5970_v19  ;;  %v8535_v19 = vld [vmem:[#allocation2 + $0x30] sm:$0xff] }
 0x28e   : > { %3337 = vmatprep.mubr.f32.mxu1 %v7897_v22  ;;  %5859 = vmatpush3.bf16.msra.mxu1 %v5856_v28  ;;  %v5868_v22 = vpack.c.bf16 %v3769_v26, %v3768_v15  ;;  %v8532_v28 = vsel %vm394_vm1, %v2546_v12, %v2548_v37  ;;  %v3772_v37 = vld [vmem:[#allocation3 + $0x470] sm:$0xff]  ;;  %v3773_v15 = vld [vmem:[#allocation3 + $0x478] sm:$0xff]  ;;  %v8546_v26 = vld [vmem:[#allocation2 + $0x38] sm:$0xff]  ;;  %v8557_v29 = vsel %vm394_vm1, %v2746_v6, %v2748_v35 }
 0x28f   : > { %5861 = vmatprep.subr.bf16.mxu1 %v5860_v24  ;;  %9593 = vst [vmem:[#allocation87_spill] sm:$0xff] %v8557_v29 }
 0x290   : > { %3003 = vmatmul.mubr.f32.gmra.mrb[180].mxu0 %v8387_v11 }
 0x291   : > { %3007 = vmatprep.mubr.f32.mxu0 %v8517_v56  ;;  %3338 = vmatmul.mubr.f32.gmra.mrb[198].mxu1 %v5971_v20  ;;  %v2745_v20 = vrot.slane %v8455_v1, 1 }
 0x292   : > { %3342 = vmatprep.mubr.f32.mxu1 %v7950_v55  ;;  %5863 = vmatpush3.bf16.msra.mxu1 %v5860_v24  ;;  %v5872_v24 = vpack.c.bf16 %v3771_v27, %v3770_v23  ;;  %v8553_v23 = vrot.slane %v8458_v30, 2  ;;  %v5876_v27 = vpack.c.bf16 %v3773_v15, %v3772_v37  ;;  %v3727_v37 = vld [vmem:[#allocation3 + $0x308] sm:$0xff]  ;;  %v3728_v15 = vld [vmem:[#allocation3 + $0x310] sm:$0xff] }
 0x293   : > { %5865 = vmatprep.subr.bf16.mxu1 %v5864_v61  ;;  %v8543_v12 = vsel %vm394_vm1, %v2745_v20, %v2746_v6  ;;  %v2585_v20 = vrot.slane %v8472_v45, 2  ;;  %v8568_v6 = vld [vmem:[#allocation2 + $0x50] sm:$0xff]  ;;  %v3731_v30 = vld [vmem:[#allocation3 + $0x328] sm:$0xff] }
 0x294   : > { %3008 = vmatmul.mubr.f32.gmra.mrb[182].mxu0 %v8395_v48  ;;  %9591 = vst [vmem:[#allocation85_spill] sm:$0xff] %v8543_v12  ;;  %9592 = vst [vmem:[#allocation86_spill] sm:$0xff] %v8553_v23 }
 0x295   : > { %3012 = vmatprep.mubr.f32.mxu0 %v8525_v0  ;;  %3343 = vmatmul.mubr.f32.gmra.mrb[200].mxu1 %v8535_v19  ;;  %v2586_v45 = vsel %vm507_vm0, %v8553_v23, %v2585_v20  ;;  %v3730_v20 = vld [vmem:[#allocation3 + $0x320] sm:$0xff] }
 0x296   : > { %3347 = vmatprep.mubr.f32.mxu1 %v7984_v43  ;;  %5867 = vmatpush3.bf16.msra.mxu1 %v5864_v61  ;;  %v2582_v61 = vrot.slane %v8451_v52, 2 }
 0x297   : > { %5869 = vmatprep.subr.bf16.mxu1 %v5868_v22 }
 0x298   : > { %3013 = vmatmul.mubr.f32.gmra.mrb[184].mxu0 %v8423_v42  ;;  %v2584_v52 = vsel %vm507_vm0, %v2582_v61, %v8553_v23  ;;  %v3729_v61 = vld [vmem:[#allocation3 + $0x318] sm:$0xff]  ;;  %v8602_v23 = vld [vmem:[#allocation2 + $0x90] sm:$0xff] }
 0x299   : > { %3017 = vmatprep.mubr.f32.mxu0 %v8532_v28  ;;  %3348 = vmatmul.mubr.f32.gmra.mrb[202].mxu1 %v8546_v26 }
 0x29a   : > { %3352 = vmatprep.mubr.f32.mxu1 %v8020_v21  ;;  %5871 = vmatpush3.bf16.msra.mxu1 %v5868_v22  ;;  %v3726_v22 = vld [vmem:[#allocation3 + $0x300] sm:$0xff] }
 0x29b   : > { %5873 = vmatprep.subr.bf16.mxu1 %v5872_v24  ;;  %v5801_v35 = vpack.c.bf16 %v3727_v37, %v3726_v22  ;;  %v9595_v22 = vld [vmem:[#allocation9_spill] sm:$0xff]  ;;  %v3732_v37 = vld [vmem:[#allocation3 + $0x330] sm:$0xff] }
 0x29c   : > { %3018 = vmatmul.mubr.f32.gmra.mrb[186].mxu0 %v8429_v49 }
 0x29d   : > { %3022 = vmatprep.mubr.f32.mxu0 %v8543_v12  ;;  %3353 = vmatmul.mubr.f32.gmra.mrb[204].mxu1 %v8560_v36 }
 0x29e   : > { %3357 = vmatprep.mubr.f32.mxu1 %v8044_v54  ;;  %5875 = vmatpush3.bf16.msra.mxu1 %v5872_v24  ;;  %v8574_v24 = vld [vmem:[#allocation2 + $0x60] sm:$0xff] }
 0x29f   : > { %5877 = vmatprep.subr.bf16.mxu1 %v5876_v27 }
 0x2a0   : > { %3023 = vmatmul.mubr.f32.gmra.mrb[188].mxu0 %v8455_v1  ;;  %v9599_v1 = vld [vmem:[#allocation14_spill] sm:$0xff] }
 0x2a1   : > { %3027 = vmatprep.mubr.f32.mxu0 %v8557_v29  ;;  %3358 = vmatmul.mubr.f32.gmra.mrb[206].mxu1 %v8568_v6  ;;  %v8595_v29 = vld [vmem:[#allocation2 + $0x80] sm:$0xff] }
 0x2a2   : > { %3362 = vmatprep.mubr.f32.mxu1 %v8090_v7  ;;  %5879 = vmatpush3.bf16.msra.mxu1 %v5876_v27  ;;  %v8581_v27 = vld [vmem:[#allocation2 + $0x68] sm:$0xff] }
 0x2a4   : > { %3028 = vmatmul.mubr.f32.gmra.mrb[190].mxu0 %v8467_v40  ;;  %v9594_v40 = vld [vmem:[#allocation31_spill] sm:$0xff] }
 0x2a5   : > { %5272 = vmatprep.mubr.f32.mxu0 %v2584_v52  ;;  %3363 = vmatmul.mubr.f32.gmra.mrb[208].mxu1 %v8574_v24  ;;  %v5804_v52 = vpack.c.bf16 %v3729_v61, %v3728_v15  ;;  %v8588_v15 = vld [vmem:[#allocation2 + $0x78] sm:$0xff] }
 0x2a6   : > { %3367 = vmatprep.mubr.f32.mxu1 %v8125_v50 }
 0x2a8   : > { %5273 = vmatmul.mubr.f32.vlgmr.msra.gmra.mrb[192].mxu0 %v2586_v45  ;;  %v3733_v45 = vld [vmem:[#allocation3 + $0x338] sm:$0xff] }
 0x2a9   : > { %5275 = vmatprep.mubr.f32.mxu0 %v7911_v62  ;;  %5802 = vmatpush1.bf16.msra.mxu0 %v5801_v35  ;;  %v5807_v62 = vpack.c.bf16 %v3731_v30, %v3730_v20  ;;  %v9596_v35 = vld [vmem:[#allocation11_spill] sm:$0xff]  ;;  %v5810_v61 = vpack.c.bf16 %v3733_v45, %v3732_v37  ;;  %v3735_v30 = vld [vmem:[#allocation3 + $0x348] sm:$0xff]  ;;  %v9598_v20 = vld [vmem:[#allocation13_spill] sm:$0xff] }
 0x2aa   : > { %5803 = vmatprep.subr.bf16.mxu0 %v9437_v9  ;;  %3368 = vmatmul.mubr.f32.gmra.mrb[210].mxu1 %v8581_v27  ;;  %v3737_v37 = vld [vmem:[#allocation3 + $0x358] sm:$0xff]  ;;  %v9600_v45 = vld [vmem:[#allocation15_spill] sm:$0xff] }
 0x2ab   : > { %3372 = vmatprep.mubr.f32.mxu1 %v8155_v34 }
 0x2ac   : > { %5276 = vmatmul.mubr.f32.gmra.mrb[194].mxu0 %v9594_v40  ;;  %v9597_v40 = vld [vmem:[#allocation12_spill] sm:$0xff] }
 0x2ad   : > { %5278 = vmatprep.mubr.f32.mxu0 %v9595_v22  ;;  %5805 = vmatpush1.bf16.msra.mxu0 %v5804_v52  ;;  %v3734_v52 = vld [vmem:[#allocation3 + $0x340] sm:$0xff] }
 0x2ae   : > { %5806 = vmatprep.subr.bf16.mxu0 %v9437_v9  ;;  %3373 = vmatmul.mubr.f32.gmra.mrb[212].mxu1 %v8588_v15  ;;  %v5813_v12 = vpack.c.bf16 %v3735_v30, %v3734_v52  ;;  %v3739_v52 = vld [vmem:[#allocation3 + $0x368] sm:$0xff] }
 0x2af   : > { %3377 = vmatprep.mubr.f32.mxu1 %v8174_v41  ;;  %v8609_v30 = vld [vmem:[#allocation2 + $0x98] sm:$0xff] }
 0x2b0   : > { %5279 = vmatmul.mubr.f32.gmra.mrb[196].mxu0 %v9596_v35 }
 0x2b1   : > { %5281 = vmatprep.mubr.f32.mxu0 %v9597_v40  ;;  %5808 = vmatpush1.bf16.msra.mxu0 %v5807_v62  ;;  %v3736_v62 = vld [vmem:[#allocation3 + $0x350] sm:$0xff] }
 0x2b2   : > { %5809 = vmatprep.subr.bf16.mxu0 %v9437_v9  ;;  %3378 = vmatmul.mubr.f32.gmra.mrb[214].mxu1 %v8595_v29 }
 0x2b3   : > { %3382 = vmatprep.mubr.f32.mxu1 %v8204_v17 }
 0x2b4   : > { %5282 = vmatmul.mubr.f32.gmra.mrb[198].mxu0 %v9598_v20  ;;  %v9601_v20 = vld [vmem:[#allocation16_spill] sm:$0xff] }
 0x2b5   : > { %5284 = vmatprep.mubr.f32.mxu0 %v9599_v1  ;;  %5811 = vmatpush1.bf16.msra.mxu0 %v5810_v61  ;;  %v5816_v1 = vpack.c.bf16 %v3737_v37, %v3736_v62  ;;  %v3738_v61 = vld [vmem:[#allocation3 + $0x360] sm:$0xff]  ;;  %v3741_v62 = vld [vmem:[#allocation3 + $0x378] sm:$0xff]  ;;  %v9602_v37 = vld [vmem:[#allocation19_spill] sm:$0xff] }
 0x2b6   : > { %5812 = vmatprep.subr.bf16.mxu0 %v9437_v9  ;;  %3383 = vmatmul.mubr.f32.gmra.mrb[216].mxu1 %v8602_v23 }
 0x2b7   : > { %3387 = vmatprep.mubr.f32.mxu1 %v8222_v59 }
 0x2b8   : > { %5285 = vmatmul.mubr.f32.gmra.mrb[200].mxu0 %v9600_v45  ;;  %v8616_v45 = vld [vmem:[#allocation2 + $0xa8] sm:$0xff] }
 0x2b9   : > { %5287 = vmatprep.mubr.f32.mxu0 %v9601_v20  ;;  %5814 = vmatpush1.bf16.msra.mxu0 %v5813_v12  ;;  %v5819_v20 = vpack.c.bf16 %v3739_v52, %v3738_v61  ;;  %v3740_v12 = vld [vmem:[#allocation3 + $0x370] sm:$0xff]  ;;  %v3743_v61 = vld [vmem:[#allocation3 + $0x388] sm:$0xff]  ;;  %v8623_v52 = vld [vmem:[#allocation2 + $0xb0] sm:$0xff] }
 0x2ba   : > { %5815 = vmatprep.subr.bf16.mxu0 %v9437_v9  ;;  %3388 = vmatmul.mubr.f32.gmra.mrb[218].mxu1 %v8609_v30 }
 0x2bb   : > { %3392 = vmatprep.mubr.f32.mxu1 %v8248_v38 }
 0x2bc   : > { %5288 = vmatmul.mubr.f32.gmra.mrb[202].mxu0 %v8041_v51  ;;  %v9603_v51 = vld [vmem:[#allocation20_spill] sm:$0xff] }
 0x2bd   : > { %5290 = vmatprep.mubr.f32.mxu0 %v8069_v3  ;;  %5817 = vmatpush1.bf16.msra.mxu0 %v5816_v1  ;;  %v5822_v3 = vpack.c.bf16 %v3741_v62, %v3740_v12  ;;  %v3742_v1 = vld [vmem:[#allocation3 + $0x380] sm:$0xff]  ;;  %v3745_v12 = vld [vmem:[#allocation3 + $0x398] sm:$0xff]  ;;  %v9605_v62 = vld [vmem:[#allocation23_spill] sm:$0xff] }
 0x2be   : > { %5818 = vmatprep.subr.bf16.mxu0 %v9437_v9  ;;  %3393 = vmatmul.mubr.f32.gmra.mrb[220].mxu1 %v8616_v45 }
 0x2bf   : > { %3397 = vmatprep.mubr.f32.mxu1 %v8262_v58  ;;  %v8630_v58 = vld [vmem:[#allocation2 + $0xc0] sm:$0xff] }
 0x2c0   : > { %5291 = vmatmul.mubr.f32.gmra.mrb[204].mxu0 %v9602_v37  ;;  %v9604_v37 = vld [vmem:[#allocation22_spill] sm:$0xff] }
 0x2c1   : > { %5293 = vmatprep.mubr.f32.mxu0 %v9603_v51  ;;  %5820 = vmatpush1.bf16.msra.mxu0 %v5819_v20  ;;  %v5825_v51 = vpack.c.bf16 %v3743_v61, %v3742_v1  ;;  %v3744_v20 = vld [vmem:[#allocation3 + $0x390] sm:$0xff]  ;;  %v3747_v1 = vld [vmem:[#allocation3 + $0x3a8] sm:$0xff]  ;;  %v9607_v61 = vld [vmem:[#allocation25_spill] sm:$0xff] }
 0x2c2   : > { %5821 = vmatprep.subr.bf16.mxu0 %v9437_v9  ;;  %3398 = vmatmul.mubr.f32.gmra.mrb[222].mxu1 %v8623_v52 }
 0x2c3   : > { %3402 = vmatprep.mubr.f32.mxu1 %v8288_v46  ;;  %v8637_v46 = vld [vmem:[#allocation2 + $0xc8] sm:$0xff] }
 0x2c4   : > { %5294 = vmatmul.mubr.f32.gmra.mrb[206].mxu0 %v8122_v16  ;;  %v9606_v16 = vld [vmem:[#allocation24_spill] sm:$0xff] }
 0x2c5   : > { %5296 = vmatprep.mubr.f32.mxu0 %v9604_v37  ;;  %5823 = vmatpush1.bf16.msra.mxu0 %v5822_v3  ;;  %v5828_v37 = vpack.c.bf16 %v3745_v12, %v3744_v20  ;;  %v3746_v3 = vld [vmem:[#allocation3 + $0x3a0] sm:$0xff]  ;;  %v3749_v20 = vld [vmem:[#allocation3 + $0x3b8] sm:$0xff] }
 0x2c6   : > { %5824 = vmatprep.subr.bf16.mxu0 %v9437_v9  ;;  %3403 = vmatmul.mubr.f32.gmra.mrb[224].mxu1 %v8630_v58 }
 0x2c7   : > { %3407 = vmatprep.mubr.f32.mxu1 %v8302_v14 }
 0x2c8   : > { %5297 = vmatmul.mubr.f32.gmra.mrb[208].mxu0 %v9605_v62 }
 0x2c9   : > { %5299 = vmatprep.mubr.f32.mxu0 %v9606_v16  ;;  %5826 = vmatpush1.bf16.msra.mxu0 %v5825_v51  ;;  %v5831_v16 = vpack.c.bf16 %v3747_v1, %v3746_v3  ;;  %v3748_v51 = vld [vmem:[#allocation3 + $0x3b0] sm:$0xff]  ;;  %v3753_v3 = vld [vmem:[#allocation3 + $0x3d8] sm:$0xff]  ;;  %v9609_v1 = vld [vmem:[#allocation58_spill] sm:$0xff] }
 0x2ca   : > { %5827 = vmatprep.subr.bf16.mxu0 %v9437_v9  ;;  %3408 = vmatmul.mubr.f32.gmra.mrb[226].mxu1 %v8637_v46  ;;  %v5834_v12 = vpack.c.bf16 %v3749_v20, %v3748_v51  ;;  %v3754_v51 = vld [vmem:[#allocation3 + $0x3e0] sm:$0xff]  ;;  %v3755_v20 = vld [vmem:[#allocation3 + $0x3e8] sm:$0xff] }
 0x2cb   : > { %3412 = vmatprep.mubr.f32.mxu1 %v8338_v39 }
 0x2cc   : > { %5300 = vmatmul.mubr.f32.gmra.mrb[210].mxu0 %v9607_v61  ;;  %v3751_v61 = vld [vmem:[#allocation3 + $0x3c8] sm:$0xff] }
 0x2cd   : > { %5302 = vmatprep.mubr.f32.mxu0 %v8239_v8  ;;  %5829 = vmatpush1.bf16.msra.mxu0 %v5828_v37  ;;  %v3750_v8 = vld [vmem:[#allocation3 + $0x3c0] sm:$0xff]  ;;  %v3752_v37 = vld [vmem:[#allocation3 + $0x3d0] sm:$0xff] }
 0x2ce   : > { %5830 = vmatprep.subr.bf16.mxu0 %v9437_v9  ;;  %3413 = vmatmul.mubr.f32.gmra.mrb[228].mxu1 %v8163_v60  ;;  %v5837_v60 = vpack.c.bf16 %v3751_v61, %v3750_v8  ;;  %v9611_v8 = vld [vmem:[#allocation26_spill] sm:$0xff]  ;;  %v9612_v61 = vld [vmem:[#allocation51_spill] sm:$0xff] }
 0x2cf   : > { %3417 = vmatprep.mubr.f32.mxu1 %v8354_v4 }
 0x2d0   : > { %5303 = vmatmul.mubr.f32.gmra.mrb[212].mxu0 %v8245_v13 }
 0x2d1   : > { %5305 = vmatprep.mubr.f32.mxu0 %v8279_v32  ;;  %5832 = vmatpush1.bf16.msra.mxu0 %v5831_v16  ;;  %v9608_v16 = vld [vmem:[#allocation54_spill] sm:$0xff] }
 0x2d2   : > { %5833 = vmatprep.subr.bf16.mxu0 %v9437_v9  ;;  %3418 = vmatmul.mubr.f32.gmra.mrb[230].mxu1 %v8176_v2  ;;  %v5840_v2 = vpack.c.bf16 %v3753_v3, %v3752_v37  ;;  %v9615_v37 = vld [vmem:[#allocation29_spill] sm:$0xff]  ;;  %v9616_v3 = vld [vmem:[#allocation75_spill] sm:$0xff] }
 0x2d3   : > { %3422 = vmatprep.mubr.f32.mxu1 %v8380_v18 }
 0x2d4   : > { %5306 = vmatmul.mubr.f32.gmra.mrb[214].mxu0 %v8285_v5  ;;  %v9617_v5 = vld [vmem:[#allocation74_spill] sm:$0xff] }
 0x2d5   : > { %5308 = vmatprep.mubr.f32.mxu0 %v8329_v10  ;;  %5835 = vmatpush1.bf16.msra.mxu0 %v5834_v12  ;;  %v9610_v12 = vld [vmem:[#allocation57_spill] sm:$0xff]  ;;  %v9613_v10 = vld [vmem:[#allocation55_spill] sm:$0xff] }
 0x2d6   : > { %5836 = vmatprep.subr.bf16.mxu0 %v9437_v9  ;;  %3423 = vmatmul.mubr.f32.gmra.mrb[232].mxu1 %v8213_v33  ;;  %v5843_v33 = vpack.c.bf16 %v3755_v20, %v3754_v51  ;;  %v9620_v51 = vld [vmem:[#allocation77_spill] sm:$0xff]  ;;  %v9621_v20 = vld [vmem:[#allocation47_spill] sm:$0xff] }
 0x2d7   : > { %3427 = vmatprep.mubr.f32.mxu1 %v9609_v1 }
 0x2d8   : > { %5309 = vmatmul.mubr.f32.gmra.mrb[216].mxu0 %v8335_v47  ;;  %v3757_v47 = vld [vmem:[#allocation3 + $0x3f8] sm:$0xff] }
 0x2d9   : > { %5311 = vmatprep.mubr.f32.mxu0 %v9608_v16  ;;  %5838 = vmatpush1.bf16.msra.mxu0 %v5837_v60  ;;  %v3756_v16 = vld [vmem:[#allocation3 + $0x3f0] sm:$0xff]  ;;  %v9614_v60 = vld [vmem:[#allocation30_spill] sm:$0xff] }
 0x2da   : > { %5839 = vmatprep.subr.bf16.mxu0 %v9437_v9  ;;  %3428 = vmatmul.mubr.f32.gmra.mrb[234].mxu1 %v9611_v8  ;;  %v5846_v8 = vpack.c.bf16 %v3757_v47, %v3756_v16 }
 0x2db   : > { %3432 = vmatprep.mubr.f32.mxu1 %v9613_v10 }
 0x2dc   : > { %5312 = vmatmul.mubr.f32.gmra.mrb[218].mxu0 %v9610_v12 }
 0x2dd   : > { %5314 = vmatprep.mubr.f32.mxu0 %v9612_v61  ;;  %5841 = vmatpush1.bf16.msra.mxu0 %v5840_v2  ;;  %v9618_v61 = vld [vmem:[#allocation76_spill] sm:$0xff] }
 0x2de   : > { %5842 = vmatprep.subr.bf16.mxu0 %v9437_v9  ;;  %3433 = vmatmul.mubr.f32.gmra.mrb[236].mxu1 %v9615_v37  ;;  %v9619_v2 = vld [vmem:[#allocation36_spill] sm:$0xff]  ;;  %v9622_v37 = vld [vmem:[#allocation81_spill] sm:$0xff] }
 0x2df   : > { %3437 = vmatprep.mubr.f32.mxu1 %v9617_v5 }
 0x2e0   : > { %5315 = vmatmul.mubr.f32.gmra.mrb[220].mxu0 %v9614_v60 }
 0x2e1   : > { %5317 = vmatprep.mubr.f32.mxu0 %v9616_v3  ;;  %5844 = vmatpush1.bf16.msra.mxu0 %v5843_v33 }
 0x2e2   : > { %5845 = vmatprep.subr.bf16.mxu0 %v9437_v9  ;;  %3438 = vmatmul.mubr.f32.gmra.mrb[238].mxu1 %v9619_v2 }
 0x2e3   : > { %3442 = vmatprep.mubr.f32.mxu1 %v9620_v51 }
 0x2e4   : > { %5318 = vmatmul.mubr.f32.gmra.mrb[222].mxu0 %v9618_v61 }
 0x2e5   : > { %3838 = vmatprep.mubr.f32.mxu0 %v7950_v55  ;;  %5847 = vmatpush1.bf16.msra.mxu0 %v5846_v8 }
 0x2e6   : > { %3443 = vmatmul.mubr.f32.gmra.mrb[240].mxu1 %v9621_v20 }
 0x2e7   : > { %3447 = vmatprep.mubr.f32.mxu1 %v9622_v37 }
 0x2e8   : > { %3839 = vmatmul.mubr.f32.vlgmr.msra.gmra.mrb[224].mxu0 %v8535_v19 }
 0x2e9   : > { %3843 = vmatprep.mubr.f32.mxu0 %v7984_v43 }
 0x2ea   : > { %3448 = vmatmul.mubr.f32.gmra.mrb[242].mxu1 %v8304_v63 }
 0x2eb   : > { %3452 = vmatprep.mubr.f32.mxu1 %v8491_v31 }
 0x2ec   : > { %3844 = vmatmul.mubr.f32.gmra.mrb[226].mxu0 %v8546_v26 }
 0x2ed   : > { %3848 = vmatprep.mubr.f32.mxu0 %v8020_v21 }
 0x2ee   : > { %3453 = vmatmul.mubr.f32.gmra.mrb[244].mxu1 %v8345_v25 }
 0x2ef   : > { %3457 = vmatprep.mubr.f32.mxu1 %v8500_v53 }
 0x2f0   : > { %3849 = vmatmul.mubr.f32.gmra.mrb[228].mxu0 %v8560_v36 }
 0x2f1   : > { %3853 = vmatprep.mubr.f32.mxu0 %v8044_v54 }
 0x2f2   : > { %3458 = vmatmul.mubr.f32.gmra.mrb[246].mxu1 %v8356_v44 }
 0x2f3   : > { %3462 = vmatprep.mubr.f32.mxu1 %v8509_v57 }
 0x2f4   : > { %3854 = vmatmul.mubr.f32.gmra.mrb[230].mxu0 %v8568_v6 }
 0x2f5   : > { %3858 = vmatprep.mubr.f32.mxu0 %v8090_v7 }
 0x2f6   : > { %3463 = vmatmul.mubr.f32.gmra.mrb[248].mxu1 %v8387_v11  ;;  %v2874_v9 = vpop.f32.mrb[128].mxu0 }
 0x2f7   : > { %3467 = vmatprep.mubr.f32.mxu1 %v8517_v56  ;;  %v2876_v55 = vpop.f32.mrb[129].mxu0 }
 0x2f8   : > { %3859 = vmatmul.mubr.f32.gmra.mrb[232].mxu0 %v8574_v24 }
 0x2f9   : > { %3863 = vmatprep.mubr.f32.mxu0 %v8125_v50  ;;  %v5194_v43 = vpop.f32.mrb[160].mxu1 }
 0x2fa   : > { %3468 = vmatmul.mubr.f32.gmra.mrb[250].mxu1 %v8395_v48  ;;  %v3099_v21 = vpop.f32.mrb[161].mxu1  ;;  %v2879_v54 = vpop.f32.mrb[130].mxu0 }
 0x2fb   : > { %3472 = vmatprep.mubr.f32.mxu1 %v8525_v0  ;;  %v8696_v7 = vadd.f32 %v3099_v21, %v2874_v9  ;;  %v8698_v63 = vadd.f32 %v5194_v43, %v2879_v54  ;;  %v2881_v47 = vpop.f32.mrb[131].mxu0  ;;  %v9626_v9 = vld [vmem:[#allocation35_spill] sm:$0xff]  ;;  %v9628_v54 = vld [vmem:[#allocation17_spill] sm:$0xff] }
 0x2fc   : > { %3864 = vmatmul.mubr.f32.gmra.mrb[234].mxu0 %v8581_v27 }
 0x2fd   : > { %3868 = vmatprep.mubr.f32.mxu0 %v8155_v34  ;;  %v5197_v50 = vpop.f32.mrb[162].mxu1 }
 0x2fe   : > { %3473 = vmatmul.mubr.f32.gmra.mrb[252].mxu1 %v8423_v42  ;;  %v3109_v25 = vpop.f32.mrb[163].mxu1 }
 0x2ff   : > { %3477 = vmatprep.mubr.f32.mxu1 %v8532_v28  ;;  %v2884_v44 = vpop.f32.mrb[132].mxu0 }
 0x300   : > { %3869 = vmatmul.mubr.f32.gmra.mrb[236].mxu0 %v8588_v15  ;;  %v8704_v36 = vadd.f32 %v3109_v25, %v2884_v44  ;;  %v2886_v34 = vpop.f32.mrb[133].mxu0 }
 0x301   : > { %3873 = vmatprep.mubr.f32.mxu0 %v8174_v41 }
 0x302   : > { %3478 = vmatmul.mubr.f32.gmra.mrb[254].mxu1 %v8429_v49  ;;  %v5200_v19 = vpop.f32.mrb[164].mxu1 }
 0x303   : > { %5352 = vmatprep.mubr.f32.mxu1 %v9595_v22  ;;  %v3119_v26 = vpop.f32.mrb[165].mxu1  ;;  %v9623_v22 = vld [vmem:[#allocation13_spill] sm:$0xff] }
 0x304   : > { %3874 = vmatmul.mubr.f32.gmra.mrb[238].mxu0 %v8595_v29  ;;  %v2889_v6 = vpop.f32.mrb[134].mxu0 }
 0x305   : > { %3878 = vmatprep.mubr.f32.mxu0 %v8204_v17  ;;  %v8710_v24 = vadd.f32 %v5197_v50, %v2889_v6  ;;  %v2891_v27 = vpop.f32.mrb[135].mxu0  ;;  %v9629_v50 = vld [vmem:[#allocation42_spill] sm:$0xff] }
 0x306   : > { %5353 = vmatmul.mubr.f32.vlgmr.msra.gmra.mrb[0].mxu1 %v9596_v35  ;;  %v5203_v41 = vpop.f32.mrb[166].mxu1 }
 0x307   : > { %5355 = vmatprep.mubr.f32.mxu1 %v9597_v40  ;;  %v3129_v29 = vpop.f32.mrb[167].mxu1  ;;  %v9625_v40 = vld [vmem:[#allocation15_spill] sm:$0xff] }
 0x308   : > { %3879 = vmatmul.mubr.f32.gmra.mrb[240].mxu0 %v8602_v23  ;;  %v9624_v23 = vld [vmem:[#allocation14_spill] sm:$0xff] }
 0x309   : > { %3883 = vmatprep.mubr.f32.mxu0 %v8222_v59  ;;  %v2894_v15 = vpop.f32.mrb[136].mxu0 }
 0x30a   : > { %v8716_v16 = vadd.f32 %v3119_v26, %v2894_v15  ;;  %v2896_v17 = vpop.f32.mrb[137].mxu0  ;;  %5356 = vmatmul.mubr.f32.gmra.mrb[2].mxu1 %v9623_v22  ;;  %v9631_v26 = vld [vmem:[#allocation19_spill] sm:$0xff] }
 0x30b   : > { %5358 = vmatprep.mubr.f32.mxu1 %v9624_v23 }
 0x30c   : > { %3884 = vmatmul.mubr.f32.gmra.mrb[242].mxu0 %v8609_v30  ;;  %v5206_v33 = vpop.f32.mrb[168].mxu1  ;;  %v9627_v30 = vld [vmem:[#allocation16_spill] sm:$0xff] }
 0x30d   : > { %3888 = vmatprep.mubr.f32.mxu0 %v8248_v38  ;;  %v3139_v35 = vpop.f32.mrb[169].mxu1 }
 0x30e   : > { %v2899_v8 = vpop.f32.mrb[138].mxu0  ;;  %5359 = vmatmul.mubr.f32.gmra.mrb[4].mxu1 %v9625_v40  ;;  %v5986_v40 = vld [vmem:[#allocation2 + $0xd8] sm:$0xff] }
 0x30f   : > { %v8722_v2 = vadd.f32 %v5200_v19, %v2899_v8  ;;  %v2901_v59 = vpop.f32.mrb[139].mxu0  ;;  %5361 = vmatprep.mubr.f32.mxu1 %v9627_v30  ;;  %v5987_v30 = vld [vmem:[#allocation2 + $0xe0] sm:$0xff] }
 0x310   : > { %3889 = vmatmul.mubr.f32.gmra.mrb[244].mxu0 %v8616_v45  ;;  %v9630_v45 = vld [vmem:[#allocation18_spill] sm:$0xff] }
 0x311   : > { %v5209_v20 = vpop.f32.mrb[170].mxu1  ;;  %3893 = vmatprep.mubr.f32.mxu0 %v9626_v9 }
 0x312   : > { %v3149_v55 = vpop.f32.mrb[171].mxu1  ;;  %5362 = vmatmul.mubr.f32.gmra.mrb[6].mxu1 %v9628_v54 }
 0x313   : > { %v2904_v43 = vpop.f32.mrb[140].mxu0  ;;  %5364 = vmatprep.mubr.f32.mxu1 %v9630_v45  ;;  %v5988_v45 = vld [vmem:[#allocation2 + $0xf0] sm:$0xff] }
 0x314   : > { %v8728_v21 = vadd.f32 %v3129_v29, %v2904_v43  ;;  %v2906_v38 = vpop.f32.mrb[141].mxu0  ;;  %3894 = vmatmul.mubr.f32.gmra.mrb[246].mxu0 %v8623_v52  ;;  %v9632_v52 = vld [vmem:[#allocation20_spill] sm:$0xff] }
 0x315   : > { %v5212_v47 = vpop.f32.mrb[172].mxu1  ;;  %3898 = vmatprep.mubr.f32.mxu0 %v9629_v50  ;;  %v9637_v43 = vld [vmem:[#allocation28_spill] sm:$0xff] }
 0x316   : > { %v3159_v25 = vpop.f32.mrb[173].mxu1  ;;  %5365 = vmatmul.mubr.f32.gmra.mrb[8].mxu1 %v9631_v26  ;;  %v9639_v26 = vld [vmem:[#allocation48_spill] sm:$0xff] }
 0x317   : > { %v2909_v44 = vpop.f32.mrb[142].mxu0  ;;  %5367 = vmatprep.mubr.f32.mxu1 %v9632_v52 }
 0x318   : > { %v8734_v34 = vadd.f32 %v5203_v41, %v2909_v44  ;;  %v2911_v19 = vpop.f32.mrb[143].mxu0  ;;  %3899 = vmatmul.mubr.f32.gmra.mrb[248].mxu0 %v8630_v58  ;;  %v9633_v41 = vld [vmem:[#allocation21_spill] sm:$0xff]  ;;  %v9634_v58 = vld [vmem:[#allocation22_spill] sm:$0xff] }
 0x319   : > { %v8738_v6 = vpop.f32.mrb[174].mxu1  ;;  %3903 = vmatprep.mubr.f32.mxu0 %v8302_v14  ;;  %v5989_v19 = vld [vmem:[#allocation2 + $0xf8] sm:$0xff] }
 0x31a   : > { %v3169_v27 = vpop.f32.mrb[175].mxu1  ;;  %5368 = vmatmul.mubr.f32.gmra.mrb[10].mxu1 %v9633_v41  ;;  %v9641_v41 = vld [vmem:[#allocation54_spill] sm:$0xff] }
 0x31b   : > { %v2914_v29 = vpop.f32.mrb[144].mxu0  ;;  %5370 = vmatprep.mubr.f32.mxu1 %v9634_v58 }
 0x31c   : > { %v8742_v15 = vadd.f32 %v3139_v35, %v2914_v29  ;;  %v2916_v17 = vpop.f32.mrb[145].mxu0  ;;  %3904 = vmatmul.mubr.f32.gmra.mrb[250].mxu0 %v8637_v46  ;;  %v9635_v46 = vld [vmem:[#allocation24_spill] sm:$0xff] }
 0x31d   : > { %3908 = vmatprep.mubr.f32.mxu0 %v8338_v39 }
 0x31e   : > { %v8750_v8 = vpop.f32.mrb[176].mxu1  ;;  %5371 = vmatmul.mubr.f32.gmra.mrb[12].mxu1 %v9605_v62 }
 0x31f   : > { %v2919_v22 = vpop.f32.mrb[146].mxu0  ;;  %v8752_v59 = vpop.f32.mrb[177].mxu1  ;;  %5373 = vmatprep.mubr.f32.mxu1 %v9635_v46 }
 0x320   : > { %v8748_v23 = vadd.f32 %v5206_v33, %v2919_v22  ;;  %v2921_v14 = vpop.f32.mrb[147].mxu0  ;;  %3909 = vmatmul.mubr.f32.gmra.mrb[252].mxu0 %v5986_v40  ;;  %v9636_v33 = vld [vmem:[#allocation25_spill] sm:$0xff] }
 0x321   : > { %3913 = vmatprep.mubr.f32.mxu0 %v8354_v4  ;;  %v5991_v14 = vld [vmem:[#allocation2 + $0x110] sm:$0xff] }
 0x322   : > { %5374 = vmatmul.mubr.f32.gmra.mrb[14].mxu1 %v9636_v33  ;;  %v8801_v33 = vld [vmem:[#allocation2 + $0x1a8] sm:$0x3] }
 0x323   : > { %v2924_v35 = vpop.f32.mrb[148].mxu0  ;;  %5376 = vmatprep.mubr.f32.mxu1 %v9637_v43 }
 0x324   : > { %v8757_v39 = vadd.f32 %v3149_v55, %v2924_v35  ;;  %v2926_v9 = vpop.f32.mrb[149].mxu0  ;;  %3914 = vmatmul.mubr.f32.gmra.mrb[254].mxu0 %v5987_v30  ;;  %v5992_v30 = vld [vmem:[#allocation2 + $0x120] sm:$0xff] }
 0x325   : > { %3918 = vmatprep.mubr.f32.mxu0 %v8380_v18  ;;  %v8795_v9 = vld [vmem:[#allocation2 + $0x198] sm:$0xff] }
 0x326   : > { %5377 = vmatmul.mubr.f32.gmra.mrb[16].mxu1 %v8245_v13 }
 0x327   : > { %v2929_v38 = vpop.f32.mrb[150].mxu0  ;;  %v8764_v62 = vpop.f32.mrb[178].mxu1  ;;  %5379 = vmatprep.mubr.f32.mxu1 %v8279_v32  ;;  %v5990_v32 = vld [vmem:[#allocation2 + $0x108] sm:$0xff] }
 0x328   : > { %v8762_v54 = vadd.f32 %v5209_v20, %v2929_v38  ;;  %v2931_v4 = vpop.f32.mrb[151].mxu0  ;;  %v8766_v50 = vpop.f32.mrb[179].mxu1  ;;  %3919 = vmatmul.mubr.f32.gmra.mrb[0].mxu0 %v5988_v45  ;;  %v9638_v20 = vld [vmem:[#allocation41_spill] sm:$0xff]  ;;  %v5993_v38 = vld [vmem:[#allocation2 + $0x128] sm:$0xff] }
 0x329   : > { %3923 = vmatprep.mubr.f32.mxu0 %v9609_v1  ;;  %v9644_v4 = vld [vmem:[#allocation86_spill] sm:$0xff] }
 0x32a   : > { %5380 = vmatmul.mubr.f32.gmra.mrb[18].mxu1 %v9638_v20  ;;  %v5994_v20 = vld [vmem:[#allocation2 + $0x138] sm:$0xff] }
 0x32b   : > { %v2934_v55 = vpop.f32.mrb[152].mxu0  ;;  %5382 = vmatprep.mubr.f32.mxu1 %v9639_v26  ;;  %v9645_v26 = vld [vmem:[#allocation84_spill] sm:$0xff] }
 0x32c   : > { %v8771_v18 = vadd.f32 %v3159_v25, %v2934_v55  ;;  %v2936_v44 = vpop.f32.mrb[153].mxu0  ;;  %3924 = vmatmul.mubr.f32.gmra.mrb[2].mxu0 %v5989_v19  ;;  %v9640_v25 = vld [vmem:[#allocation53_spill] sm:$0xff] }
 0x32d   : > { %3928 = vmatprep.mubr.f32.mxu0 %v9613_v10 }
 0x32e   : > { %5383 = vmatmul.mubr.f32.gmra.mrb[20].mxu1 %v9640_v25 }
 0x32f   : > { %v2939_v52 = vpop.f32.mrb[154].mxu0  ;;  %v8778_v13 = vpop.f32.mrb[180].mxu1  ;;  %5385 = vmatprep.mubr.f32.mxu1 %v9641_v41 }
 0x330   : > { %v8776_v29 = vadd.f32 %v5212_v47, %v2939_v52  ;;  %v2941_v1 = vpop.f32.mrb[155].mxu0  ;;  %v8780_v17 = vpop.f32.mrb[181].mxu1  ;;  %3929 = vmatmul.mubr.f32.gmra.mrb[4].mxu0 %v5990_v32  ;;  %v9642_v47 = vld [vmem:[#allocation51_spill] sm:$0xff] }
 0x331   : > { %3933 = vmatprep.mubr.f32.mxu0 %v9617_v5 }
 0x332   : > { %5386 = vmatmul.mubr.f32.gmra.mrb[22].mxu1 %v9610_v12 }
 0x333   : > { %v2944_v58 = vpop.f32.mrb[156].mxu0  ;;  %5388 = vmatprep.mubr.f32.mxu1 %v9642_v47 }
 0x334   : > { %v8785_v10 = vadd.f32 %v3169_v27, %v2944_v58  ;;  %v2946_v22 = vpop.f32.mrb[157].mxu0  ;;  %3934 = vmatmul.mubr.f32.gmra.mrb[6].mxu0 %v5991_v14 }
 0x335   : > { %3938 = vmatprep.mubr.f32.mxu0 %v9620_v51  ;;  %v8793_v35 = vpop.f32.mrb[182].mxu1  ;;  %v3718_v51 = vrot.slane %v8795_v9, 2 }
 0x336   : > { %v3209_v27 = vpop.f32.mrb[183].mxu1  ;;  %5389 = vmatmul.mubr.f32.gmra.mrb[24].mxu1 %v9614_v60  ;;  %v9643_v60 = vld [vmem:[#allocation83_spill] sm:$0xff] }
 0x337   : > { %v2949_v40 = vpop.f32.mrb[158].mxu0  ;;  %5391 = vmatprep.mubr.f32.mxu1 %v9616_v3  ;;  %v3720_v45 = vsel %vm507_vm0, %v3718_v51, %v9644_v4 }
 0x338   : > { %v8791_v46 = vadd.f32 %v8738_v6, %v2949_v40  ;;  %v2951_v5 = vpop.f32.mrb[159].mxu0  ;;  %3939 = vmatmul.mubr.f32.gmra.mrb[8].mxu0 %v5992_v30  ;;  %v3711_v30 = vrot.slane %v8795_v9, 1 }
 0x339   : > { %3943 = vmatprep.mubr.f32.mxu0 %v9622_v37  ;;  %v3721_v37 = vrot.slane %v8801_v33, 2 }
 0x33a   : > { %5392 = vmatmul.mubr.f32.gmra.mrb[26].mxu1 %v9618_v61 }
 0x33b   : > { %v2954_v12 = vpop.f32.mrb[160].mxu0  ;;  %5394 = vmatprep.mubr.f32.mxu1 %v9643_v60 }
 0x33c   : > { %v8804_v6 = vadd.f32 %v8752_v59, %v2954_v12  ;;  %v2956_v43 = vpop.f32.mrb[161].mxu0  ;;  %3944 = vmatmul.mubr.f32.gmra.mrb[10].mxu0 %v5993_v38  ;;  %v9649_v38 = vld [vmem:[#allocation80_spill] sm:$0xff] }
 0x33d   : > { %3948 = vmatprep.mubr.f32.mxu0 %v8491_v31  ;;  %v3722_v31 = vsel %vm507_vm0, %v9644_v4, %v3721_v37  ;;  %v3713_v60 = vsel %vm394_vm1, %v3711_v30, %v9649_v38 }
 0x33e   : > { %v5230_v59 = vpop.f32.mrb[184].mxu1  ;;  %5395 = vmatmul.mubr.f32.gmra.mrb[28].mxu1 %v9645_v26 }
 0x33f   : > { %v2959_v3 = vpop.f32.mrb[162].mxu0  ;;  %v3219_v19 = vpop.f32.mrb[185].mxu1  ;;  %5397 = vmatprep.mubr.f32.mxu1 %v3720_v45  ;;  %v9650_v45 = vld [vmem:[#allocation82_spill] sm:$0xff] }
 0x340   : > { %v8813_v55 = vadd.f32 %v8750_v8, %v2959_v3  ;;  %v2961_v44 = vpop.f32.mrb[163].mxu0  ;;  %3949 = vmatmul.mubr.f32.gmra.mrb[12].mxu0 %v5994_v20  ;;  %v5995_v8 = vld [vmem:[#allocation2 + $0x140] sm:$0xff] }
 0x341   : > { %3953 = vmatprep.mubr.f32.mxu0 %v8500_v53 }
 0x342   : > { %5398 = vmatmul.mubr.f32.gmra.mrb[30].mxu1 %v3722_v31 }
 0x343   : > { %v2964_v61 = vpop.f32.mrb[164].mxu0 }
 0x344   : > { %v8820_v52 = vadd.f32 %v8766_v50, %v2964_v61  ;;  %v2966_v1 = vpop.f32.mrb[165].mxu0  ;;  %3954 = vmatmul.mubr.f32.gmra.mrb[14].mxu0 %v5995_v8 }
 0x345   : > { %3958 = vmatprep.mubr.f32.mxu0 %v8509_v57 }
 0x347   : > { %v2969_v32 = vpop.f32.mrb[166].mxu0  ;;  %v5233_v41 = vpop.f32.mrb[186].mxu1 }
 0x348   : > { %v8824_v25 = vadd.f32 %v8764_v62, %v2969_v32  ;;  %v2971_v53 = vpop.f32.mrb[167].mxu0  ;;  %v3229_v58 = vpop.f32.mrb[187].mxu1  ;;  %3959 = vmatmul.mubr.f32.gmra.mrb[16].mxu0 %v8387_v11 }
 0x349   : > { %3963 = vmatprep.mubr.f32.mxu0 %v8517_v56 }
 0x34b   : > { %v2974_v22 = vpop.f32.mrb[168].mxu0 }
 0x34c   : > { %v8829_v50 = vadd.f32 %v8780_v17, %v2974_v22  ;;  %v2976_v14 = vpop.f32.mrb[169].mxu0  ;;  %3964 = vmatmul.mubr.f32.gmra.mrb[18].mxu0 %v8395_v48  ;;  %v9646_v48 = vld [vmem:[#allocation85_spill] sm:$0xff] }
 0x34d   : > { %3968 = vmatprep.mubr.f32.mxu0 %v8525_v0  ;;  %v5236_v47 = vpop.f32.mrb[188].mxu1 }
 0x34e   : > { %v3239_v5 = vpop.f32.mrb[189].mxu1 }
 0x34f   : > { %v2979_v57 = vpop.f32.mrb[170].mxu0 }
 0x350   : > { %v8834_v62 = vadd.f32 %v8778_v13, %v2979_v57  ;;  %v2981_v40 = vpop.f32.mrb[171].mxu0  ;;  %3969 = vmatmul.mubr.f32.gmra.mrb[20].mxu0 %v8423_v42  ;;  %v9647_v42 = vld [vmem:[#allocation78_spill] sm:$0xff]  ;;  %v9651_v57 = vld [vmem:[#allocation79_spill] sm:$0xff] }
 0x351   : > { %3973 = vmatprep.mubr.f32.mxu0 %v8532_v28  ;;  %v9648_v28 = vld [vmem:[#allocation87_spill] sm:$0xff] }
 0x353   : > { %v2984_v11 = vpop.f32.mrb[172].mxu0 }
 0x354   : > { %v8838_v56 = vadd.f32 %v3209_v27, %v2984_v11  ;;  %v2986_v17 = vpop.f32.mrb[173].mxu0  ;;  %3974 = vmatmul.mubr.f32.gmra.mrb[22].mxu0 %v8429_v49  ;;  %v5239_v12 = vpop.f32.mrb[190].mxu1  ;;  %v3714_v49 = vrot.slane %v8801_v33, 1 }
 0x355   : > { %3978 = vmatprep.mubr.f32.mxu0 %v9646_v48  ;;  %v3249_v43 = vpop.f32.mrb[191].mxu1 }
 0x356   : > { %v3715_v26 = vsel %vm394_vm1, %v9649_v38, %v3714_v49 }
 0x357   : > { %v2989_v0 = vpop.f32.mrb[174].mxu0 }
 0x358   : > { %v8844_v13 = vadd.f32 %v8793_v35, %v2989_v0  ;;  %v2991_v51 = vpop.f32.mrb[175].mxu0  ;;  %3979 = vmatmul.mubr.f32.gmra.mrb[24].mxu0 %v9647_v42  ;;  %v3324_v3 = vpop.f32.mrb[192].mxu1 }
 0x359   : > { %3983 = vmatprep.mubr.f32.mxu0 %v9648_v28  ;;  %v3325_v35 = vadd.f32 %v3324_v3, %v8696_v7  ;;  %v3326_v44 = vpop.f32.mrb[193].mxu1 }
 0x35b   : > { %v2994_v27 = vpop.f32.mrb[176].mxu0 }
 0x35c   : > { %v8851_v37 = vadd.f32 %v3219_v19, %v2994_v27  ;;  %v2996_v4 = vpop.f32.mrb[177].mxu0  ;;  %3984 = vmatmul.mubr.f32.gmra.mrb[26].mxu0 %v9650_v45  ;;  %v3329_v61 = vpop.f32.mrb[194].mxu1 }
 0x35d   : > { %3988 = vmatprep.mubr.f32.mxu0 %v3713_v60  ;;  %v3330_v33 = vadd.f32 %v3329_v61, %v8698_v63  ;;  %v3331_v19 = vpop.f32.mrb[195].mxu1 }
 0x35f   : > { %v2999_v20 = vpop.f32.mrb[178].mxu0 }
 0x360   : > { %v8857_v31 = vadd.f32 %v5230_v59, %v2999_v20  ;;  %v3001_v1 = vpop.f32.mrb[179].mxu0  ;;  %3989 = vmatmul.mubr.f32.gmra.mrb[28].mxu0 %v8795_v9  ;;  %v3334_v32 = vpop.f32.mrb[196].mxu1 }
 0x361   : > { %3993 = vmatprep.mubr.f32.mxu0 %v3715_v26  ;;  %v3335_v22 = vadd.f32 %v3334_v32, %v8704_v36  ;;  %v3336_v14 = vpop.f32.mrb[197].mxu1 }
 0x363   : > { %v3004_v8 = vpop.f32.mrb[180].mxu0 }
 0x364   : > { %v8861_v7 = vadd.f32 %v3229_v58, %v3004_v8  ;;  %v3006_v53 = vpop.f32.mrb[181].mxu0  ;;  %3994 = vmatmul.mubr.f32.gmra.mrb[30].mxu0 %v9651_v57  ;;  %v3339_v11 = vpop.f32.mrb[198].mxu1 }
 0x365   : > { %v3340_v63 = vadd.f32 %v3339_v11, %v8710_v24  ;;  %v3341_v9 = vpop.f32.mrb[199].mxu1 }
 0x367   : > { %v3009_v59 = vpop.f32.mrb[182].mxu0 }
 0x368   : > { %v8865_v40 = vadd.f32 %v5233_v41, %v3009_v59  ;;  %v3011_v17 = vpop.f32.mrb[183].mxu0  ;;  %v3344_v58 = vpop.f32.mrb[200].mxu1 }
 0x369   : > { %v3345_v51 = vadd.f32 %v3344_v58, %v8716_v16  ;;  %v3346_v42 = vpop.f32.mrb[201].mxu1 }
 0x36b   : > { %v3014_v48 = vpop.f32.mrb[184].mxu0 }
 0x36c   : > { %v8868_v0 = vadd.f32 %v3239_v5, %v3014_v48  ;;  %v3016_v30 = vpop.f32.mrb[185].mxu0  ;;  %v3349_v27 = vpop.f32.mrb[202].mxu1 }
 0x36d   : > { %v3350_v41 = vadd.f32 %v3349_v27, %v8722_v2  ;;  %v3351_v60 = vpop.f32.mrb[203].mxu1 }
 0x36f   : > { %v3019_v36 = vpop.f32.mrb[186].mxu0 }
 0x370   : > { %v8871_v28 = vadd.f32 %v5236_v47, %v3019_v36  ;;  %v3021_v38 = vpop.f32.mrb[187].mxu0  ;;  %v3354_v24 = vpop.f32.mrb[204].mxu1 }
 0x371   : > { %v3355_v5 = vadd.f32 %v3354_v24, %v8728_v21  ;;  %v3356_v45 = vpop.f32.mrb[205].mxu1 }
 0x373   : > { %v3024_v49 = vpop.f32.mrb[188].mxu0 }
 0x374   : > { %v8874_v3 = vadd.f32 %v3249_v43, %v3024_v49  ;;  %v3026_v4 = vpop.f32.mrb[189].mxu0  ;;  %v3359_v16 = vpop.f32.mrb[206].mxu1 }
 0x375   : > { %v3360_v47 = vadd.f32 %v3359_v16, %v8734_v34  ;;  %v3361_v61 = vpop.f32.mrb[207].mxu1 }
 0x377   : > { %v3029_v44 = vpop.f32.mrb[190].mxu0 }
 0x378   : > { %v8877_v20 = vadd.f32 %v5239_v12, %v3029_v44  ;;  %v3031_v26 = vpop.f32.mrb[191].mxu0  ;;  %v3364_v19 = vpop.f32.mrb[208].mxu1 }
 0x379   : > { %v3365_v43 = vadd.f32 %v3364_v19, %v8742_v15  ;;  %v3366_v32 = vpop.f32.mrb[209].mxu1 }
 0x37b   : > { %v5274_v1 = vpop.f32.mrb[192].mxu0 }
 0x37c   : > { %v8880_v2 = vadd.f32 %v5274_v1, %v3330_v33  ;;  %v3549_v8 = vpop.f32.mrb[193].mxu0 }
 0x37d   : > { %v8883_v53 = vadd.f32 %v3549_v8, %v3325_v35  ;;  %v3369_v14 = vpop.f32.mrb[210].mxu1 }
 0x37e   : > { %v3370_v59 = vadd.f32 %v3369_v14, %v8748_v23  ;;  %v3371_v11 = vpop.f32.mrb[211].mxu1 }
 0x37f   : > { %v5277_v21 = vpop.f32.mrb[194].mxu0 }
 0x380   : > { %v8885_v57 = vadd.f32 %v5277_v21, %v3340_v63  ;;  %v3559_v12 = vpop.f32.mrb[195].mxu0 }
 0x381   : > { %v8888_v34 = vadd.f32 %v3559_v12, %v3335_v22  ;;  %v3374_v9 = vpop.f32.mrb[212].mxu1 }
 0x382   : > { %v3375_v15 = vadd.f32 %v3374_v9, %v8757_v39  ;;  %v3376_v58 = vpop.f32.mrb[213].mxu1 }
 0x383   : > { %v5280_v17 = vpop.f32.mrb[196].mxu0 }
 0x384   : > { %v8890_v33 = vadd.f32 %v5280_v17, %v3350_v41  ;;  %v3569_v48 = vpop.f32.mrb[197].mxu0 }
 0x385   : > { %v8893_v35 = vadd.f32 %v3569_v48, %v3345_v51  ;;  %v3379_v42 = vpop.f32.mrb[214].mxu1 }
 0x386   : > { %v3380_v23 = vadd.f32 %v3379_v42, %v8762_v54  ;;  %v3381_v27 = vpop.f32.mrb[215].mxu1 }
 0x387   : > { %v5283_v30 = vpop.f32.mrb[198].mxu0 }
 0x388   : > { %v8895_v63 = vadd.f32 %v5283_v30, %v3360_v47  ;;  %v3579_v36 = vpop.f32.mrb[199].mxu0 }
 0x389   : > { %v8898_v22 = vadd.f32 %v3579_v36, %v3355_v5  ;;  %v3384_v60 = vpop.f32.mrb[216].mxu1 }
 0x38a   : > { %v3385_v39 = vadd.f32 %v3384_v60, %v8771_v18  ;;  %v3386_v24 = vpop.f32.mrb[217].mxu1 }
 0x38b   : > { %v5286_v38 = vpop.f32.mrb[200].mxu0 }
 0x38c   : > { %v8900_v41 = vadd.f32 %v5286_v38, %v3370_v59  ;;  %v3589_v49 = vpop.f32.mrb[201].mxu0 }
 0x38d   : > { %v8903_v51 = vadd.f32 %v3589_v49, %v3365_v43  ;;  %v3389_v45 = vpop.f32.mrb[218].mxu1 }
 0x38e   : > { %v3390_v54 = vadd.f32 %v3389_v45, %v8776_v29  ;;  %v3391_v26 = vpop.f32.mrb[219].mxu1 }
 0x38f   : > { %v5289_v4 = vpop.f32.mrb[202].mxu0 }
 0x390   : > { %v8905_v44 = vadd.f32 %v5289_v4, %v3380_v23  ;;  %v3599_v16 = vpop.f32.mrb[203].mxu0 }
 0x391   : > { %v8908_v5 = vadd.f32 %v3599_v16, %v3375_v15  ;;  %v3394_v61 = vpop.f32.mrb[220].mxu1 }
 0x392   : > { %v3395_v18 = vadd.f32 %v3394_v61, %v8785_v10  ;;  %v3396_v8 = vpop.f32.mrb[221].mxu1 }
 0x393   : > { %v5292_v47 = vpop.f32.mrb[204].mxu0 }
 0x394   : > { %v8910_v1 = vadd.f32 %v5292_v47, %v3390_v54  ;;  %v3609_v19 = vpop.f32.mrb[205].mxu0 }
 0x395   : > { %v8913_v43 = vadd.f32 %v3609_v19, %v3385_v39  ;;  %v3399_v21 = vpop.f32.mrb[222].mxu1 }
 0x396   : > { %v3400_v12 = vadd.f32 %v3399_v21, %v8791_v46  ;;  %v3401_v59 = vpop.f32.mrb[223].mxu1 }
 0x397   : > { %v5295_v32 = vpop.f32.mrb[206].mxu0 }
 0x398   : > { %v3619_v14 = vpop.f32.mrb[207].mxu0  ;;  %v8918_v11 = vadd.f32 %v5295_v32, %v3400_v12 }
 0x399   : > { %v8916_v29 = vadd.f32 %v3619_v14, %v3395_v18  ;;  %v3404_v9 = vpop.f32.mrb[224].mxu1 }
 0x39a   : > { %v3405_v15 = vadd.f32 %v3404_v9, %v8804_v6  ;;  %v3406_v58 = vpop.f32.mrb[225].mxu1 }
 0x39b   : > { %v5298_v17 = vpop.f32.mrb[208].mxu0 }
 0x39c   : > { %v3629_v48 = vpop.f32.mrb[209].mxu0 }
 0x39d   : > { %v8921_v10 = vadd.f32 %v3629_v48, %v3405_v15  ;;  %v3409_v42 = vpop.f32.mrb[226].mxu1 }
 0x39e   : > { %v3410_v23 = vadd.f32 %v3409_v42, %v8813_v55  ;;  %v3411_v27 = vpop.f32.mrb[227].mxu1 }
 0x39f   : > { %v5301_v30 = vpop.f32.mrb[210].mxu0 }
 0x3a0   : > { %v3639_v36 = vpop.f32.mrb[211].mxu0  ;;  %v8924_v46 = vadd.f32 %v5298_v17, %v3410_v23 }
 0x3a1   : > { %v3414_v60 = vpop.f32.mrb[228].mxu1 }
 0x3a2   : > { %v3415_v39 = vadd.f32 %v3414_v60, %v8820_v52  ;;  %v3416_v24 = vpop.f32.mrb[229].mxu1 }
 0x3a3   : > { %v5304_v38 = vpop.f32.mrb[212].mxu0 }
 0x3a4   : > { %v3649_v49 = vpop.f32.mrb[213].mxu0  ;;  %v8927_v4 = vadd.f32 %v3639_v36, %v3415_v39 }
 0x3a5   : > { %v3419_v45 = vpop.f32.mrb[230].mxu1 }
 0x3a6   : > { %v3420_v54 = vadd.f32 %v3419_v45, %v8824_v25  ;;  %v3421_v26 = vpop.f32.mrb[231].mxu1 }
 0x3a7   : > { %v5307_v6 = vpop.f32.mrb[214].mxu0 }
 0x3a8   : > { %v3659_v16 = vpop.f32.mrb[215].mxu0  ;;  %v8930_v47 = vadd.f32 %v5301_v30, %v3420_v54 }
 0x3a9   : > { %v3424_v61 = vpop.f32.mrb[232].mxu1 }
 0x3aa   : > { %v3425_v18 = vadd.f32 %v3424_v61, %v8829_v50  ;;  %v3426_v8 = vpop.f32.mrb[233].mxu1 }
 0x3ab   : > { %v5310_v55 = vpop.f32.mrb[216].mxu0 }
 0x3ac   : > { %v3669_v19 = vpop.f32.mrb[217].mxu0  ;;  %v8933_v32 = vadd.f32 %v3649_v49, %v3425_v18 }
 0x3ad   : > { %v3429_v21 = vpop.f32.mrb[234].mxu1 }
 0x3ae   : > { %v3430_v12 = vadd.f32 %v3429_v21, %v8834_v62  ;;  %v3431_v59 = vpop.f32.mrb[235].mxu1 }
 0x3af   : > { %v5313_v52 = vpop.f32.mrb[218].mxu0 }
 0x3b0   : > { %v3679_v14 = vpop.f32.mrb[219].mxu0  ;;  %v8936_v17 = vadd.f32 %v5304_v38, %v3430_v12 }
 0x3b1   : > { %v3434_v9 = vpop.f32.mrb[236].mxu1 }
 0x3b2   : > { %v3435_v15 = vadd.f32 %v3434_v9, %v8838_v56  ;;  %v3436_v58 = vpop.f32.mrb[237].mxu1 }
 0x3b3   : > { %v5316_v25 = vpop.f32.mrb[220].mxu0 }
 0x3b4   : > { %v3689_v48 = vpop.f32.mrb[221].mxu0  ;;  %v8939_v30 = vadd.f32 %v3659_v16, %v3435_v15 }
 0x3b5   : > { %v3439_v42 = vpop.f32.mrb[238].mxu1 }
 0x3b6   : > { %v3440_v23 = vadd.f32 %v3439_v42, %v8844_v13  ;;  %v3441_v27 = vpop.f32.mrb[239].mxu1 }
 0x3b7   : > { %v5319_v50 = vpop.f32.mrb[222].mxu0 }
 0x3b8   : > { %v3699_v36 = vpop.f32.mrb[223].mxu0  ;;  %v8942_v60 = vadd.f32 %v5307_v6, %v3440_v23 }
 0x3b9   : > { %v3444_v62 = vpop.f32.mrb[240].mxu1 }
 0x3ba   : > { %v3445_v38 = vadd.f32 %v3444_v62, %v8851_v37  ;;  %v3446_v39 = vpop.f32.mrb[241].mxu1 }
 0x3bb   : > { %v3840_v49 = vpop.f32.mrb[224].mxu0 }
 0x3bc   : > { %v3842_v24 = vpop.f32.mrb[225].mxu0  ;;  %v8945_v45 = vadd.f32 %v3669_v19, %v3445_v38 }
 0x3bd   : > { %v3449_v56 = vpop.f32.mrb[242].mxu1 }
 0x3be   : > { %v3450_v16 = vadd.f32 %v3449_v56, %v8857_v31  ;;  %v3451_v26 = vpop.f32.mrb[243].mxu1 }
 0x3bf   : > { %v3845_v54 = vpop.f32.mrb[226].mxu0 }
 0x3c0   : > { %v3847_v61 = vpop.f32.mrb[227].mxu0  ;;  %v8948_v18 = vadd.f32 %v5310_v55, %v3450_v16 }
 0x3c1   : > { %v3454_v13 = vpop.f32.mrb[244].mxu1 }
 0x3c2   : > { %v3455_v6 = vadd.f32 %v3454_v13, %v8861_v7  ;;  %v3456_v21 = vpop.f32.mrb[245].mxu1 }
 0x3c3   : > { %v3850_v8 = vpop.f32.mrb[228].mxu0 }
 0x3c4   : > { %v3852_v12 = vpop.f32.mrb[229].mxu0  ;;  %v8951_v59 = vadd.f32 %v3679_v14, %v3455_v6 }
 0x3c5   : > { %v3459_v37 = vpop.f32.mrb[246].mxu1 }
 0x3c6   : > { %v3460_v19 = vadd.f32 %v3459_v37, %v8865_v40  ;;  %v3461_v15 = vpop.f32.mrb[247].mxu1 }
 0x3c7   : > { %v3855_v9 = vpop.f32.mrb[230].mxu0 }
 0x3c8   : > { %v3857_v58 = vpop.f32.mrb[231].mxu0  ;;  %v8954_v42 = vadd.f32 %v5313_v52, %v3460_v19 }
 0x3c9   : > { %v3464_v31 = vpop.f32.mrb[248].mxu1 }
 0x3ca   : > { %v3465_v55 = vadd.f32 %v3464_v31, %v8868_v0  ;;  %v3466_v27 = vpop.f32.mrb[249].mxu1 }
 0x3cb   : > { %v3860_v23 = vpop.f32.mrb[232].mxu0 }
 0x3cc   : > { %v3862_v62 = vpop.f32.mrb[233].mxu0  ;;  %v8957_v38 = vadd.f32 %v3689_v48, %v3465_v55 }
 0x3cd   : > { %v3469_v7 = vpop.f32.mrb[250].mxu1 }
 0x3ce   : > { %v3470_v14 = vadd.f32 %v3469_v7, %v8871_v28  ;;  %v3471_v24 = vpop.f32.mrb[251].mxu1 }
 0x3cf   : > { %v3865_v39 = vpop.f32.mrb[234].mxu0 }
 0x3d0   : > { %v3867_v56 = vpop.f32.mrb[235].mxu0  ;;  %v8960_v16 = vadd.f32 %v5316_v25, %v3470_v14 }
 0x3d1   : > { %v3474_v40 = vpop.f32.mrb[252].mxu1 }
 0x3d2   : > { %v3475_v52 = vadd.f32 %v3474_v40, %v8874_v3  ;;  %v3476_v61 = vpop.f32.mrb[253].mxu1 }
 0x3d3   : > { %v8962_v26 = vpop.f32.mrb[236].mxu0 }
 0x3d4   : > { %v3872_v13 = vpop.f32.mrb[237].mxu0  ;;  %v8965_v0 = vadd.f32 %v3699_v36, %v3475_v52  ;;  %v8975_v36 = vld [vmem:[%s9218_s5] ss:$0 sm:$0xff] }
 0x3d5   : > { %v3479_v48 = vpop.f32.mrb[254].mxu1 }
 0x3d6   : > { %v3480_v21 = vadd.f32 %v3479_v48, %v8877_v20  ;;  %v3481_v12 = vpop.f32.mrb[255].mxu1  ;;  %v8982_v20 = vld [vmem:[%s9219_s6] ss:$0 sm:$0xff] }
 0x3d7   : > { %v3875_v6 = vpop.f32.mrb[238].mxu0  ;;  %v9652_v48 = vld [vmem:[#allocation27_spill] sm:$0xff] }
 0x3d8   : > { %v3877_v28 = vpop.f32.mrb[239].mxu0  ;;  %v8968_v37 = vadd.f32 %v5319_v50, %v3480_v21 }
 0x3d9   : > { %v5354_v19 = vpop.f32.mrb[0].mxu1 }
 0x3da   : > { %v4071_v15 = vadd.f32 %v5354_v19, %v3845_v54  ;;  %v4065_v3 = vpop.f32.mrb[1].mxu1  ;;  %v9653_v19 = vld [vmem:[#allocation10_spill] sm:$0xff] }
 0x3db   : > { %v8970_v25 = vpop.f32.mrb[240].mxu0  ;;  %v4066_v31 = vadd.f32 %v4065_v3, %v3840_v49 }
 0x3dc   : > { %v3882_v58 = vpop.f32.mrb[241].mxu0  ;;  %v4225_v55 = vadd.f32 %v4071_v15, %v8880_v2 }
 0x3dd   : > { %v4224_v50 = vadd.f32 %v4066_v31, %v8883_v53  ;;  %v5357_v27 = vpop.f32.mrb[2].mxu1 }
 0x3de   : > { %v4264_v62 = vmul.f32 %v8975_v36, %v4225_v55  ;;  %v4081_v7 = vadd.f32 %v5357_v27, %v3855_v9  ;;  %v4075_v24 = vpop.f32.mrb[3].mxu1 }
 0x3df   : > { %v3885_v54 = vpop.f32.mrb[242].mxu0  ;;  %v4263_v56 = vmul.f32 %v8975_v36, %v4224_v50  ;;  %v4076_v49 = vadd.f32 %v4075_v24, %v3850_v8 }
 0x3e0   : > { %v3887_v14 = vpop.f32.mrb[243].mxu0  ;;  %v4303_v2 = vadd.f32 %v8982_v20, %v4264_v62  ;;  %v4227_v40 = vadd.f32 %v4081_v7, %v8885_v57 }
 0x3e1   : > { %v4302_v52 = vadd.f32 %v8982_v20, %v4263_v56  ;;  %v4226_v53 = vadd.f32 %v4076_v49, %v8888_v34  ;;  %v5360_v13 = vpop.f32.mrb[4].mxu1  ;;  %v9655_v49 = vld [vmem:[#allocation34_spill] sm:$0xff] }
 0x3e2   : > { %v4335_v9 = vadd.f32 %v4303_v2, %v9652_v48  ;;  %v4266_v21 = vmul.f32 %v8975_v36, %v4227_v40  ;;  %v4091_v12 = vadd.f32 %v5360_v13, %v3865_v39  ;;  %v4085_v8 = vpop.f32.mrb[5].mxu1  ;;  %v9654_v39 = vld [vmem:[#allocation40_spill] sm:$0xff] }
 0x3e3   : > { %v8993_v61 = vpop.f32.mrb[244].mxu0  ;;  %v4334_v15 = vadd.f32 %v4302_v52, %v9653_v19  ;;  %v4265_v58 = vmul.f32 %v8975_v36, %v4226_v53  ;;  %v4086_v3 = vadd.f32 %v4085_v8, %v3860_v23 }
 0x3e4   : > { %v3892_v28 = vpop.f32.mrb[245].mxu0  ;;  %v4367_v57 = vmax.f32 %v4335_v9, 0.0  ;;  %v4305_v31 = vadd.f32 %v8982_v20, %v4266_v21  ;;  %v4229_v34 = vadd.f32 %v4091_v12, %v8890_v33 }
 0x3e5   : > { %v4366_v55 = vmax.f32 %v4334_v15, 0.0  ;;  %v4304_v50 = vadd.f32 %v8982_v20, %v4265_v58  ;;  %v4228_v27 = vadd.f32 %v4086_v3, %v8893_v35  ;;  %v5363_v7 = vpop.f32.mrb[6].mxu1  ;;  %v9656_v28 = vld [vmem:[#allocation52_spill] sm:$0xff]  ;;  %v9657_v3 = vld [vmem:[#allocation46_spill] sm:$0xff] }
 0x3e6   : > { %4399 = vst [vmem:[%s9003_s20 + $0x8] sm:$0xff] %v4367_v57  ;;  %v4337_v14 = vadd.f32 %v4305_v31, %v9654_v39  ;;  %v4268_v23 = vmul.f32 %v8975_v36, %v4229_v34  ;;  %v4101_v24 = vadd.f32 %v5363_v7, %v3875_v6  ;;  %v4095_v33 = vpop.f32.mrb[7].mxu1 }
 0x3e7   : > { %v3895_v62 = vpop.f32.mrb[246].mxu0  ;;  %4398 = vst [vmem:[%s9003_s20] sm:$0xff] %v4366_v55  ;;  %v4336_v2 = vadd.f32 %v4304_v50, %v9655_v49  ;;  %v4267_v35 = vmul.f32 %v8975_v36, %v4228_v27  ;;  %v4096_v40 = vadd.f32 %v4095_v33, %v8962_v26  ;;  %v9659_v49 = vld [vmem:[#allocation56_spill] sm:$0xff] }
 0x3e8   : > { %v3897_v56 = vpop.f32.mrb[247].mxu0  ;;  %v4369_v52 = vmax.f32 %v4337_v14, 0.0  ;;  %v4307_v53 = vadd.f32 %v8982_v20, %v4268_v23  ;;  %v4231_v13 = vadd.f32 %v4101_v24, %v8895_v63  ;;  %v9658_v14 = vld [vmem:[#allocation59_spill] sm:$0xff] }
 0x3e9   : > { %v4368_v48 = vmax.f32 %v4336_v2, 0.0  ;;  %v4306_v9 = vadd.f32 %v8982_v20, %v4267_v35  ;;  %v4230_v6 = vadd.f32 %v4096_v40, %v8898_v22  ;;  %v5366_v12 = vpop.f32.mrb[8].mxu1 }
 0x3ea   : > { %4401 = vst [vmem:[%s9003_s20 + $0x18] sm:$0xff] %v4369_v52  ;;  %v4339_v8 = vadd.f32 %v4307_v53, %v9656_v28  ;;  %v4270_v19 = vmul.f32 %v8975_v36, %v4231_v13  ;;  %v4111_v15 = vadd.f32 %v5366_v12, %v3885_v54  ;;  %v4105_v58 = vpop.f32.mrb[9].mxu1 }
 0x3eb   : > { %v3900_v21 = vpop.f32.mrb[248].mxu0  ;;  %4400 = vst [vmem:[%s9003_s20 + $0x10] sm:$0xff] %v4368_v48  ;;  %v4338_v57 = vadd.f32 %v4306_v9, %v9657_v3  ;;  %v4269_v63 = vmul.f32 %v8975_v36, %v4230_v6  ;;  %v4106_v31 = vadd.f32 %v4105_v58, %v8970_v25  ;;  %v9660_v6 = vld [vmem:[#allocation61_spill] sm:$0xff] }
 0x3ec   : > { %v3902_v26 = vpop.f32.mrb[249].mxu0  ;;  %v4371_v22 = vmax.f32 %v4339_v8, 0.0  ;;  %v4309_v34 = vadd.f32 %v8982_v20, %v4270_v19  ;;  %v4233_v55 = vadd.f32 %v4111_v15, %v8900_v41  ;;  %v9661_v15 = vld [vmem:[#allocation60_spill] sm:$0xff] }
 0x3ed   : > { %v4370_v50 = vmax.f32 %v4338_v57, 0.0  ;;  %v4308_v27 = vadd.f32 %v8982_v20, %v4269_v63  ;;  %v4232_v54 = vadd.f32 %v4106_v31, %v8903_v51  ;;  %v5369_v39 = vpop.f32.mrb[10].mxu1 }
 0x3ee   : > { %4403 = vst [vmem:[%s9003_s20 + $0x28] sm:$0xff] %v4371_v22  ;;  %v4341_v23 = vadd.f32 %v4309_v34, %v9658_v14  ;;  %v4272_v24 = vmul.f32 %v8975_v36, %v4233_v55  ;;  %v4121_v56 = vadd.f32 %v5369_v39, %v3895_v62  ;;  %v4115_v33 = vpop.f32.mrb[11].mxu1  ;;  %v9663_v14 = vld [vmem:[#allocation62_spill] sm:$0xff] }
 0x3ef   : > { %v3905_v7 = vpop.f32.mrb[250].mxu0  ;;  %4402 = vst [vmem:[%s9003_s20 + $0x20] sm:$0xff] %v4370_v50  ;;  %v4340_v2 = vadd.f32 %v4308_v27, %v9659_v49  ;;  %v4271_v41 = vmul.f32 %v8975_v36, %v4232_v54  ;;  %v4116_v35 = vadd.f32 %v4115_v33, %v8993_v61  ;;  %v9662_v50 = vld [vmem:[#allocation63_spill] sm:$0xff] }
 0x3f0   : > { %v3907_v25 = vpop.f32.mrb[251].mxu0  ;;  %v4373_v51 = vmax.f32 %v4341_v23, 0.0  ;;  %v4311_v40 = vadd.f32 %v8982_v20, %v4272_v24  ;;  %v4235_v52 = vadd.f32 %v4121_v56, %v8905_v44 }
 0x3f1   : > { %v4372_v53 = vmax.f32 %v4340_v2, 0.0  ;;  %v4310_v13 = vadd.f32 %v8982_v20, %v4271_v41  ;;  %v4234_v62 = vadd.f32 %v4116_v35, %v8908_v5  ;;  %v5372_v9 = vpop.f32.mrb[12].mxu1 }
 0x3f2   : > { %4405 = vst [vmem:[%s9003_s20 + $0x38] sm:$0xff] %v4373_v51  ;;  %v4343_v12 = vadd.f32 %v4311_v40, %v9660_v6  ;;  %v4274_v28 = vmul.f32 %v8975_v36, %v4235_v52  ;;  %v4131_v8 = vadd.f32 %v5372_v9, %v3905_v7  ;;  %v4125_v19 = vpop.f32.mrb[13].mxu1  ;;  %v9664_v51 = vld [vmem:[#allocation65_spill] sm:$0xff] }
 0x3f3   : > { %v3910_v48 = vpop.f32.mrb[252].mxu0  ;;  %4404 = vst [vmem:[%s9003_s20 + $0x30] sm:$0xff] %v4372_v53  ;;  %v4342_v26 = vadd.f32 %v4310_v13, %v9661_v15  ;;  %v4273_v44 = vmul.f32 %v8975_v36, %v4234_v62  ;;  %v4126_v58 = vadd.f32 %v4125_v19, %v3900_v21  ;;  %v9665_v62 = vld [vmem:[#allocation64_spill] sm:$0xff]  ;;  %v9666_v15 = vld [vmem:[#allocation67_spill] sm:$0xff] }
 0x3f4   : > { %v3912_v61 = vpop.f32.mrb[253].mxu0  ;;  %v4375_v3 = vmax.f32 %v4343_v12, 0.0  ;;  %v4313_v5 = vadd.f32 %v8982_v20, %v4274_v28  ;;  %v4237_v57 = vadd.f32 %v4131_v8, %v8910_v1 }
 0x3f5   : > { %v4374_v63 = vmax.f32 %v4342_v26, 0.0  ;;  %v4312_v31 = vadd.f32 %v8982_v20, %v4273_v44  ;;  %v4236_v22 = vadd.f32 %v4126_v58, %v8913_v43  ;;  %v5375_v55 = vpop.f32.mrb[14].mxu1 }
 0x3f6   : > { %4407 = vst [vmem:[%s9003_s20 + $0x48] sm:$0xff] %v4375_v3  ;;  %v4345_v27 = vadd.f32 %v4313_v5, %v9662_v50  ;;  %v4276_v54 = vmul.f32 %v8975_v36, %v4237_v57  ;;  %v4135_v39 = vpop.f32.mrb[15].mxu1  ;;  %v9667_v5 = vld [vmem:[#allocation66_spill] sm:$0xff] }
 0x3f7   : > { %v3915_v34 = vpop.f32.mrb[254].mxu0  ;;  %4406 = vst [vmem:[%s9003_s20 + $0x40] sm:$0xff] %v4374_v63  ;;  %v4344_v23 = vadd.f32 %v4312_v31, %v9663_v14  ;;  %v4275_v1 = vmul.f32 %v8975_v36, %v4236_v22  ;;  %v4136_v24 = vadd.f32 %v4135_v39, %v3910_v48  ;;  %v9668_v39 = vld [vmem:[#allocation68_spill] sm:$0xff] }
 0x3f8   : > { %v4141_v7 = vadd.f32 %v5375_v55, %v3915_v34  ;;  %v3917_v21 = vpop.f32.mrb[255].mxu0  ;;  %v4377_v56 = vmax.f32 %v4345_v27, 0.0  ;;  %v4315_v43 = vadd.f32 %v8982_v20, %v4276_v54 }
 0x3f9   : > { %v4376_v33 = vmax.f32 %v4344_v23, 0.0  ;;  %v4314_v49 = vadd.f32 %v8982_v20, %v4275_v1  ;;  %v4238_v2 = vadd.f32 %v4136_v24, %v8916_v29  ;;  %v5378_v35 = vpop.f32.mrb[16].mxu1 }
 0x3fa   : > { %v4239_v25 = vadd.f32 %v4141_v7, %v8918_v11  ;;  %4409 = vst [vmem:[%s9003_s20 + $0x58] sm:$0xff] %v4377_v56  ;;  %v4347_v40 = vadd.f32 %v4315_v43, %v9664_v51  ;;  %v4145_v13 = vpop.f32.mrb[17].mxu1  ;;  %v9669_v43 = vld [vmem:[#allocation69_spill] sm:$0xff] }
 0x3fb   : > { %v3920_v41 = vpop.f32.mrb[0].mxu0  ;;  %4408 = vst [vmem:[%s9003_s20 + $0x50] sm:$0xff] %v4376_v33  ;;  %v4346_v48 = vadd.f32 %v4314_v49, %v9665_v62  ;;  %v4277_v11 = vmul.f32 %v8975_v36, %v4238_v2 }
 0x3fc   : > { %v4278_v52 = vmul.f32 %v8975_v36, %v4239_v25  ;;  %v3922_v53 = vpop.f32.mrb[1].mxu0  ;;  %v4146_v9 = vadd.f32 %v4145_v13, %v3920_v41  ;;  %v4379_v6 = vmax.f32 %v4347_v40, 0.0 }
 0x3fd   : > { %v4378_v12 = vmax.f32 %v4346_v48, 0.0  ;;  %v4316_v28 = vadd.f32 %v8982_v20, %v4277_v11  ;;  %v5381_v19 = vpop.f32.mrb[18].mxu1 }
 0x3fe   : > { %v4317_v29 = vadd.f32 %v8982_v20, %v4278_v52  ;;  %v4240_v8 = vadd.f32 %v4146_v9, %v8921_v10  ;;  %4411 = vst [vmem:[%s9003_s20 + $0x68] sm:$0xff] %v4379_v6  ;;  %v4155_v3 = vpop.f32.mrb[19].mxu1 }
 0x3ff   : > { %v3925_v61 = vpop.f32.mrb[2].mxu0  ;;  %4410 = vst [vmem:[%s9003_s20 + $0x60] sm:$0xff] %v4378_v12  ;;  %v4348_v57 = vadd.f32 %v4316_v28, %v9667_v5 }
 0x400   : > { %v4349_v26 = vadd.f32 %v4317_v29, %v9666_v15  ;;  %v4151_v44 = vadd.f32 %v5378_v35, %v3925_v61  ;;  %v3927_v58 = vpop.f32.mrb[3].mxu0  ;;  %v4279_v63 = vmul.f32 %v8975_v36, %v4240_v8 }
 0x401   : > { %v4380_v34 = vmax.f32 %v4348_v57, 0.0  ;;  %v5384_v50 = vpop.f32.mrb[20].mxu1 }
 0x402   : > { %v4381_v31 = vmax.f32 %v4349_v26, 0.0  ;;  %v4241_v22 = vadd.f32 %v4151_v44, %v8924_v46  ;;  %v4318_v10 = vadd.f32 %v8982_v20, %v4279_v63  ;;  %v4165_v21 = vpop.f32.mrb[21].mxu1 }
 0x403   : > { %v3930_v55 = vpop.f32.mrb[4].mxu0  ;;  %4412 = vst [vmem:[%s9003_s20 + $0x70] sm:$0xff] %v4380_v34 }
 0x404   : > { %4413 = vst [vmem:[%s9003_s20 + $0x78] sm:$0xff] %v4381_v31  ;;  %v4280_v27 = vmul.f32 %v8975_v36, %v4241_v22  ;;  %v4156_v54 = vadd.f32 %v4155_v3, %v3930_v55  ;;  %v3932_v7 = vpop.f32.mrb[5].mxu0  ;;  %v4350_v14 = vadd.f32 %v4318_v10, %v9668_v39 }
 0x405   : > { %v5387_v56 = vpop.f32.mrb[22].mxu1 }
 0x406   : > { %v4319_v23 = vadd.f32 %v8982_v20, %v4280_v27  ;;  %v4242_v46 = vadd.f32 %v4156_v54, %v8927_v4  ;;  %v4382_v1 = vmax.f32 %v4350_v14, 0.0  ;;  %v4175_v41 = vpop.f32.mrb[23].mxu1  ;;  %v9670_v4 = vld [vmem:[#allocation70_spill] sm:$0xff] }
 0x407   : > { %v3935_v24 = vpop.f32.mrb[6].mxu0 }
 0x408   : > { %v4351_v25 = vadd.f32 %v4319_v23, %v9669_v43  ;;  %v4281_v33 = vmul.f32 %v8975_v36, %v4242_v46  ;;  %v4161_v49 = vadd.f32 %v5381_v19, %v3935_v24  ;;  %v3937_v2 = vpop.f32.mrb[7].mxu0  ;;  %4414 = vst [vmem:[%s9003_s20 + $0x80] sm:$0xff] %v4382_v1 }
 0x409   : > { %v5390_v53 = vpop.f32.mrb[24].mxu1 }
 0x40a   : > { %v4383_v35 = vmax.f32 %v4351_v25, 0.0  ;;  %v4320_v51 = vadd.f32 %v8982_v20, %v4281_v33  ;;  %v4243_v40 = vadd.f32 %v4161_v49, %v8930_v47  ;;  %v4185_v9 = vpop.f32.mrb[25].mxu1  ;;  %v9671_v47 = vld [vmem:[#allocation71_spill] sm:$0xff] }
 0x40b   : > { %v3940_v52 = vpop.f32.mrb[8].mxu0 }
 0x40c   : > { %4415 = vst [vmem:[%s9003_s20 + $0x88] sm:$0xff] %v4383_v35  ;;  %v4352_v13 = vadd.f32 %v4320_v51, %v9670_v4  ;;  %v4282_v62 = vmul.f32 %v8975_v36, %v4243_v40  ;;  %v4166_v48 = vadd.f32 %v4165_v21, %v3940_v52  ;;  %v3942_v11 = vpop.f32.mrb[9].mxu0  ;;  %v9675_v4 = vld [vmem:[#allocation33_spill] sm:$0xff] }
 0x40d   : > { %v9090_v8 = vpop.f32.mrb[26].mxu1 }
 0x40e   : > { %v4384_v6 = vmax.f32 %v4352_v13, 0.0  ;;  %v4321_v29 = vadd.f32 %v8982_v20, %v4282_v62  ;;  %v4244_v12 = vadd.f32 %v4166_v48, %v8933_v32  ;;  %v4195_v44 = vpop.f32.mrb[27].mxu1  ;;  %v9672_v32 = vld [vmem:[#allocation72_spill] sm:$0xff] }
 0x40f   : > { %v3945_v28 = vpop.f32.mrb[10].mxu0 }
 0x410   : > { %4416 = vst [vmem:[%s9003_s20 + $0x90] sm:$0xff] %v4384_v6  ;;  %v4353_v61 = vadd.f32 %v4321_v29, %v9671_v47  ;;  %v4283_v19 = vmul.f32 %v8975_v36, %v4244_v12  ;;  %v4171_v15 = vadd.f32 %v5384_v50, %v3945_v28  ;;  %v3947_v26 = vpop.f32.mrb[11].mxu0  ;;  %v9676_v12 = vld [vmem:[#allocation37_spill] sm:$0xff] }
 0x411   : > { %v9097_v63 = vpop.f32.mrb[28].mxu1 }
 0x412   : > { %v4385_v58 = vmax.f32 %v4353_v61, 0.0  ;;  %v4322_v3 = vadd.f32 %v8982_v20, %v4283_v19  ;;  %v4245_v5 = vadd.f32 %v4171_v15, %v8936_v17  ;;  %v4205_v55 = vpop.f32.mrb[29].mxu1  ;;  %v9673_v17 = vld [vmem:[#allocation73_spill] sm:$0xff] }
 0x413   : > { %v3950_v57 = vpop.f32.mrb[12].mxu0 }
 0x414   : > { %4417 = vst [vmem:[%s9003_s20 + $0x98] sm:$0xff] %v4385_v58  ;;  %v4354_v31 = vadd.f32 %v4322_v3, %v9672_v32  ;;  %v4284_v22 = vmul.f32 %v8975_v36, %v4245_v5  ;;  %v4176_v34 = vadd.f32 %v4175_v41, %v3950_v57  ;;  %v3952_v10 = vpop.f32.mrb[13].mxu0  ;;  %v9677_v58 = vld [vmem:[#allocation38_spill] sm:$0xff] }
 0x415   : > { %v9104_v21 = vpop.f32.mrb[30].mxu1 }
 0x416   : > { %v4386_v50 = vmax.f32 %v4354_v31, 0.0  ;;  %v4323_v27 = vadd.f32 %v8982_v20, %v4284_v22  ;;  %v4246_v54 = vadd.f32 %v4176_v34, %v8939_v30  ;;  %v4215_v1 = vpop.f32.mrb[31].mxu1  ;;  %v9674_v30 = vld [vmem:[#allocation32_spill] sm:$0xff]  ;;  %v9678_v34 = vld [vmem:[#allocation39_spill] sm:$0xff] }
 0x417   : > { %v3955_v7 = vpop.f32.mrb[14].mxu0 }
 0x418   : > { %4418 = vst [vmem:[%s9003_s20 + $0xa0] sm:$0xff] %v4386_v50  ;;  %v4355_v39 = vadd.f32 %v4323_v27, %v9673_v17  ;;  %v4285_v14 = vmul.f32 %v8975_v36, %v4246_v54  ;;  %v4181_v23 = vadd.f32 %v5387_v56, %v3955_v7  ;;  %v3957_v46 = vpop.f32.mrb[15].mxu0 }
 0x41a   : > { %v4387_v24 = vmax.f32 %v4355_v39, 0.0  ;;  %v4324_v43 = vadd.f32 %v8982_v20, %v4285_v14  ;;  %v4247_v25 = vadd.f32 %v4181_v23, %v8942_v60  ;;  %v9679_v39 = vld [vmem:[#allocation43_spill] sm:$0xff] }
 0x41b   : > { %v3960_v33 = vpop.f32.mrb[16].mxu0 }
 0x41c   : > { %4419 = vst [vmem:[%s9003_s20 + $0xa8] sm:$0xff] %v4387_v24  ;;  %v4356_v49 = vadd.f32 %v4324_v43, %v9674_v30  ;;  %v4286_v2 = vmul.f32 %v8975_v36, %v4247_v25  ;;  %v4186_v41 = vadd.f32 %v4185_v9, %v3960_v33  ;;  %v3962_v35 = vpop.f32.mrb[17].mxu0  ;;  %v9680_v33 = vld [vmem:[#allocation44_spill] sm:$0xff] }
 0x41e   : > { %v4388_v51 = vmax.f32 %v4356_v49, 0.0  ;;  %v4325_v56 = vadd.f32 %v8982_v20, %v4286_v2  ;;  %v4248_v40 = vadd.f32 %v4186_v41, %v8945_v45 }
 0x41f   : > { %v3965_v52 = vpop.f32.mrb[18].mxu0 }
 0x420   : > { %4420 = vst [vmem:[%s9003_s20 + $0xb0] sm:$0xff] %v4388_v51  ;;  %v4357_v13 = vadd.f32 %v4325_v56, %v9675_v4  ;;  %v4287_v60 = vmul.f32 %v8975_v36, %v4248_v40  ;;  %v4191_v62 = vadd.f32 %v5390_v53, %v3965_v52  ;;  %v3967_v48 = vpop.f32.mrb[19].mxu0 }
 0x422   : > { %v4389_v11 = vmax.f32 %v4357_v13, 0.0  ;;  %v4326_v6 = vadd.f32 %v8982_v20, %v4287_v60  ;;  %v4249_v9 = vadd.f32 %v4191_v62, %v8948_v18 }
 0x423   : > { %v3970_v29 = vpop.f32.mrb[20].mxu0 }
 0x424   : > { %4421 = vst [vmem:[%s9003_s20 + $0xb8] sm:$0xff] %v4389_v11  ;;  %v4358_v28 = vadd.f32 %v4326_v6, %v9676_v12  ;;  %v4288_v45 = vmul.f32 %v8975_v36, %v4249_v9  ;;  %v4196_v47 = vadd.f32 %v4195_v44, %v3970_v29  ;;  %v3972_v61 = vpop.f32.mrb[21].mxu0 }
 0x426   : > { %v4390_v19 = vmax.f32 %v4358_v28, 0.0  ;;  %v4327_v15 = vadd.f32 %v8982_v20, %v4288_v45  ;;  %v4250_v53 = vadd.f32 %v4196_v47, %v8951_v59 }
 0x427   : > { %v3975_v26 = vpop.f32.mrb[22].mxu0 }
 0x428   : > { %4422 = vst [vmem:[%s9003_s20 + $0xc0] sm:$0xff] %v4390_v19  ;;  %v4359_v3 = vadd.f32 %v4327_v15, %v9677_v58  ;;  %v4289_v18 = vmul.f32 %v8975_v36, %v4250_v53  ;;  %v4201_v5 = vadd.f32 %v9090_v8, %v3975_v26  ;;  %v3977_v57 = vpop.f32.mrb[23].mxu0 }
 0x42a   : > { %v4391_v32 = vmax.f32 %v4359_v3, 0.0  ;;  %v4328_v31 = vadd.f32 %v8982_v20, %v4289_v18  ;;  %v4251_v44 = vadd.f32 %v4201_v5, %v8954_v42 }
 0x42b   : > { %v3980_v22 = vpop.f32.mrb[24].mxu0 }
 0x42c   : > { %4423 = vst [vmem:[%s9003_s20 + $0xc8] sm:$0xff] %v4391_v32  ;;  %v4360_v10 = vadd.f32 %v4328_v31, %v9678_v34  ;;  %v4290_v59 = vmul.f32 %v8975_v36, %v4251_v44  ;;  %v4206_v50 = vadd.f32 %v4205_v55, %v3980_v22  ;;  %v3982_v27 = vpop.f32.mrb[25].mxu0 }
 0x42e   : > { %v4392_v54 = vmax.f32 %v4360_v10, 0.0  ;;  %v4329_v7 = vadd.f32 %v8982_v20, %v4290_v59  ;;  %v4252_v8 = vadd.f32 %v4206_v50, %v8957_v38 }
 0x42f   : > { %v3985_v17 = vpop.f32.mrb[26].mxu0 }
 0x430   : > { %4424 = vst [vmem:[%s9003_s20 + $0xd0] sm:$0xff] %v4392_v54  ;;  %v4361_v14 = vadd.f32 %v4329_v7, %v9679_v39  ;;  %v4291_v42 = vmul.f32 %v8975_v36, %v4252_v8  ;;  %v4211_v23 = vadd.f32 %v9097_v63, %v3985_v17  ;;  %v3987_v46 = vpop.f32.mrb[27].mxu0 }
 0x432   : > { %v4393_v24 = vmax.f32 %v4361_v14, 0.0  ;;  %v4330_v43 = vadd.f32 %v8982_v20, %v4291_v42  ;;  %v4253_v55 = vadd.f32 %v4211_v23, %v8960_v16  ;;  %v9681_v16 = vld [vmem:[#allocation45_spill] sm:$0xff] }
 0x433   : > { %v3990_v25 = vpop.f32.mrb[28].mxu0 }
 0x434   : > { %4425 = vst [vmem:[%s9003_s20 + $0xd8] sm:$0xff] %v4393_v24  ;;  %v4362_v30 = vadd.f32 %v4330_v43, %v9680_v33  ;;  %v4292_v38 = vmul.f32 %v8975_v36, %v4253_v55  ;;  %v4216_v49 = vadd.f32 %v4215_v1, %v3990_v25  ;;  %v3992_v2 = vpop.f32.mrb[29].mxu0 }
 0x436   : > { %v4394_v41 = vmax.f32 %v4362_v30, 0.0  ;;  %v4331_v35 = vadd.f32 %v8982_v20, %v4292_v38  ;;  %v4254_v63 = vadd.f32 %v4216_v49, %v8965_v0  ;;  %v9682_v0 = vld [vmem:[#allocation49_spill] sm:$0xff] }
 0x437   : > { %v3995_v51 = vpop.f32.mrb[30].mxu0 }
 0x438   : > { %4426 = vst [vmem:[%s9003_s20 + $0xe0] sm:$0xff] %v4394_v41  ;;  %v4363_v56 = vadd.f32 %v4331_v35, %v9681_v16  ;;  %v4293_v40 = vmul.f32 %v8975_v36, %v4254_v63  ;;  %v4221_v52 = vadd.f32 %v9104_v21, %v3995_v51  ;;  %v3997_v4 = vpop.f32.mrb[31].mxu0  ;;  %v9683_v21 = vld [vmem:[#allocation50_spill] sm:$0xff] }
 0x43a   : > { %v4395_v1 = vmax.f32 %v4363_v56, 0.0  ;;  %v4332_v13 = vadd.f32 %v8982_v20, %v4293_v40  ;;  %v4255_v60 = vadd.f32 %v4221_v52, %v8968_v37 }
 0x43c   : > { %4427 = vst [vmem:[%s9003_s20 + $0xe8] sm:$0xff] %v4395_v1  ;;  %v4364_v62 = vadd.f32 %v4332_v13, %v9682_v0  ;;  %v4294_v48 = vmul.f32 %v8975_v36, %v4255_v60 }
 0x43e   : > { %v4396_v11 = vmax.f32 %v4364_v62, 0.0  ;;  %v4333_v6 = vadd.f32 %v8982_v20, %v4294_v48 }
 0x440   : > { %4428 = vst [vmem:[%s9003_s20 + $0xf0] sm:$0xff] %v4396_v11  ;;  %v4365_v9 = vadd.f32 %v4333_v6, %v9683_v21 }
 0x442   : > { %v4397_v37 = vmax.f32 %v4365_v9, 0.0 }
 0x444   : > { %4429 = vst [vmem:[%s9003_s20 + $0xf8] sm:$0xff] %v4397_v37 }
 0x445   : > { %6037 = shalt.err (!%p6034_p7)
}
 0x446   : > { %s6038_s16 = scalar_lea.hbm %s9165_s23, 4096  ;;  %s6042_s15 = scalar_lea.hbm %s9220_s7, 8192 }
 0x447   : > { %p6039_p8 = scmp.ne.s32.totalorder %s9165_s23, %s6038_s16  ;;  %p6043_p1 = scmp.lt.u32.totalorder %s9165_s23, %s9220_s7 }
 0x448   : > { %p6044_p0 = scmp.lt.u32.totalorder %s6042_s15, %s6038_s16  ;;  %p6046_p6 = scmp.lt.u32.totalorder %s6038_s16, %s9165_s23 }
 0x449   : > { %p6040_p11 = pnand %p6039_p8, %p9684_p9 }
 0x44a   : > { %p6045_p5 = por %p6044_p0, %p6043_p1 }
 0x44b   : > { %p6041_p13 = pneg %p6040_p11 }
 0x44c   : > { %p6047_p10 = por %p6046_p6, %p6045_p5 }
 0x44e   : > { %p6048_p12 = pnand %p6047_p10, %p6041_p13 }
 0x450   : > { %6051 = shalt.err (!%p6048_p12)
}
 0x451   : > { %s6098_s29 = smov 128   ;;  %s6099_s8 = smov 8  }
 0x452   : > { %5885 = dma.vmem_to_hbm [thread:$0]  (%p9684_p9), %s9167_s22, 4096, %s9165_s23, %s9172_s9, %s6098_s29, %s6098_s29, %s6099_s8  }
 0x453 PF: > { %p5897_p2 = scmp.ge.s32.totalorder %s6090_s27, 2  ;;  %s4459_s28 = sand.u32 1, %s6078_s24  }
 0x454   : > { %p9685_p3 = scmp.ne.s32.totalorder %s9410_s12, 0  ;;  %s4460_s14 = scalar_lea.sflag [#allocation5], %s4459_s28 }
 0x456   : > { %p5892_p4 = pnand %p5897_p2, %p9685_p3 }
 0x458   : > { %6073 = dma.done.wait (!%p5892_p4), %s4460_s14, 4096  }
 0x459   : > { %6075 = vsyncadd (!%p5892_p4), %s4460_s14, 4294963200  ;;  %p18_p7 = scmp.ge.s32.totalorder %s6165_s30, 4   ;;  %s9686_s24 = smov %s6082_s25 }
 0x45a   : > { %s9687_s25 = smov %s6086_s26  ;;  %s9688_s26 = smov %s6176_s10 }
 0x45b   : > { %s9689_s27 = smov %s6165_s30  ;;  %20 = sbr.rel (!%p18_p7) target bundleno = 4 (0x4), region = 94 }
 0x462   :  { %4465 = vsyncpa [#allocation4], 1 }
 0x463   :  { %4467 = vsyncpa [#allocation4 + $0x1], 1 }
 0x464   :  { %4468 = vsyncpa [#allocation5], 1 }
 0x465   :  { %4470 = vsyncpa [#allocation5 + $0x1], 1 }

</bundles_post_ra>
